<compile_context>
chip_gen: v5e
topology: v5e:2x2
jax: 0.10.0
libtpu: 0.0.40
codegen_flags: <defaults>
</compile_context>

<pallas_src>
import functools

import jax
import jax.numpy as jnp
from jax.experimental import pallas as pl
from jax.experimental.pallas import tpu as pltpu

BN_EPS = 1e-5
LANE = 128


def _round_up(x, m):
    return (x + m - 1) // m * m


def _vmem_cap_bytes():
    """75% of per-core VMEM (64 MiB v7x / 128 MiB v5e-v6e), 48 MiB fallback."""
    try:
        cap = int(pltpu.get_tpu_info().vmem_capacity_bytes)
    except Exception:
        cap = 64 << 20
    return max(cap * 3 // 4, 32 << 20)


def _make_conv_tile(shifts, p_blk):
    """Direct conv over one flattened image: sum of kh*kw shifted matmuls."""
    def conv_tile(x_ref, w_ref):
        acc = None
        for t, off in enumerate(shifts):          # static python loop (kh*kw taps)
            xt = x_ref[0, pl.ds(off, p_blk), :]   # (p_blk, C_in_p), static offset
            y = jnp.dot(xt, w_ref[t], preferred_element_type=jnp.float32)
            acc = y if acc is None else acc + y
        return acc                                # (p_blk, C_pad) f32
    return conv_tile


def _make_stats_kernel(shifts, p_blk):
    conv_tile = _make_conv_tile(shifts, p_blk)

    def kernel(x_ref, w_ref, mask_ref, stats_ref, acc_ref):
        i = pl.program_id(1)

        @pl.when(i == 0)
        def _():
            acc_ref[...] = jnp.zeros_like(acc_ref)

        y = conv_tile(x_ref, w_ref) * mask_ref[...]   # zero out invalid anchors
        acc_ref[0:1, :] += jnp.sum(y, axis=0, keepdims=True)
        acc_ref[1:2, :] += jnp.sum(y * y, axis=0, keepdims=True)

        @pl.when(i == pl.num_programs(1) - 1)
        def _():
            stats_ref[0] = acc_ref[...]

    return kernel


def _make_apply_kernel(shifts, p_blk):
    conv_tile = _make_conv_tile(shifts, p_blk)

    def kernel(x_ref, w_ref, shift_ref, o_ref):
        y = conv_tile(x_ref, w_ref)                   # scale already folded into w
        o_ref[0] = jnp.maximum(y + shift_ref[...], 0.0).astype(o_ref.dtype)

    return kernel


@functools.partial(jax.jit,
                   static_argnames=("stride", "padding", "dilation", "compute_dtype"))
def conv_bn_relu(x, weight, bias, gamma, beta, *, stride=1, padding=0,
                 dilation=1, compute_dtype=jnp.bfloat16):
    """x: (N, C_in, H, W) NCHW; weight: (C_out, C_in, kh, kw) (PyTorch layout)."""
    del bias  # Conv bias followed by train-mode BatchNorm cancels exactly.
    N, C_in, H, W = x.shape
    C_out, _, kh, kw = weight.shape
    s, p, d = stride, padding, dilation

    H_pad, W_pad = H + 2 * p, W + 2 * p
    H_out = (H_pad - d * (kh - 1) - 1) // s + 1
    W_out = (W_pad - d * (kw - 1) - 1) // s + 1
    H_span = (H_out - 1) * s + 1
    W_span = (W_out - 1) * s + 1

    itemsize = jnp.dtype(compute_dtype).itemsize
    row_mult = 8 * max(1, 4 // itemsize)          # 8 rows (f32) / 16 (bf16) / 32 (i8)
    C_in_p = _round_up(C_in, row_mult)
    C_pad = _round_up(C_out, LANE)                # lane-dense weights / output
    # TODO(synk): for C_out << 128, pack multiple output tiles into the lane dim
    # (or store C_out directly) to avoid padded output writes.

    P_blk = _round_up(H_span * W_pad, row_mult)   # anchor rows computed per image
    max_shift = (kh - 1) * d * W_pad + (kw - 1) * d
    L = _round_up(max(H_pad * W_pad, max_shift + P_blk), row_mult)
    shifts = tuple(i * d * W_pad + j * d for i in range(kh) for j in range(kw))
    T = kh * kw

    # --- activation: NCHW -> NHWC once, cast to compute_dtype BEFORE padding,
    #     spatial zero-pad, flatten spatial dims, tail-pad so tap reads stay
    #     in-bounds.  This is the only HBM-resident activation buffer (~1x x).
    xh = jnp.transpose(x, (0, 2, 3, 1)).astype(compute_dtype)
    xh = jnp.pad(xh, ((0, 0), (p, p), (p, p), (0, C_in_p - C_in)))
    x_flat = xh.reshape(N, H_pad * W_pad, C_in_p)
    x_flat = jnp.pad(x_flat, ((0, 0), (0, L - H_pad * W_pad), (0, 0)))
    # TODO(synk): for very large spatial planes (> a few MiB per image), tile the
    # flat spatial dim with a manual halo DMA instead of whole-image blocks.

    n_cores = 2 if N >= 2 else 1                  # megacore split for the stats pass
    N_pad = _round_up(N, n_cores)
    x_stats = (jnp.pad(x_flat, ((0, N_pad - N), (0, 0), (0, 0)))
               if N_pad != N else x_flat)         # zero images contribute 0 to sums
    n_inner = N_pad // n_cores

    # --- weights: (C_out,C_in,kh,kw) -> (T, C_in_p, C_pad); f32 master copy.
    w_f32 = jnp.transpose(weight.astype(jnp.float32), (2, 3, 1, 0)).reshape(T, C_in, C_out)
    w_f32 = jnp.pad(w_f32, ((0, 0), (0, C_in_p - C_in), (0, C_pad - C_out)))
    w_taps = w_f32.astype(compute_dtype)

    # --- validity mask over anchor rows (in-bounds + stride phase), built once.
    pos = jnp.arange(P_blk)
    hh, ww = pos // W_pad, pos % W_pad
    valid = (hh % s == 0) & (hh < H_span) & (ww % s == 0) & (ww < W_span)
    mask = valid.astype(jnp.float32)[:, None]     # (P_blk, 1)

    # --- VMEM budget: real footprint * 1.5, capped per generation.
    est = (2 * L * C_in_p * itemsize              # double-buffered x blocks
           + 2 * P_blk * C_pad * itemsize         # double-buffered out blocks
           + 2 * T * C_in_p * C_pad * itemsize    # weight taps
           + 4 * P_blk * C_pad * 4                # f32 accumulator temporaries
           + 2 * P_blk * 4 + (64 << 10))
    vmem_limit = int(min(max(int(1.5 * est), 4 << 20), _vmem_cap_bytes()))

    # ---------------- pass 1: per-channel sum / sum-of-squares ----------------
    stats = pl.pallas_call(
        _make_stats_kernel(shifts, P_blk),
        out_shape=jax.ShapeDtypeStruct((n_cores, 2, C_pad), jnp.float32),
        grid=(n_cores, n_inner),
        in_specs=[
            pl.BlockSpec((1, L, C_in_p), lambda c, i: (c * n_inner + i, 0, 0)),
            pl.BlockSpec((T, C_in_p, C_pad), lambda c, i: (0, 0, 0)),   # resident
            pl.BlockSpec((P_blk, 1), lambda c, i: (0, 0)),              # resident
        ],
        out_specs=pl.BlockSpec((1, 2, C_pad), lambda c, i: (c, 0, 0)),
        scratch_shapes=[pltpu.VMEM((2, C_pad), jnp.float32)],
        compiler_params=pltpu.CompilerParams(
            dimension_semantics=("parallel", "arbitrary"),
            vmem_limit_bytes=vmem_limit),
    )(x_stats, w_taps, mask)

    # Fold BN batch statistics + gamma/beta into per-channel scale & shift (f32).
    count = float(N * H_out * W_out)
    mean = stats[:, 0, :].sum(axis=0) / count
    var = jnp.maximum(stats[:, 1, :].sum(axis=0) / count - mean * mean, 0.0)
    gamma_p = jnp.pad(gamma.astype(jnp.float32), (0, C_pad - C_out))
    beta_p = jnp.pad(beta.astype(jnp.float32), (0, C_pad - C_out))
    scale = gamma_p * jax.lax.rsqrt(var + BN_EPS)
    shift_row = (beta_p - mean * scale)[None, :]                  # (1, C_pad) f32
    w_scaled = (w_f32 * scale).astype(compute_dtype)              # fold scale into W

    # ---------------- pass 2: relu(conv(x) + shift), fully parallel ------------
    out_flat = pl.pallas_call(
        _make_apply_kernel(shifts, P_blk),
        out_shape=jax.ShapeDtypeStruct((N, P_blk, C_pad), compute_dtype),
        grid=(N,),
        in_specs=[
            pl.BlockSpec((1, L, C_in_p), lambda n: (n, 0, 0)),
            pl.BlockSpec((T, C_in_p, C_pad), lambda n: (0, 0, 0)),
            pl.BlockSpec((1, C_pad), lambda n: (0, 0)),
        ],
        out_specs=pl.BlockSpec((1, P_blk, C_pad), lambda n: (n, 0, 0)),
        compiler_params=pltpu.CompilerParams(
            dimension_semantics=("parallel",),
            vmem_limit_bytes=vmem_limit),
    )(x_flat, w_scaled, shift_row)

    # Extract the valid (strided) anchors and go back to NCHW.
    y = out_flat[:, :H_span * W_pad, :C_out].reshape(N, H_span, W_pad, C_out)
    y = y[:, ::s, ::s, :][:, :H_out, :W_out, :]
    return jnp.transpose(y, (0, 3, 1, 2)).astype(x.dtype)


def _reference(x, weight, bias, gamma, beta, *, stride, padding, dilation):
    y = jax.lax.conv_general_dilated(
        x.astype(jnp.float32), weight.astype(jnp.float32),
        window_strides=(stride, stride),
        padding=[(padding, padding), (padding, padding)],
        rhs_dilation=(dilation, dilation),
        dimension_numbers=("NCHW", "OIHW", "NCHW"),
    ) + bias.reshape(1, -1, 1, 1)
    mean = jnp.mean(y, axis=(0, 2, 3), keepdims=True)
    var = jnp.mean((y - mean) ** 2, axis=(0, 2, 3), keepdims=True)
    y = (y - mean) * jax.lax.rsqrt(var + BN_EPS)
    y = y * gamma.reshape(1, -1, 1, 1) + beta.reshape(1, -1, 1, 1)
    return jnp.maximum(y, 0.0)


if __name__ == "__main__":
    # ConvBNReLU(in_channels=4, out_channels=8, kernel_size=3, ...)
    N, C_in, H, W = 2, 4, 16, 16
    C_out, ksize = 8, 3

    key = jax.random.PRNGKey(0)
    kx, kw_, kb = jax.random.split(key, 3)
    x = jax.random.normal(kx, (N, C_in, H, W), dtype=jnp.float32)
    fan_in = C_in * ksize * ksize
    bound = 1.0 / (fan_in ** 0.5)
    weight = jax.random.uniform(kw_, (C_out, C_in, ksize, ksize),
                                minval=-bound, maxval=bound, dtype=jnp.float32)
    bias = jax.random.uniform(kb, (C_out,), minval=-bound, maxval=bound,
                              dtype=jnp.float32)
    gamma = jnp.ones((C_out,), jnp.float32)     # BatchNorm2d default weight
    beta = jnp.zeros((C_out,), jnp.float32)     # BatchNorm2d default bias

    # Config 1: stride=1, padding=1, f32 compute -> tight check vs reference.
    out = jax.block_until_ready(conv_bn_relu(
        x, weight, bias, gamma, beta,
        stride=1, padding=1, dilation=1, compute_dtype=jnp.float32))
    ref = _reference(x, weight, bias, gamma, beta, stride=1, padding=1, dilation=1)
    assert out.shape == (N, C_out, H, W), out.shape
    assert jnp.allclose(out, ref, atol=1e-4, rtol=1e-4), float(
        jnp.max(jnp.abs(out - ref)))

    # Config 2: stride=2, padding=0, f32 compute (exercises the stride mask /
    # wrapper subsample path).
    out2 = jax.block_until_ready(conv_bn_relu(
        x, weight, bias, gamma, beta,
        stride=2, padding=0, dilation=1, compute_dtype=jnp.float32))
    ref2 = _reference(x, weight, bias, gamma, beta, stride=2, padding=0, dilation=1)
    assert out2.shape == ref2.shape, (out2.shape, ref2.shape)
    assert jnp.allclose(out2, ref2, atol=1e-4, rtol=1e-4), float(
        jnp.max(jnp.abs(out2 - ref2)))

    # Config 3: default bfloat16 compute (MXU fast path); looser tolerance since
    # the batch statistics are computed from bf16-rounded matmul outputs.
    out3 = jax.block_until_ready(conv_bn_relu(
        x, weight, bias, gamma, beta, stride=1, padding=1, dilation=1))
    assert out3.shape == ref.shape, out3.shape
    assert jnp.allclose(out3, ref, atol=1e-1, rtol=1e-1), float(
        jnp.max(jnp.abs(out3 - ref)))

    print("KERNEL_OK")
</pallas_src>

<mosaic_0001>
module attributes {stable_mosaic.version = 11 : i64} {
  func.func @kernel(%arg0: i32, %arg1: i32, %arg2: memref<1x328x8xf32, #tpu.memory_space<vmem>>, %arg3: memref<9x8x128xf32, #tpu.memory_space<vmem>>, %arg4: memref<288x1xf32, #tpu.memory_space<vmem>>, %arg5: memref<1x2x128xf32, #tpu.memory_space<vmem>>, %arg6: memref<2x128xf32, #tpu.memory_space<vmem>>) attributes {dimension_semantics = [#tpu.dimension_semantics<parallel>, #tpu.dimension_semantics<arbitrary>], iteration_bounds = array<i64: 2, 1>, scalar_prefetch = 0 : i64, scratch_operands = 1 : i64, tpu.core_type = #tpu.core_type<tc>, window_params = [{transform_indices = @transform_0, window_bounds = array<i64: 1, 328, 8>}, {pipeline_mode = #tpu.pipeline_mode<synchronous>, transform_indices = @transform_1, window_bounds = array<i64: 9, 8, 128>}, {pipeline_mode = #tpu.pipeline_mode<synchronous>, transform_indices = @transform_2, window_bounds = array<i64: 288, 1>}, {transform_indices = @transform_3, window_bounds = array<i64: 1, 2, 128>}]} {
    %c0_i32 = arith.constant 0 : i32
    %0 = arith.cmpi eq, %arg1, %c0_i32 : i32
    %1 = arith.extui %0 : i1 to i32
    %c0_i32_0 = arith.constant 0 : i32
    %2 = arith.cmpi ne, %1, %c0_i32_0 : i32
    scf.if %2 {
      %cst_62 = arith.constant 0.000000e+00 : f32
      %73 = vector.broadcast %cst_62 : f32 to vector<2x128xf32>
      %c0_63 = arith.constant 0 : index
      %c0_64 = arith.constant 0 : index
      %74 = vector.load %arg6[%c0_63, %c0_64] : memref<2x128xf32, #tpu.memory_space<vmem>>, vector<2x128xf32>
      tpu.vector_store %arg6[%c0_63, %c0_64], %73 {strides = array<i32>} : memref<2x128xf32, #tpu.memory_space<vmem>>, vector<2x128xf32>,
    } else {
    }
    %c0 = arith.constant 0 : index
    %c0_1 = arith.constant 0 : index
    %c0_2 = arith.constant 0 : index
    %3 = vector.load %arg2[%c0, %c0_1, %c0_2] : memref<1x328x8xf32, #tpu.memory_space<vmem>>, vector<1x288x8xf32>
    %4 = vector.shape_cast %3 : vector<1x288x8xf32> to vector<288x8xf32>
    %c0_3 = arith.constant 0 : index
    %c0_4 = arith.constant 0 : index
    %c0_5 = arith.constant 0 : index
    %5 = vector.load %arg3[%c0_3, %c0_4, %c0_5] : memref<9x8x128xf32, #tpu.memory_space<vmem>>, vector<1x8x128xf32>
    %6 = vector.shape_cast %5 : vector<1x8x128xf32> to vector<8x128xf32>
    %cst = arith.constant dense<0.000000e+00> : vector<288x128xf32>
    %7 = tpu.matmul %4, %6, %cst {dimension_numbers = #tpu.dot_dimension_numbers<[1], [0], [0], [1], [0, 0, 1, 1], [], []>} : vector<288x8xf32>, vector<8x128xf32>, vector<288x128xf32> -> vector<288x128xf32>
    %c0_6 = arith.constant 0 : index
    %c1 = arith.constant 1 : index
    %c0_7 = arith.constant 0 : index
    %8 = vector.load %arg2[%c0_6, %c1, %c0_7] : memref<1x328x8xf32, #tpu.memory_space<vmem>>, vector<1x288x8xf32>
    %9 = vector.shape_cast %8 : vector<1x288x8xf32> to vector<288x8xf32>
    %c1_8 = arith.constant 1 : index
    %c0_9 = arith.constant 0 : index
    %c0_10 = arith.constant 0 : index
    %10 = vector.load %arg3[%c1_8, %c0_9, %c0_10] : memref<9x8x128xf32, #tpu.memory_space<vmem>>, vector<1x8x128xf32>
    %11 = vector.shape_cast %10 : vector<1x8x128xf32> to vector<8x128xf32>
    %cst_11 = arith.constant dense<0.000000e+00> : vector<288x128xf32>
    %12 = tpu.matmul %9, %11, %cst_11 {dimension_numbers = #tpu.dot_dimension_numbers<[1], [0], [0], [1], [0, 0, 1, 1], [], []>} : vector<288x8xf32>, vector<8x128xf32>, vector<288x128xf32> -> vector<288x128xf32>
    %13 = arith.addf %7, %12 : vector<288x128xf32>
    %c0_12 = arith.constant 0 : index
    %c2 = arith.constant 2 : index
    %c0_13 = arith.constant 0 : index
    %14 = vector.load %arg2[%c0_12, %c2, %c0_13] : memref<1x328x8xf32, #tpu.memory_space<vmem>>, vector<1x288x8xf32>
    %15 = vector.shape_cast %14 : vector<1x288x8xf32> to vector<288x8xf32>
    %c2_14 = arith.constant 2 : index
    %c0_15 = arith.constant 0 : index
    %c0_16 = arith.constant 0 : index
    %16 = vector.load %arg3[%c2_14, %c0_15, %c0_16] : memref<9x8x128xf32, #tpu.memory_space<vmem>>, vector<1x8x128xf32>
    %17 = vector.shape_cast %16 : vector<1x8x128xf32> to vector<8x128xf32>
    %cst_17 = arith.constant dense<0.000000e+00> : vector<288x128xf32>
    %18 = tpu.matmul %15, %17, %cst_17 {dimension_numbers = #tpu.dot_dimension_numbers<[1], [0], [0], [1], [0, 0, 1, 1], [], []>} : vector<288x8xf32>, vector<8x128xf32>, vector<288x128xf32> -> vector<288x128xf32>
    %19 = arith.addf %13, %18 : vector<288x128xf32>
    %c0_18 = arith.constant 0 : index
    %c18 = arith.constant 18 : index
    %c0_19 = arith.constant 0 : index
    %20 = vector.load %arg2[%c0_18, %c18, %c0_19] : memref<1x328x8xf32, #tpu.memory_space<vmem>>, vector<1x288x8xf32>
    %21 = vector.shape_cast %20 : vector<1x288x8xf32> to vector<288x8xf32>
    %c3 = arith.constant 3 : index
    %c0_20 = arith.constant 0 : index
    %c0_21 = arith.constant 0 : index
    %22 = vector.load %arg3[%c3, %c0_20, %c0_21] : memref<9x8x128xf32, #tpu.memory_space<vmem>>, vector<1x8x128xf32>
    %23 = vector.shape_cast %22 : vector<1x8x128xf32> to vector<8x128xf32>
    %cst_22 = arith.constant dense<0.000000e+00> : vector<288x128xf32>
    %24 = tpu.matmul %21, %23, %cst_22 {dimension_numbers = #tpu.dot_dimension_numbers<[1], [0], [0], [1], [0, 0, 1, 1], [], []>} : vector<288x8xf32>, vector<8x128xf32>, vector<288x128xf32> -> vector<288x128xf32>
    %25 = arith.addf %19, %24 : vector<288x128xf32>
    %c0_23 = arith.constant 0 : index
    %c19 = arith.constant 19 : index
    %c0_24 = arith.constant 0 : index
    %26 = vector.load %arg2[%c0_23, %c19, %c0_24] : memref<1x328x8xf32, #tpu.memory_space<vmem>>, vector<1x288x8xf32>
    %27 = vector.shape_cast %26 : vector<1x288x8xf32> to vector<288x8xf32>
    %c4 = arith.constant 4 : index
    %c0_25 = arith.constant 0 : index
    %c0_26 = arith.constant 0 : index
    %28 = vector.load %arg3[%c4, %c0_25, %c0_26] : memref<9x8x128xf32, #tpu.memory_space<vmem>>, vector<1x8x128xf32>
    %29 = vector.shape_cast %28 : vector<1x8x128xf32> to vector<8x128xf32>
    %cst_27 = arith.constant dense<0.000000e+00> : vector<288x128xf32>
    %30 = tpu.matmul %27, %29, %cst_27 {dimension_numbers = #tpu.dot_dimension_numbers<[1], [0], [0], [1], [0, 0, 1, 1], [], []>} : vector<288x8xf32>, vector<8x128xf32>, vector<288x128xf32> -> vector<288x128xf32>
    %31 = arith.addf %25, %30 : vector<288x128xf32>
    %c0_28 = arith.constant 0 : index
    %c20 = arith.constant 20 : index
    %c0_29 = arith.constant 0 : index
    %32 = vector.load %arg2[%c0_28, %c20, %c0_29] : memref<1x328x8xf32, #tpu.memory_space<vmem>>, vector<1x288x8xf32>
    %33 = vector.shape_cast %32 : vector<1x288x8xf32> to vector<288x8xf32>
    %c5 = arith.constant 5 : index
    %c0_30 = arith.constant 0 : index
    %c0_31 = arith.constant 0 : index
    %34 = vector.load %arg3[%c5, %c0_30, %c0_31] : memref<9x8x128xf32, #tpu.memory_space<vmem>>, vector<1x8x128xf32>
    %35 = vector.shape_cast %34 : vector<1x8x128xf32> to vector<8x128xf32>
    %cst_32 = arith.constant dense<0.000000e+00> : vector<288x128xf32>
    %36 = tpu.matmul %33, %35, %cst_32 {dimension_numbers = #tpu.dot_dimension_numbers<[1], [0], [0], [1], [0, 0, 1, 1], [], []>} : vector<288x8xf32>, vector<8x128xf32>, vector<288x128xf32> -> vector<288x128xf32>
    %37 = arith.addf %31, %36 : vector<288x128xf32>
    %c0_33 = arith.constant 0 : index
    %c36 = arith.constant 36 : index
    %c0_34 = arith.constant 0 : index
    %38 = vector.load %arg2[%c0_33, %c36, %c0_34] : memref<1x328x8xf32, #tpu.memory_space<vmem>>, vector<1x288x8xf32>
    %39 = vector.shape_cast %38 : vector<1x288x8xf32> to vector<288x8xf32>
    %c6 = arith.constant 6 : index
    %c0_35 = arith.constant 0 : index
    %c0_36 = arith.constant 0 : index
    %40 = vector.load %arg3[%c6, %c0_35, %c0_36] : memref<9x8x128xf32, #tpu.memory_space<vmem>>, vector<1x8x128xf32>
    %41 = vector.shape_cast %40 : vector<1x8x128xf32> to vector<8x128xf32>
    %cst_37 = arith.constant dense<0.000000e+00> : vector<288x128xf32>
    %42 = tpu.matmul %39, %41, %cst_37 {dimension_numbers = #tpu.dot_dimension_numbers<[1], [0], [0], [1], [0, 0, 1, 1], [], []>} : vector<288x8xf32>, vector<8x128xf32>, vector<288x128xf32> -> vector<288x128xf32>
    %43 = arith.addf %37, %42 : vector<288x128xf32>
    %c0_38 = arith.constant 0 : index
    %c37 = arith.constant 37 : index
    %c0_39 = arith.constant 0 : index
    %44 = vector.load %arg2[%c0_38, %c37, %c0_39] : memref<1x328x8xf32, #tpu.memory_space<vmem>>, vector<1x288x8xf32>
    %45 = vector.shape_cast %44 : vector<1x288x8xf32> to vector<288x8xf32>
    %c7 = arith.constant 7 : index
    %c0_40 = arith.constant 0 : index
    %c0_41 = arith.constant 0 : index
    %46 = vector.load %arg3[%c7, %c0_40, %c0_41] : memref<9x8x128xf32, #tpu.memory_space<vmem>>, vector<1x8x128xf32>
    %47 = vector.shape_cast %46 : vector<1x8x128xf32> to vector<8x128xf32>
    %cst_42 = arith.constant dense<0.000000e+00> : vector<288x128xf32>
    %48 = tpu.matmul %45, %47, %cst_42 {dimension_numbers = #tpu.dot_dimension_numbers<[1], [0], [0], [1], [0, 0, 1, 1], [], []>} : vector<288x8xf32>, vector<8x128xf32>, vector<288x128xf32> -> vector<288x128xf32>
    %49 = arith.addf %43, %48 : vector<288x128xf32>
    %c0_43 = arith.constant 0 : index
    %c38 = arith.constant 38 : index
    %c0_44 = arith.constant 0 : index
    %50 = vector.load %arg2[%c0_43, %c38, %c0_44] : memref<1x328x8xf32, #tpu.memory_space<vmem>>, vector<1x288x8xf32>
    %51 = vector.shape_cast %50 : vector<1x288x8xf32> to vector<288x8xf32>
    %c8 = arith.constant 8 : index
    %c0_45 = arith.constant 0 : index
    %c0_46 = arith.constant 0 : index
    %52 = vector.load %arg3[%c8, %c0_45, %c0_46] : memref<9x8x128xf32, #tpu.memory_space<vmem>>, vector<1x8x128xf32>
    %53 = vector.shape_cast %52 : vector<1x8x128xf32> to vector<8x128xf32>
    %cst_47 = arith.constant dense<0.000000e+00> : vector<288x128xf32>
    %54 = tpu.matmul %51, %53, %cst_47 {dimension_numbers = #tpu.dot_dimension_numbers<[1], [0], [0], [1], [0, 0, 1, 1], [], []>} : vector<288x8xf32>, vector<8x128xf32>, vector<288x128xf32> -> vector<288x128xf32>
    %55 = arith.addf %49, %54 : vector<288x128xf32>
    %c0_48 = arith.constant 0 : index
    %c0_49 = arith.constant 0 : index
    %56 = vector.load %arg4[%c0_48, %c0_49] : memref<288x1xf32, #tpu.memory_space<vmem>>, vector<288x1xf32>
    %57 = vector.broadcast %56 : vector<288x1xf32> to vector<288x128xf32>
    %58 = arith.mulf %55, %57 : vector<288x128xf32>
    %c0_50 = arith.constant 0 : index
    %c0_51 = arith.constant 0 : index
    %59 = vector.load %arg6[%c0_50, %c0_51] : memref<2x128xf32, #tpu.memory_space<vmem>>, vector<1x128xf32>
    %cst_52 = arith.constant dense<0.000000e+00> : vector<128xf32>
    %60 = vector.multi_reduction <add>, %58, %cst_52 [0] : vector<288x128xf32> to vector<128xf32>
    %61 = vector.shape_cast %60 : vector<128xf32> to vector<1x128xf32>
    %62 = arith.addf %59, %61 : vector<1x128xf32>
    %c0_53 = arith.constant 0 : index
    %c0_54 = arith.constant 0 : index
    %63 = vector.load %arg6[%c0_53, %c0_54] : memref<2x128xf32, #tpu.memory_space<vmem>>, vector<1x128xf32>
    tpu.vector_store %arg6[%c0_53, %c0_54], %62 {strides = array<i32>} : memref<2x128xf32, #tpu.memory_space<vmem>>, vector<1x128xf32>,
    %c1_55 = arith.constant 1 : index
    %c0_56 = arith.constant 0 : index
    %64 = vector.load %arg6[%c1_55, %c0_56] : memref<2x128xf32, #tpu.memory_space<vmem>>, vector<1x128xf32>
    %65 = arith.mulf %58, %58 : vector<288x128xf32>
    %cst_57 = arith.constant dense<0.000000e+00> : vector<128xf32>
    %66 = vector.multi_reduction <add>, %65, %cst_57 [0] : vector<288x128xf32> to vector<128xf32>
    %67 = vector.shape_cast %66 : vector<128xf32> to vector<1x128xf32>
    %68 = arith.addf %64, %67 : vector<1x128xf32>
    %c1_58 = arith.constant 1 : index
    %c0_59 = arith.constant 0 : index
    %69 = vector.load %arg6[%c1_58, %c0_59] : memref<2x128xf32, #tpu.memory_space<vmem>>, vector<1x128xf32>
    tpu.vector_store %arg6[%c1_58, %c0_59], %68 {strides = array<i32>} : memref<2x128xf32, #tpu.memory_space<vmem>>, vector<1x128xf32>,
    %c0_i32_60 = arith.constant 0 : i32
    %70 = arith.cmpi eq, %arg1, %c0_i32_60 : i32
    %71 = arith.extui %70 : i1 to i32
    %c0_i32_61 = arith.constant 0 : i32
    %72 = arith.cmpi ne, %71, %c0_i32_61 : i32
    scf.if %72 {
      %c0_62 = arith.constant 0 : index
      %c0_63 = arith.constant 0 : index
      %73 = vector.load %arg6[%c0_62, %c0_63] : memref<2x128xf32, #tpu.memory_space<vmem>>, vector<2x128xf32>
      %c0_64 = arith.constant 0 : index
      %c0_65 = arith.constant 0 : index
      %c0_66 = arith.constant 0 : index
      %74 = vector.load %arg5[%c0_64, %c0_65, %c0_66] : memref<1x2x128xf32, #tpu.memory_space<vmem>>, vector<1x2x128xf32>
      %75 = vector.shape_cast %74 : vector<1x2x128xf32> to vector<2x128xf32>
      %76 = vector.shape_cast %73 : vector<2x128xf32> to vector<1x2x128xf32>
      tpu.vector_store %arg5[%c0_64, %c0_65, %c0_66], %76 {strides = array<i32>} : memref<1x2x128xf32, #tpu.memory_space<vmem>>, vector<1x2x128xf32>,
    } else {
    }
    return
  }
  func.func @transform_0(%arg0: i32, %arg1: i32) -> (i32, i32, i32) {
    %c1_i32 = arith.constant 1 : i32
    %0 = arith.muli %arg0, %c1_i32 : i32
    %1 = arith.addi %0, %arg1 : i32
    %c0_i32 = arith.constant 0 : i32
    %c0_i32_0 = arith.constant 0 : i32
    %c0_i32_1 = arith.constant 0 : i32
    return %1, %c0_i32, %c0_i32_0 : i32, i32, i32
  }
  func.func @transform_1(%arg0: i32, %arg1: i32) -> (i32, i32, i32) {
    %c0_i32 = arith.constant 0 : i32
    %c0_i32_0 = arith.constant 0 : i32
    %c0_i32_1 = arith.constant 0 : i32
    %c0_i32_2 = arith.constant 0 : i32
    return %c0_i32, %c0_i32_0, %c0_i32_1 : i32, i32, i32
  }
  func.func @transform_2(%arg0: i32, %arg1: i32) -> (i32, i32) {
    %c0_i32 = arith.constant 0 : i32
    %c0_i32_0 = arith.constant 0 : i32
    %c0_i32_1 = arith.constant 0 : i32
    return %c0_i32, %c0_i32_0 : i32, i32
  }
  func.func @transform_3(%arg0: i32, %arg1: i32) -> (i32, i32, i32) {
    %c0_i32 = arith.constant 0 : i32
    %c0_i32_0 = arith.constant 0 : i32
    %c0_i32_1 = arith.constant 0 : i32
    return %arg0, %c0_i32, %c0_i32_0 : i32, i32, i32
  }
}

module attributes {stable_mosaic.version = 11 : i64} {
  func.func @kernel(%arg0: i32, %arg1: memref<1x328x8xf32, #tpu.memory_space<vmem>>, %arg2: memref<9x8x128xf32, #tpu.memory_space<vmem>>, %arg3: memref<1x128xf32, #tpu.memory_space<vmem>>, %arg4: memref<1x288x128xf32, #tpu.memory_space<vmem>>) attributes {dimension_semantics = [#tpu.dimension_semantics<parallel>], iteration_bounds = array<i64: 2>, scalar_prefetch = 0 : i64, scratch_operands = 0 : i64, tpu.core_type = #tpu.core_type<tc>, window_params = [{transform_indices = @transform_0, window_bounds = array<i64: 1, 328, 8>}, {pipeline_mode = #tpu.pipeline_mode<synchronous>, transform_indices = @transform_1, window_bounds = array<i64: 9, 8, 128>}, {pipeline_mode = #tpu.pipeline_mode<synchronous>, transform_indices = @transform_2, window_bounds = array<i64: 1, 128>}, {transform_indices = @transform_3, window_bounds = array<i64: 1, 288, 128>}]} {
    %c0 = arith.constant 0 : index
    %c0_0 = arith.constant 0 : index
    %c0_1 = arith.constant 0 : index
    %0 = vector.load %arg1[%c0, %c0_0, %c0_1] : memref<1x328x8xf32, #tpu.memory_space<vmem>>, vector<1x288x8xf32>
    %1 = vector.shape_cast %0 : vector<1x288x8xf32> to vector<288x8xf32>
    %c0_2 = arith.constant 0 : index
    %c0_3 = arith.constant 0 : index
    %c0_4 = arith.constant 0 : index
    %2 = vector.load %arg2[%c0_2, %c0_3, %c0_4] : memref<9x8x128xf32, #tpu.memory_space<vmem>>, vector<1x8x128xf32>
    %3 = vector.shape_cast %2 : vector<1x8x128xf32> to vector<8x128xf32>
    %cst = arith.constant dense<0.000000e+00> : vector<288x128xf32>
    %4 = tpu.matmul %1, %3, %cst {dimension_numbers = #tpu.dot_dimension_numbers<[1], [0], [0], [1], [0, 0, 1, 1], [], []>} : vector<288x8xf32>, vector<8x128xf32>, vector<288x128xf32> -> vector<288x128xf32>
    %c0_5 = arith.constant 0 : index
    %c1 = arith.constant 1 : index
    %c0_6 = arith.constant 0 : index
    %5 = vector.load %arg1[%c0_5, %c1, %c0_6] : memref<1x328x8xf32, #tpu.memory_space<vmem>>, vector<1x288x8xf32>
    %6 = vector.shape_cast %5 : vector<1x288x8xf32> to vector<288x8xf32>
    %c1_7 = arith.constant 1 : index
    %c0_8 = arith.constant 0 : index
    %c0_9 = arith.constant 0 : index
    %7 = vector.load %arg2[%c1_7, %c0_8, %c0_9] : memref<9x8x128xf32, #tpu.memory_space<vmem>>, vector<1x8x128xf32>
    %8 = vector.shape_cast %7 : vector<1x8x128xf32> to vector<8x128xf32>
    %cst_10 = arith.constant dense<0.000000e+00> : vector<288x128xf32>
    %9 = tpu.matmul %6, %8, %cst_10 {dimension_numbers = #tpu.dot_dimension_numbers<[1], [0], [0], [1], [0, 0, 1, 1], [], []>} : vector<288x8xf32>, vector<8x128xf32>, vector<288x128xf32> -> vector<288x128xf32>
    %10 = arith.addf %4, %9 : vector<288x128xf32>
    %c0_11 = arith.constant 0 : index
    %c2 = arith.constant 2 : index
    %c0_12 = arith.constant 0 : index
    %11 = vector.load %arg1[%c0_11, %c2, %c0_12] : memref<1x328x8xf32, #tpu.memory_space<vmem>>, vector<1x288x8xf32>
    %12 = vector.shape_cast %11 : vector<1x288x8xf32> to vector<288x8xf32>
    %c2_13 = arith.constant 2 : index
    %c0_14 = arith.constant 0 : index
    %c0_15 = arith.constant 0 : index
    %13 = vector.load %arg2[%c2_13, %c0_14, %c0_15] : memref<9x8x128xf32, #tpu.memory_space<vmem>>, vector<1x8x128xf32>
    %14 = vector.shape_cast %13 : vector<1x8x128xf32> to vector<8x128xf32>
    %cst_16 = arith.constant dense<0.000000e+00> : vector<288x128xf32>
    %15 = tpu.matmul %12, %14, %cst_16 {dimension_numbers = #tpu.dot_dimension_numbers<[1], [0], [0], [1], [0, 0, 1, 1], [], []>} : vector<288x8xf32>, vector<8x128xf32>, vector<288x128xf32> -> vector<288x128xf32>
    %16 = arith.addf %10, %15 : vector<288x128xf32>
    %c0_17 = arith.constant 0 : index
    %c18 = arith.constant 18 : index
    %c0_18 = arith.constant 0 : index
    %17 = vector.load %arg1[%c0_17, %c18, %c0_18] : memref<1x328x8xf32, #tpu.memory_space<vmem>>, vector<1x288x8xf32>
    %18 = vector.shape_cast %17 : vector<1x288x8xf32> to vector<288x8xf32>
    %c3 = arith.constant 3 : index
    %c0_19 = arith.constant 0 : index
    %c0_20 = arith.constant 0 : index
    %19 = vector.load %arg2[%c3, %c0_19, %c0_20] : memref<9x8x128xf32, #tpu.memory_space<vmem>>, vector<1x8x128xf32>
    %20 = vector.shape_cast %19 : vector<1x8x128xf32> to vector<8x128xf32>
    %cst_21 = arith.constant dense<0.000000e+00> : vector<288x128xf32>
    %21 = tpu.matmul %18, %20, %cst_21 {dimension_numbers = #tpu.dot_dimension_numbers<[1], [0], [0], [1], [0, 0, 1, 1], [], []>} : vector<288x8xf32>, vector<8x128xf32>, vector<288x128xf32> -> vector<288x128xf32>
    %22 = arith.addf %16, %21 : vector<288x128xf32>
    %c0_22 = arith.constant 0 : index
    %c19 = arith.constant 19 : index
    %c0_23 = arith.constant 0 : index
    %23 = vector.load %arg1[%c0_22, %c19, %c0_23] : memref<1x328x8xf32, #tpu.memory_space<vmem>>, vector<1x288x8xf32>
    %24 = vector.shape_cast %23 : vector<1x288x8xf32> to vector<288x8xf32>
    %c4 = arith.constant 4 : index
    %c0_24 = arith.constant 0 : index
    %c0_25 = arith.constant 0 : index
    %25 = vector.load %arg2[%c4, %c0_24, %c0_25] : memref<9x8x128xf32, #tpu.memory_space<vmem>>, vector<1x8x128xf32>
    %26 = vector.shape_cast %25 : vector<1x8x128xf32> to vector<8x128xf32>
    %cst_26 = arith.constant dense<0.000000e+00> : vector<288x128xf32>
    %27 = tpu.matmul %24, %26, %cst_26 {dimension_numbers = #tpu.dot_dimension_numbers<[1], [0], [0], [1], [0, 0, 1, 1], [], []>} : vector<288x8xf32>, vector<8x128xf32>, vector<288x128xf32> -> vector<288x128xf32>
    %28 = arith.addf %22, %27 : vector<288x128xf32>
    %c0_27 = arith.constant 0 : index
    %c20 = arith.constant 20 : index
    %c0_28 = arith.constant 0 : index
    %29 = vector.load %arg1[%c0_27, %c20, %c0_28] : memref<1x328x8xf32, #tpu.memory_space<vmem>>, vector<1x288x8xf32>
    %30 = vector.shape_cast %29 : vector<1x288x8xf32> to vector<288x8xf32>
    %c5 = arith.constant 5 : index
    %c0_29 = arith.constant 0 : index
    %c0_30 = arith.constant 0 : index
    %31 = vector.load %arg2[%c5, %c0_29, %c0_30] : memref<9x8x128xf32, #tpu.memory_space<vmem>>, vector<1x8x128xf32>
    %32 = vector.shape_cast %31 : vector<1x8x128xf32> to vector<8x128xf32>
    %cst_31 = arith.constant dense<0.000000e+00> : vector<288x128xf32>
    %33 = tpu.matmul %30, %32, %cst_31 {dimension_numbers = #tpu.dot_dimension_numbers<[1], [0], [0], [1], [0, 0, 1, 1], [], []>} : vector<288x8xf32>, vector<8x128xf32>, vector<288x128xf32> -> vector<288x128xf32>
    %34 = arith.addf %28, %33 : vector<288x128xf32>
    %c0_32 = arith.constant 0 : index
    %c36 = arith.constant 36 : index
    %c0_33 = arith.constant 0 : index
    %35 = vector.load %arg1[%c0_32, %c36, %c0_33] : memref<1x328x8xf32, #tpu.memory_space<vmem>>, vector<1x288x8xf32>
    %36 = vector.shape_cast %35 : vector<1x288x8xf32> to vector<288x8xf32>
    %c6 = arith.constant 6 : index
    %c0_34 = arith.constant 0 : index
    %c0_35 = arith.constant 0 : index
    %37 = vector.load %arg2[%c6, %c0_34, %c0_35] : memref<9x8x128xf32, #tpu.memory_space<vmem>>, vector<1x8x128xf32>
    %38 = vector.shape_cast %37 : vector<1x8x128xf32> to vector<8x128xf32>
    %cst_36 = arith.constant dense<0.000000e+00> : vector<288x128xf32>
    %39 = tpu.matmul %36, %38, %cst_36 {dimension_numbers = #tpu.dot_dimension_numbers<[1], [0], [0], [1], [0, 0, 1, 1], [], []>} : vector<288x8xf32>, vector<8x128xf32>, vector<288x128xf32> -> vector<288x128xf32>
    %40 = arith.addf %34, %39 : vector<288x128xf32>
    %c0_37 = arith.constant 0 : index
    %c37 = arith.constant 37 : index
    %c0_38 = arith.constant 0 : index
    %41 = vector.load %arg1[%c0_37, %c37, %c0_38] : memref<1x328x8xf32, #tpu.memory_space<vmem>>, vector<1x288x8xf32>
    %42 = vector.shape_cast %41 : vector<1x288x8xf32> to vector<288x8xf32>
    %c7 = arith.constant 7 : index
    %c0_39 = arith.constant 0 : index
    %c0_40 = arith.constant 0 : index
    %43 = vector.load %arg2[%c7, %c0_39, %c0_40] : memref<9x8x128xf32, #tpu.memory_space<vmem>>, vector<1x8x128xf32>
    %44 = vector.shape_cast %43 : vector<1x8x128xf32> to vector<8x128xf32>
    %cst_41 = arith.constant dense<0.000000e+00> : vector<288x128xf32>
    %45 = tpu.matmul %42, %44, %cst_41 {dimension_numbers = #tpu.dot_dimension_numbers<[1], [0], [0], [1], [0, 0, 1, 1], [], []>} : vector<288x8xf32>, vector<8x128xf32>, vector<288x128xf32> -> vector<288x128xf32>
    %46 = arith.addf %40, %45 : vector<288x128xf32>
    %c0_42 = arith.constant 0 : index
    %c38 = arith.constant 38 : index
    %c0_43 = arith.constant 0 : index
    %47 = vector.load %arg1[%c0_42, %c38, %c0_43] : memref<1x328x8xf32, #tpu.memory_space<vmem>>, vector<1x288x8xf32>
    %48 = vector.shape_cast %47 : vector<1x288x8xf32> to vector<288x8xf32>
    %c8 = arith.constant 8 : index
    %c0_44 = arith.constant 0 : index
    %c0_45 = arith.constant 0 : index
    %49 = vector.load %arg2[%c8, %c0_44, %c0_45] : memref<9x8x128xf32, #tpu.memory_space<vmem>>, vector<1x8x128xf32>
    %50 = vector.shape_cast %49 : vector<1x8x128xf32> to vector<8x128xf32>
    %cst_46 = arith.constant dense<0.000000e+00> : vector<288x128xf32>
    %51 = tpu.matmul %48, %50, %cst_46 {dimension_numbers = #tpu.dot_dimension_numbers<[1], [0], [0], [1], [0, 0, 1, 1], [], []>} : vector<288x8xf32>, vector<8x128xf32>, vector<288x128xf32> -> vector<288x128xf32>
    %52 = arith.addf %46, %51 : vector<288x128xf32>
    %c0_47 = arith.constant 0 : index
    %c0_48 = arith.constant 0 : index
    %53 = vector.load %arg3[%c0_47, %c0_48] : memref<1x128xf32, #tpu.memory_space<vmem>>, vector<1x128xf32>
    %54 = vector.broadcast %53 : vector<1x128xf32> to vector<288x128xf32>
    %55 = arith.addf %52, %54 : vector<288x128xf32>
    %cst_49 = arith.constant 0.000000e+00 : f32
    %56 = vector.broadcast %cst_49 : f32 to vector<288x128xf32>
    %57 = arith.maximumf %55, %56 : vector<288x128xf32>
    %c0_50 = arith.constant 0 : index
    %c0_51 = arith.constant 0 : index
    %c0_52 = arith.constant 0 : index
    %58 = vector.load %arg4[%c0_50, %c0_51, %c0_52] : memref<1x288x128xf32, #tpu.memory_space<vmem>>, vector<1x288x128xf32>
    %59 = vector.shape_cast %58 : vector<1x288x128xf32> to vector<288x128xf32>
    %60 = vector.shape_cast %57 : vector<288x128xf32> to vector<1x288x128xf32>
    tpu.vector_store %arg4[%c0_50, %c0_51, %c0_52], %60 {strides = array<i32>} : memref<1x288x128xf32, #tpu.memory_space<vmem>>, vector<1x288x128xf32>,
    return
  }
  func.func @transform_0(%arg0: i32) -> (i32, i32, i32) {
    %c0_i32 = arith.constant 0 : i32
    %c0_i32_0 = arith.constant 0 : i32
    %c0_i32_1 = arith.constant 0 : i32
    return %arg0, %c0_i32, %c0_i32_0 : i32, i32, i32
  }
  func.func @transform_1(%arg0: i32) -> (i32, i32, i32) {
    %c0_i32 = arith.constant 0 : i32
    %c0_i32_0 = arith.constant 0 : i32
    %c0_i32_1 = arith.constant 0 : i32
    %c0_i32_2 = arith.constant 0 : i32
    return %c0_i32, %c0_i32_0, %c0_i32_1 : i32, i32, i32
  }
  func.func @transform_2(%arg0: i32) -> (i32, i32) {
    %c0_i32 = arith.constant 0 : i32
    %c0_i32_0 = arith.constant 0 : i32
    %c0_i32_1 = arith.constant 0 : i32
    return %c0_i32, %c0_i32_0 : i32, i32
  }
  func.func @transform_3(%arg0: i32) -> (i32, i32, i32) {
    %c0_i32 = arith.constant 0 : i32
    %c0_i32_0 = arith.constant 0 : i32
    %c0_i32_1 = arith.constant 0 : i32
    return %arg0, %c0_i32, %c0_i32_0 : i32, i32, i32
  }
}

</mosaic_0001>

<bundles_post_ra>
// kernel: conv_bn_relu.3
= control target key start
LH: loop header
LB: loop body
LE: loop exit
PB: predicated region body
PF: predicated region fallthrough
CT: control target
= control target key end

     0   :  { %s3413_s12 = smov 0   ;;  %s4340_s0 = inlined_call_operand.vmem [shape: f32[2,328,8], index: 0, kind: input, shape index: {}]   ;;  %s4341_s1 = inlined_call_operand.vmem [shape: f32[9,8,128], index: 1, kind: input, shape index: {}]   ;;  %s4342_s2 = inlined_call_operand.vmem [shape: f32[1,128], index: 2, kind: input, shape index: {}]   ;;  %s4343_s3 = inlined_call_operand.vmem [shape: f32[2,288,128], index: 3, kind: output, shape index: {}]  }
   0x1 LB: > { %s3029_s13 = sadd.s32 4294967295, %s3391_s12   ;;  %p3033_p0 = scmp.ge.s32.totalorder %s3391_s12, 1  ;;  %s3391_s12 = sphi %s3413_s12, %s13_s12  }
   0x2   : > { %p137_p1 = scmp.lt.s32.totalorder %s3391_s12, 3 }
   0x4   : > { %p138_p2 = pnand %p3033_p0, %p137_p1 }
   0x5   : > { %p161_p3 = scmp.lt.s32.totalorder (!%p138_p2), %s3029_s13, 1 }
   0x6   : > { %141 = sbr.rel (%p138_p2) target bundleno = 799 (0x31f), region = 32 }
   0xb   : > { %v3036_v0 = vld [vmem:[%s4341_s1 + $0x8] sm:$0xff]  ;;  %v3109_v1 = vld [vmem:[%s4341_s1 + $0x10] sm:$0xff]  ;;  %v3146_v2 = vld [vmem:[%s4341_s1 + $0x18] sm:$0xff]  ;;  %s4345_s13 = smov (!%p161_p3, %s3029_s13), 1  ;;  %vm246_vm0 = vcmask 64512  }
   0xc   : > { %3370 = vmatpush.msra.mxu1 %v3036_v0  ;;  %3371 = vmatpush.msra.mxu2 %v3036_v0  ;;  %v207_v3 = vld [vmem:[%s4341_s1] sm:$0xff]  ;;  %s3373_s24 = smul.u32 328, %s4345_s13  ;;  %v3257_v29 = vld [vmem:[%s4341_s1 + $0x30] sm:$0xff]  ;;  %v3294_v30 = vld [vmem:[%s4341_s1 + $0x38] sm:$0xff] }
   0xd   : > { %3372 = vmatpush.msra.mxu3 %v3036_v0  ;;  %v3183_v4 = vld [vmem:[%s4341_s1 + $0x20] sm:$0xff]  ;;  %370 = vmatpush.msra.mxu0 %v3036_v0  ;;  %v3220_v31 = vld [vmem:[%s4341_s1 + $0x28] sm:$0xff]  ;;  %s3374_s11 = smul.u32 288, %s4345_s13 }
   0xe   : > { %874 = vmatpush.msrb.mxu2 %v3109_v1  ;;  %603 = vmatpush.msrb.mxu1 %v207_v3  ;;  %s3442_s27 = scalar_lea.vmem %s4340_s0, %s3373_s24  ;;  %v3331_v36 = vld [vmem:[%s4341_s1 + $0x40] sm:$0xff] }
   0xf   : > { %1181 = vmatpush.msrb.mxu3 %v3146_v2  ;;  %1488 = vmatpush.msrb.mxu0 %v3183_v4  ;;  %v217_v5 = vld [vmem:[%s3442_s27 + $0x49] sm:$0xff]  ;;  %v226_v6 = vld [vmem:[%s3442_s27 + $0x91] sm:$0xff]  ;;  %v235_v7 = vld [vmem:[%s3442_s27 + $0xd9] sm:$0xff]  ;;  %s4102_s16 = scalar_lea.vmem %s4343_s3, %s3374_s11 }
  0x10   : > { %3046 = vmatmul.msk.f32.vlgmr.msra.gmra.mxu1 %vm246_vm0, %v217_v5  ;;  %3055 = vmatmul.msk.f32.vlgmr.msra.gmra.mxu2 %vm246_vm0, %v226_v6  ;;  %v208_v8 = vld [vmem:[%s3442_s27 + $0x1] sm:$0xff]  ;;  %v218_v9 = vld [vmem:[%s3442_s27 + $0x51] sm:$0xff]  ;;  %v227_v10 = vld [vmem:[%s3442_s27 + $0x99] sm:$0xff] }
  0x11   : > { %3064 = vmatmul.msk.f32.vlgmr.msra.gmra.mxu3 %vm246_vm0, %v235_v7  ;;  %3037 = vmatmul.msk.f32.vlgmr.msra.gmra.mxu0 %vm246_vm0, %v208_v8  ;;  %v236_v11 = vld [vmem:[%s3442_s27 + $0xe1] sm:$0xff]  ;;  %v209_v12 = vld [vmem:[%s3442_s27 + $0x9] sm:$0xff]  ;;  %v219_v13 = vld [vmem:[%s3442_s27 + $0x59] sm:$0xff] }
  0x12   : > { %v228_v14 = vld [vmem:[%s3442_s27 + $0xa1] sm:$0xff]  ;;  %v237_v15 = vld [vmem:[%s3442_s27 + $0xe9] sm:$0xff]  ;;  %v210_v16 = vld [vmem:[%s3442_s27 + $0x11] sm:$0xff]  ;;  %2102 = vmatpush.msra.mxu2 %v3257_v29  ;;  %2409 = vmatpush.msra.mxu3 %v3294_v30 }
  0x13   : > { %v220_v17 = vld [vmem:[%s3442_s27 + $0x61] sm:$0xff]  ;;  %v229_v18 = vld [vmem:[%s3442_s27 + $0xa9] sm:$0xff]  ;;  %v238_v19 = vld [vmem:[%s3442_s27 + $0xf1] sm:$0xff]  ;;  %1795 = vmatpush.msra.mxu1 %v3220_v31  ;;  %2716 = vmatpush.msra.mxu0 %v3331_v36 }
  0x14   : > { %v211_v20 = vld [vmem:[%s3442_s27 + $0x19] sm:$0xff]  ;;  %v221_v21 = vld [vmem:[%s3442_s27 + $0x69] sm:$0xff]  ;;  %v230_v22 = vld [vmem:[%s3442_s27 + $0xb1] sm:$0xff] }
  0x15   : > { %v239_v23 = vld [vmem:[%s3442_s27 + $0xf9] sm:$0xff]  ;;  %v212_v24 = vld [vmem:[%s3442_s27 + $0x21] sm:$0xff]  ;;  %v222_v25 = vld [vmem:[%s3442_s27 + $0x71] sm:$0xff] }
  0x16   : > { %v231_v26 = vld [vmem:[%s3442_s27 + $0xb9] sm:$0xff]  ;;  %v240_v27 = vld [vmem:[%s3442_s27 + $0x101] sm:$0xff]  ;;  %v213_v28 = vld [vmem:[%s3442_s27 + $0x29] sm:$0xff] }
  0x17   : > { %v223_v32 = vld [vmem:[%s3442_s27 + $0x79] sm:$0xff]  ;;  %v232_v33 = vld [vmem:[%s3442_s27 + $0xc1] sm:$0xff]  ;;  %v241_v34 = vld [vmem:[%s3442_s27 + $0x109] sm:$0xff] }
  0x18   : > { %3047 = vmatmul.msk.f32.gmra.mxu1 %vm246_vm0, %v218_v9  ;;  %3056 = vmatmul.msk.f32.gmra.mxu2 %vm246_vm0, %v227_v10  ;;  %v214_v35 = vld [vmem:[%s3442_s27 + $0x31] sm:$0xff]  ;;  %v224_v37 = vld [vmem:[%s3442_s27 + $0x81] sm:$0xff]  ;;  %v233_v38 = vld [vmem:[%s3442_s27 + $0xc9] sm:$0xff] }
  0x19   : > { %3065 = vmatmul.msk.f32.gmra.mxu3 %vm246_vm0, %v236_v11  ;;  %3038 = vmatmul.msk.f32.gmra.mxu0 %vm246_vm0, %v209_v12  ;;  %v242_v39 = vld [vmem:[%s3442_s27 + $0x111] sm:$0xff]  ;;  %v215_v40 = vld [vmem:[%s3442_s27 + $0x39] sm:$0xff]  ;;  %v225_v41 = vld [vmem:[%s3442_s27 + $0x89] sm:$0xff] }
  0x1a   : > { %v234_v42 = vld [vmem:[%s3442_s27 + $0xd1] sm:$0xff]  ;;  %v243_v43 = vld [vmem:[%s3442_s27 + $0x119] sm:$0xff]  ;;  %v216_v44 = vld [vmem:[%s3442_s27 + $0x41] sm:$0xff] }
  0x1b   : > { %v171_v45 = vld [vmem:[%s3442_s27] sm:$0xff]  ;;  %v1020_v47 = vld [vmem:[%s3442_s27 + $0x12] sm:$0xff]  ;;  %v172_v49 = vld [vmem:[%s3442_s27 + $0x8] sm:$0xff] }
  0x1c   : > { %v713_v46 = vld [vmem:[%s3442_s27 + $0x2] sm:$0xff]  ;;  %v1327_v48 = vld [vmem:[%s3442_s27 + $0x13] sm:$0xff]  ;;  %v714_v50 = vld [vmem:[%s3442_s27 + $0xa] sm:$0xff] }
  0x1d   : > { %v1021_v51 = vld [vmem:[%s3442_s27 + $0x1a] sm:$0xff]  ;;  %v173_v53 = vld [vmem:[%s3442_s27 + $0x10] sm:$0xff]  ;;  %v1022_v54 = vld [vmem:[%s3442_s27 + $0x22] sm:$0xff] }
  0x1e   : > { %v1328_v52 = vld [vmem:[%s3442_s27 + $0x1b] sm:$0xff]  ;;  %v1329_v55 = vld [vmem:[%s3442_s27 + $0x23] sm:$0xff]  ;;  %v1330_v58 = vld [vmem:[%s3442_s27 + $0x2b] sm:$0xff] }
  0x1f   : > { %v174_v56 = vld [vmem:[%s3442_s27 + $0x18] sm:$0xff]  ;;  %v1023_v57 = vld [vmem:[%s3442_s27 + $0x2a] sm:$0xff]  ;;  %v175_v59 = vld [vmem:[%s3442_s27 + $0x20] sm:$0xff] }
  0x20   : > { %3048 = vmatmul.msk.f32.gmra.mxu1 %vm246_vm0, %v219_v13  ;;  %3057 = vmatmul.msk.f32.gmra.mxu2 %vm246_vm0, %v228_v14  ;;  %v1024_v60 = vld [vmem:[%s3442_s27 + $0x32] sm:$0xff]  ;;  %v176_v62 = vld [vmem:[%s3442_s27 + $0x28] sm:$0xff]  ;;  %v1025_v63 = vld [vmem:[%s3442_s27 + $0x3a] sm:$0xff] }
  0x21   : > { %3066 = vmatmul.msk.f32.gmra.mxu3 %vm246_vm0, %v237_v15  ;;  %3039 = vmatmul.msk.f32.gmra.mxu0 %vm246_vm0, %v210_v16  ;;  %v1331_v61 = vld [vmem:[%s3442_s27 + $0x33] sm:$0xff]  ;;  %v1332_v0 = vld [vmem:[%s3442_s27 + $0x3b] sm:$0xff]  ;;  %v1333_v3 = vld [vmem:[%s3442_s27 + $0x43] sm:$0xff] }
  0x22   : > { %v177_v1 = vld [vmem:[%s3442_s27 + $0x30] sm:$0xff]  ;;  %v1026_v2 = vld [vmem:[%s3442_s27 + $0x42] sm:$0xff]  ;;  %v178_v5 = vld [vmem:[%s3442_s27 + $0x38] sm:$0xff] }
  0x23   : > { %v1027_v6 = vld [vmem:[%s3442_s27 + $0x4a] sm:$0xff]  ;;  %v179_v12 = vld [vmem:[%s3442_s27 + $0x40] sm:$0xff]  ;;  %v1028_v13 = vld [vmem:[%s3442_s27 + $0x52] sm:$0xff] }
  0x24   : > { %v1334_v8 = vld [vmem:[%s3442_s27 + $0x4b] sm:$0xff]  ;;  %v1335_v15 = vld [vmem:[%s3442_s27 + $0x53] sm:$0xff]  ;;  %v1337_v29 = vld [vmem:[%s3442_s27 + $0x63] sm:$0xff] }
  0x25   : > { %v1338_v36 = vld [vmem:[%s3442_s27 + $0x6b] sm:$0xff] }
  0x28   : > { %3049 = vmatmul.msk.f32.gmra.mxu1 %vm246_vm0, %v220_v17  ;;  %3058 = vmatmul.msk.f32.gmra.mxu2 %vm246_vm0, %v229_v18 }
  0x29   : > { %3067 = vmatmul.msk.f32.gmra.mxu3 %vm246_vm0, %v238_v19  ;;  %3040 = vmatmul.msk.f32.gmra.mxu0 %vm246_vm0, %v211_v20  ;;  %v180_v19 = vld [vmem:[%s3442_s27 + $0x48] sm:$0xff]  ;;  %v1029_v20 = vld [vmem:[%s3442_s27 + $0x5a] sm:$0xff] }
  0x30   : > { %3050 = vmatmul.msk.f32.gmra.mxu1 %vm246_vm0, %v221_v21  ;;  %3059 = vmatmul.msk.f32.gmra.mxu2 %vm246_vm0, %v230_v22  ;;  %v1336_v22 = vld [vmem:[%s3442_s27 + $0x5b] sm:$0xff] }
  0x31   : > { %3068 = vmatmul.msk.f32.gmra.mxu3 %vm246_vm0, %v239_v23  ;;  %3041 = vmatmul.msk.f32.gmra.mxu0 %vm246_vm0, %v212_v24 }
  0x38   : > { %3051 = vmatmul.msk.f32.gmra.mxu1 %vm246_vm0, %v222_v25  ;;  %3060 = vmatmul.msk.f32.gmra.mxu2 %vm246_vm0, %v231_v26  ;;  %v181_v26 = vld [vmem:[%s3442_s27 + $0x50] sm:$0xff] }
  0x39   : > { %3069 = vmatmul.msk.f32.gmra.mxu3 %vm246_vm0, %v240_v27  ;;  %3042 = vmatmul.msk.f32.gmra.mxu0 %vm246_vm0, %v213_v28  ;;  %v1030_v27 = vld [vmem:[%s3442_s27 + $0x62] sm:$0xff] }
  0x40   : > { %3052 = vmatmul.msk.f32.gmra.mxu1 %vm246_vm0, %v223_v32  ;;  %3061 = vmatmul.msk.f32.gmra.mxu2 %vm246_vm0, %v232_v33  ;;  %v182_v33 = vld [vmem:[%s3442_s27 + $0x58] sm:$0xff] }
  0x41   : > { %3070 = vmatmul.msk.f32.gmra.mxu3 %vm246_vm0, %v241_v34  ;;  %3043 = vmatmul.msk.f32.gmra.mxu0 %vm246_vm0, %v214_v35  ;;  %v1031_v34 = vld [vmem:[%s3442_s27 + $0x6a] sm:$0xff] }
  0x48   : > { %3053 = vmatmul.msk.f32.gmra.mxu1 %vm246_vm0, %v224_v37  ;;  %3062 = vmatmul.msk.f32.gmra.mxu2 %vm246_vm0, %v233_v38 }
  0x49   : > { %3071 = vmatmul.msk.f32.gmra.mxu3 %vm246_vm0, %v242_v39  ;;  %3044 = vmatmul.msk.f32.gmra.mxu0 %vm246_vm0, %v215_v40  ;;  %v183_v40 = vld [vmem:[%s3442_s27 + $0x60] sm:$0xff] }
  0x50   : > { %3054 = vmatmul.msk.f32.gmra.mxu1 %vm246_vm0, %v225_v41  ;;  %3063 = vmatmul.msk.f32.gmra.mxu2 %vm246_vm0, %v234_v42  ;;  %v1032_v41 = vld [vmem:[%s3442_s27 + $0x72] sm:$0xff] }
  0x51   : > { %3072 = vmatmul.msk.f32.gmra.mxu3 %vm246_vm0, %v243_v43  ;;  %3045 = vmatmul.msk.f32.gmra.mxu0 %vm246_vm0, %v216_v44  ;;  %v1339_v43 = vld [vmem:[%s3442_s27 + $0x73] sm:$0xff] }
  0x58   : > { %3073 = vmatmul.msk.f32.vlgmr.msrb.gmra.mxu1 %vm246_vm0, %v171_v45  ;;  %3110 = vmatmul.msk.f32.vlgmr.msrb.gmra.mxu2 %vm246_vm0, %v713_v46 }
  0x59   : > { %3147 = vmatmul.msk.f32.vlgmr.msrb.gmra.mxu3 %vm246_vm0, %v1020_v47  ;;  %3184 = vmatmul.msk.f32.vlgmr.msrb.gmra.mxu0 %vm246_vm0, %v1327_v48  ;;  %v1033_v48 = vld [vmem:[%s3442_s27 + $0x7a] sm:$0xff] }
  0x60   : > { %3074 = vmatmul.msk.f32.gmra.mxu1 %vm246_vm0, %v172_v49  ;;  %3111 = vmatmul.msk.f32.gmra.mxu2 %vm246_vm0, %v714_v50  ;;  %v1340_v50 = vld [vmem:[%s3442_s27 + $0x7b] sm:$0xff] }
  0x61   : > { %3148 = vmatmul.msk.f32.gmra.mxu3 %vm246_vm0, %v1021_v51  ;;  %3185 = vmatmul.msk.f32.gmra.mxu0 %vm246_vm0, %v1328_v52 }
  0x68   : > { %3075 = vmatmul.msk.f32.gmra.mxu1 %vm246_vm0, %v173_v53  ;;  %3112 = vmatmul.msk.f32.gmra.mxu2 %vm246_vm0, %v1020_v47  ;;  %v184_v47 = vld [vmem:[%s3442_s27 + $0x68] sm:$0xff] }
  0x69   : > { %3149 = vmatmul.msk.f32.gmra.mxu3 %vm246_vm0, %v1022_v54  ;;  %3186 = vmatmul.msk.f32.gmra.mxu0 %vm246_vm0, %v1329_v55  ;;  %v1034_v55 = vld [vmem:[%s3442_s27 + $0x82] sm:$0xff] }
  0x70   : > { %3076 = vmatmul.msk.f32.gmra.mxu1 %vm246_vm0, %v174_v56  ;;  %3113 = vmatmul.msk.f32.gmra.mxu2 %vm246_vm0, %v1021_v51 }
  0x71   : > { %3150 = vmatmul.msk.f32.gmra.mxu3 %vm246_vm0, %v1023_v57  ;;  %3187 = vmatmul.msk.f32.gmra.mxu0 %vm246_vm0, %v1330_v58 }
  0x78   : > { %3077 = vmatmul.msk.f32.gmra.mxu1 %vm246_vm0, %v175_v59  ;;  %3114 = vmatmul.msk.f32.gmra.mxu2 %vm246_vm0, %v1022_v54  ;;  %v185_v54 = vld [vmem:[%s3442_s27 + $0x70] sm:$0xff] }
  0x79   : > { %3151 = vmatmul.msk.f32.gmra.mxu3 %vm246_vm0, %v1024_v60  ;;  %3188 = vmatmul.msk.f32.gmra.mxu0 %vm246_vm0, %v1331_v61  ;;  %v186_v61 = vld [vmem:[%s3442_s27 + $0x78] sm:$0xff] }
  0x80   : > { %3078 = vmatmul.msk.f32.gmra.mxu1 %vm246_vm0, %v176_v62  ;;  %3115 = vmatmul.msk.f32.gmra.mxu2 %vm246_vm0, %v1023_v57  ;;  %v1341_v57 = vld [vmem:[%s3442_s27 + $0x83] sm:$0xff] }
  0x81   : > { %3152 = vmatmul.msk.f32.gmra.mxu3 %vm246_vm0, %v1025_v63  ;;  %3189 = vmatmul.msk.f32.gmra.mxu0 %vm246_vm0, %v1332_v0  ;;  %v1035_v62 = vld [vmem:[%s3442_s27 + $0x8a] sm:$0xff] }
  0x82   : > { %v1342_v0 = vld [vmem:[%s3442_s27 + $0x8b] sm:$0xff] }
  0x88   : > { %3079 = vmatmul.msk.f32.gmra.mxu1 %vm246_vm0, %v177_v1  ;;  %3116 = vmatmul.msk.f32.gmra.mxu2 %vm246_vm0, %v1024_v60 }
  0x89   : > { %3153 = vmatmul.msk.f32.gmra.mxu3 %vm246_vm0, %v1026_v2  ;;  %3190 = vmatmul.msk.f32.gmra.mxu0 %vm246_vm0, %v1333_v3 }
  0x8d   : > { %v3579_v4 = vpop.f32.mrf.mxu1 }
  0x8e   : > { %v3583_v7 = vpop.f32.mrf.mxu0 }
  0x90   : > { %3080 = vmatmul.msk.f32.gmra.mxu1 %vm246_vm0, %v178_v5  ;;  %3117 = vmatmul.msk.f32.gmra.mxu2 %vm246_vm0, %v1025_v63  ;;  %v187_v5 = vld [vmem:[%s3442_s27 + $0x80] sm:$0xff] }
  0x91   : > { %3154 = vmatmul.msk.f32.gmra.mxu3 %vm246_vm0, %v1027_v6  ;;  %3191 = vmatmul.msk.f32.gmra.mxu0 %vm246_vm0, %v1334_v8 }
  0x93   : > { %v3590_v9 = vpop.f32.mrf.mxu2 }
  0x94   : > { %v3592_v10 = vpop.f32.mrf.mxu3 }
  0x95   : > { %v3594_v11 = vpop.f32.mrf.mxu1 }
  0x96   : > { %v3598_v14 = vpop.f32.mrf.mxu0 }
  0x98   : > { %3081 = vmatmul.msk.f32.gmra.mxu1 %vm246_vm0, %v179_v12  ;;  %3118 = vmatmul.msk.f32.gmra.mxu2 %vm246_vm0, %v1026_v2  ;;  %v1343_v12 = vld [vmem:[%s3442_s27 + $0x93] sm:$0xff] }
  0x99   : > { %3155 = vmatmul.msk.f32.gmra.mxu3 %vm246_vm0, %v1028_v13  ;;  %3192 = vmatmul.msk.f32.gmra.mxu0 %vm246_vm0, %v1335_v15 }
  0x9b   : > { %v3605_v16 = vpop.f32.mrf.mxu2 }
  0x9c   : > { %v3607_v17 = vpop.f32.mrf.mxu3 }
  0x9d   : > { %v3609_v18 = vpop.f32.mrf.mxu1 }
  0x9e   : > { %v3613_v21 = vpop.f32.mrf.mxu0 }
  0xa0   : > { %3082 = vmatmul.msk.f32.gmra.mxu1 %vm246_vm0, %v180_v19  ;;  %3119 = vmatmul.msk.f32.gmra.mxu2 %vm246_vm0, %v1027_v6  ;;  %v1036_v6 = vld [vmem:[%s3442_s27 + $0x92] sm:$0xff] }
  0xa1   : > { %3156 = vmatmul.msk.f32.gmra.mxu3 %vm246_vm0, %v1029_v20  ;;  %3193 = vmatmul.msk.f32.gmra.mxu0 %vm246_vm0, %v1336_v22 }
  0xa3   : > { %v3620_v23 = vpop.f32.mrf.mxu2 }
  0xa4   : > { %v3622_v24 = vpop.f32.mrf.mxu3 }
  0xa5   : > { %v3624_v25 = vpop.f32.mrf.mxu1 }
  0xa6   : > { %v3628_v28 = vpop.f32.mrf.mxu0 }
  0xa8   : > { %3083 = vmatmul.msk.f32.gmra.mxu1 %vm246_vm0, %v181_v26  ;;  %3120 = vmatmul.msk.f32.gmra.mxu2 %vm246_vm0, %v1028_v13  ;;  %v188_v26 = vld [vmem:[%s3442_s27 + $0x88] sm:$0xff] }
  0xa9   : > { %3157 = vmatmul.msk.f32.gmra.mxu3 %vm246_vm0, %v1030_v27  ;;  %3194 = vmatmul.msk.f32.gmra.mxu0 %vm246_vm0, %v1337_v29  ;;  %v1037_v29 = vld [vmem:[%s3442_s27 + $0x9a] sm:$0xff] }
  0xab   : > { %v3635_v30 = vpop.f32.mrf.mxu2 }
  0xac   : > { %v3637_v31 = vpop.f32.mrf.mxu3 }
  0xad   : > { %v3639_v32 = vpop.f32.mrf.mxu1 }
  0xae   : > { %v3643_v35 = vpop.f32.mrf.mxu0 }
  0xb0   : > { %3084 = vmatmul.msk.f32.gmra.mxu1 %vm246_vm0, %v182_v33  ;;  %3121 = vmatmul.msk.f32.gmra.mxu2 %vm246_vm0, %v1029_v20 }
  0xb1   : > { %3158 = vmatmul.msk.f32.gmra.mxu3 %vm246_vm0, %v1031_v34  ;;  %3195 = vmatmul.msk.f32.gmra.mxu0 %vm246_vm0, %v1338_v36 }
  0xb3   : > { %v3650_v37 = vpop.f32.mrf.mxu2 }
  0xb4   : > { %v3652_v38 = vpop.f32.mrf.mxu3 }
  0xb5   : > { %v3654_v39 = vpop.f32.mrf.mxu1 }
  0xb6   : > { %v3658_v42 = vpop.f32.mrf.mxu0 }
  0xb8   : > { %3085 = vmatmul.msk.f32.gmra.mxu1 %vm246_vm0, %v183_v40  ;;  %3122 = vmatmul.msk.f32.gmra.mxu2 %vm246_vm0, %v1030_v27 }
  0xb9   : > { %3159 = vmatmul.msk.f32.gmra.mxu3 %vm246_vm0, %v1032_v41  ;;  %3196 = vmatmul.msk.f32.gmra.mxu0 %vm246_vm0, %v1339_v43 }
  0xbb   : > { %v3665_v44 = vpop.f32.mrf.mxu2 }
  0xbc   : > { %v3667_v45 = vpop.f32.mrf.mxu3 }
  0xbd   : > { %v3669_v46 = vpop.f32.mrf.mxu1 }
  0xbe   : > { %v3673_v49 = vpop.f32.mrf.mxu0 }
  0xc0   : > { %3086 = vmatmul.msk.f32.gmra.mxu1 %vm246_vm0, %v184_v47  ;;  %3123 = vmatmul.msk.f32.gmra.mxu2 %vm246_vm0, %v1031_v34  ;;  %v1344_v34 = vld [vmem:[%s3442_s27 + $0x9b] sm:$0xff] }
  0xc1   : > { %3160 = vmatmul.msk.f32.gmra.mxu3 %vm246_vm0, %v1033_v48  ;;  %3197 = vmatmul.msk.f32.gmra.mxu0 %vm246_vm0, %v1340_v50 }
  0xc3   : > { %v3680_v51 = vpop.f32.mrf.mxu2 }
  0xc4   : > { %v3682_v52 = vpop.f32.mrf.mxu3 }
  0xc5   : > { %v3684_v53 = vpop.f32.mrf.mxu1 }
  0xc6   : > { %v3688_v56 = vpop.f32.mrf.mxu0 }
  0xc8   : > { %3087 = vmatmul.msk.f32.gmra.mxu1 %vm246_vm0, %v185_v54  ;;  %3124 = vmatmul.msk.f32.gmra.mxu2 %vm246_vm0, %v1032_v41  ;;  %v1038_v54 = vld [vmem:[%s3442_s27 + $0xa2] sm:$0xff] }
  0xc9   : > { %3161 = vmatmul.msk.f32.gmra.mxu3 %vm246_vm0, %v1034_v55  ;;  %3198 = vmatmul.msk.f32.gmra.mxu0 %vm246_vm0, %v1341_v57  ;;  %v1345_v57 = vld [vmem:[%s3442_s27 + $0xa3] sm:$0xff] }
  0xcb   : > { %v3695_v58 = vpop.f32.mrf.mxu2 }
  0xcc   : > { %v3697_v59 = vpop.f32.mrf.mxu3 }
  0xcd   : > { %v3699_v60 = vpop.f32.mrf.mxu1 }
  0xce   : > { %v3703_v63 = vpop.f32.mrf.mxu0 }
  0xd0   : > { %3088 = vmatmul.msk.f32.gmra.mxu1 %vm246_vm0, %v186_v61  ;;  %3125 = vmatmul.msk.f32.gmra.mxu2 %vm246_vm0, %v1033_v48  ;;  %v189_v48 = vld [vmem:[%s3442_s27 + $0x90] sm:$0xff] }
  0xd1   : > { %3162 = vmatmul.msk.f32.gmra.mxu3 %vm246_vm0, %v1035_v62  ;;  %3199 = vmatmul.msk.f32.gmra.mxu0 %vm246_vm0, %v1342_v0 }
  0xd3   : > { %v3710_v1 = vpop.f32.mrf.mxu2 }
  0xd4   : > { %v3712_v2 = vpop.f32.mrf.mxu3 }
  0xd5   : > { %v605_v3 = vpop.f32.mrf.mxu1 }
  0xd6   : > { %v1490_v8 = vpop.f32.mrf.mxu0  ;;  %v606_v13 = vadd.f32 %v605_v3, %v3583_v7 }
  0xd8   : > { %3089 = vmatmul.msk.f32.gmra.mxu1 %vm246_vm0, %v187_v5  ;;  %3126 = vmatmul.msk.f32.gmra.mxu2 %vm246_vm0, %v1034_v55 }
  0xd9   : > { %3163 = vmatmul.msk.f32.gmra.mxu3 %vm246_vm0, %v1036_v6  ;;  %3200 = vmatmul.msk.f32.gmra.mxu0 %vm246_vm0, %v1343_v12 }
  0xdb   : > { %v876_v15 = vpop.f32.mrf.mxu2 }
  0xdc   : > { %v984_v19 = vadd.f32 %v876_v15, %v606_v13  ;;  %v1183_v20 = vpop.f32.mrf.mxu3  ;;  %v1039_v13 = vld [vmem:[%s3442_s27 + $0xaa] sm:$0xff] }
  0xdd   : > { %v608_v22 = vpop.f32.mrf.mxu1 }
  0xde   : > { %v1291_v27 = vadd.f32 %v1183_v20, %v984_v19  ;;  %v1493_v33 = vpop.f32.mrf.mxu0  ;;  %v609_v7 = vadd.f32 %v608_v22, %v3598_v14  ;;  %v1346_v19 = vld [vmem:[%s3442_s27 + $0xab] sm:$0xff] }
  0xe0   : > { %v3725_v36 = vadd.f32 %v1490_v8, %v1291_v27  ;;  %3090 = vmatmul.msk.f32.gmra.mxu1 %vm246_vm0, %v188_v26  ;;  %3127 = vmatmul.msk.f32.gmra.mxu2 %vm246_vm0, %v1035_v62  ;;  %v190_v8 = vld [vmem:[%s3442_s27 + $0x98] sm:$0xff] }
  0xe1   : > { %3164 = vmatmul.msk.f32.gmra.mxu3 %vm246_vm0, %v1037_v29  ;;  %3201 = vmatmul.msk.f32.gmra.mxu0 %vm246_vm0, %v1344_v34 }
  0xe3   : > { %v879_v40 = vpop.f32.mrf.mxu2 }
  0xe4   : > { %v985_v41 = vadd.f32 %v879_v40, %v609_v7  ;;  %v1186_v43 = vpop.f32.mrf.mxu3  ;;  %v1040_v7 = vld [vmem:[%s3442_s27 + $0xb2] sm:$0xff] }
  0xe5   : > { %v611_v47 = vpop.f32.mrf.mxu1 }
  0xe6   : > { %v1292_v50 = vadd.f32 %v1186_v43, %v985_v41  ;;  %v1496_v55 = vpop.f32.mrf.mxu0  ;;  %v612_v14 = vadd.f32 %v611_v47, %v3613_v21  ;;  %v1347_v41 = vld [vmem:[%s3442_s27 + $0xb3] sm:$0xff] }
  0xe8   : > { %v3735_v61 = vadd.f32 %v1493_v33, %v1292_v50  ;;  %3091 = vmatmul.msk.f32.gmra.mxu1 %vm246_vm0, %v189_v48  ;;  %3128 = vmatmul.msk.f32.gmra.mxu2 %vm246_vm0, %v1036_v6  ;;  %v191_v33 = vld [vmem:[%s3442_s27 + $0xa0] sm:$0xff] }
  0xe9   : > { %3165 = vmatmul.msk.f32.gmra.mxu3 %vm246_vm0, %v1038_v54  ;;  %3202 = vmatmul.msk.f32.gmra.mxu0 %vm246_vm0, %v1345_v57 }
  0xeb   : > { %v882_v62 = vpop.f32.mrf.mxu2 }
  0xec   : > { %v986_v0 = vadd.f32 %v882_v62, %v612_v14  ;;  %v1189_v3 = vpop.f32.mrf.mxu3  ;;  %v1041_v14 = vld [vmem:[%s3442_s27 + $0xba] sm:$0xff] }
  0xed   : > { %v614_v5 = vpop.f32.mrf.mxu1 }
  0xee   : > { %v1293_v12 = vadd.f32 %v1189_v3, %v986_v0  ;;  %v1499_v15 = vpop.f32.mrf.mxu0  ;;  %v615_v21 = vadd.f32 %v614_v5, %v3628_v28  ;;  %v1348_v0 = vld [vmem:[%s3442_s27 + $0xbb] sm:$0xff] }
  0xf0   : > { %v3745_v20 = vadd.f32 %v1496_v55, %v1293_v12  ;;  %3092 = vmatmul.msk.f32.gmra.mxu1 %vm246_vm0, %v190_v8  ;;  %3129 = vmatmul.msk.f32.gmra.mxu2 %vm246_vm0, %v1037_v29  ;;  %v192_v55 = vld [vmem:[%s3442_s27 + $0xa8] sm:$0xff] }
  0xf1   : > { %3166 = vmatmul.msk.f32.gmra.mxu3 %vm246_vm0, %v1039_v13  ;;  %3203 = vmatmul.msk.f32.gmra.mxu0 %vm246_vm0, %v1346_v19 }
  0xf3   : > { %v885_v6 = vpop.f32.mrf.mxu2 }
  0xf4   : > { %v987_v22 = vadd.f32 %v885_v6, %v615_v21  ;;  %v1192_v26 = vpop.f32.mrf.mxu3  ;;  %v1042_v21 = vld [vmem:[%s3442_s27 + $0xc2] sm:$0xff] }
  0xf5   : > { %v617_v27 = vpop.f32.mrf.mxu1 }
  0xf6   : > { %v1294_v34 = vadd.f32 %v1192_v26, %v987_v22  ;;  %v1502_v40 = vpop.f32.mrf.mxu0  ;;  %v618_v28 = vadd.f32 %v617_v27, %v3643_v35  ;;  %v1349_v22 = vld [vmem:[%s3442_s27 + $0xc3] sm:$0xff] }
  0xf8   : > { %v3755_v43 = vadd.f32 %v1499_v15, %v1294_v34  ;;  %3093 = vmatmul.msk.f32.gmra.mxu1 %vm246_vm0, %v191_v33  ;;  %3130 = vmatmul.msk.f32.gmra.mxu2 %vm246_vm0, %v1038_v54  ;;  %v193_v15 = vld [vmem:[%s3442_s27 + $0xb0] sm:$0xff] }
  0xf9   : > { %3167 = vmatmul.msk.f32.gmra.mxu3 %vm246_vm0, %v1040_v7  ;;  %3204 = vmatmul.msk.f32.gmra.mxu0 %vm246_vm0, %v1347_v41 }
  0xfb   : > { %v888_v29 = vpop.f32.mrf.mxu2 }
  0xfc   : > { %v988_v47 = vadd.f32 %v888_v29, %v618_v28  ;;  %v1195_v48 = vpop.f32.mrf.mxu3  ;;  %v1043_v28 = vld [vmem:[%s3442_s27 + $0xca] sm:$0xff] }
  0xfd   : > { %v620_v50 = vpop.f32.mrf.mxu1 }
  0xfe   : > { %v1295_v57 = vadd.f32 %v1195_v48, %v988_v47  ;;  %v1505_v62 = vpop.f32.mrf.mxu0  ;;  %v621_v35 = vadd.f32 %v620_v50, %v3658_v42  ;;  %v1350_v47 = vld [vmem:[%s3442_s27 + $0xcb] sm:$0xff] }
 0x100   : > { %v3765_v3 = vadd.f32 %v1502_v40, %v1295_v57  ;;  %3094 = vmatmul.msk.f32.gmra.mxu1 %vm246_vm0, %v192_v55  ;;  %3131 = vmatmul.msk.f32.gmra.mxu2 %vm246_vm0, %v1039_v13  ;;  %v194_v40 = vld [vmem:[%s3442_s27 + $0xb8] sm:$0xff] }
 0x101   : > { %3168 = vmatmul.msk.f32.gmra.mxu3 %vm246_vm0, %v1041_v14  ;;  %3205 = vmatmul.msk.f32.gmra.mxu0 %vm246_vm0, %v1348_v0 }
 0x103   : > { %v891_v54 = vpop.f32.mrf.mxu2 }
 0x104   : > { %v989_v5 = vadd.f32 %v891_v54, %v621_v35  ;;  %v1198_v8 = vpop.f32.mrf.mxu3  ;;  %v1044_v35 = vld [vmem:[%s3442_s27 + $0xd2] sm:$0xff] }
 0x105   : > { %v623_v12 = vpop.f32.mrf.mxu1 }
 0x106   : > { %v1296_v19 = vadd.f32 %v1198_v8, %v989_v5  ;;  %v1508_v6 = vpop.f32.mrf.mxu0  ;;  %v624_v42 = vadd.f32 %v623_v12, %v3673_v49  ;;  %v1351_v5 = vld [vmem:[%s3442_s27 + $0xd3] sm:$0xff] }
 0x108   : > { %v3775_v26 = vadd.f32 %v1505_v62, %v1296_v19  ;;  %3095 = vmatmul.msk.f32.gmra.mxu1 %vm246_vm0, %v193_v15  ;;  %3132 = vmatmul.msk.f32.gmra.mxu2 %vm246_vm0, %v1040_v7  ;;  %v195_v62 = vld [vmem:[%s3442_s27 + $0xc0] sm:$0xff] }
 0x109   : > { %3169 = vmatmul.msk.f32.gmra.mxu3 %vm246_vm0, %v1042_v21  ;;  %3206 = vmatmul.msk.f32.gmra.mxu0 %vm246_vm0, %v1349_v22 }
 0x10b   : > { %v894_v13 = vpop.f32.mrf.mxu2 }
 0x10c   : > { %v990_v27 = vadd.f32 %v894_v13, %v624_v42  ;;  %v1201_v33 = vpop.f32.mrf.mxu3  ;;  %v1045_v42 = vld [vmem:[%s3442_s27 + $0xda] sm:$0xff] }
 0x10d   : > { %v626_v34 = vpop.f32.mrf.mxu1 }
 0x10e   : > { %v1297_v41 = vadd.f32 %v1201_v33, %v990_v27  ;;  %v1511_v29 = vpop.f32.mrf.mxu0  ;;  %v627_v49 = vadd.f32 %v626_v34, %v3688_v56  ;;  %v1352_v27 = vld [vmem:[%s3442_s27 + $0xdb] sm:$0xff] }
 0x110   : > { %v3785_v48 = vadd.f32 %v1508_v6, %v1297_v41  ;;  %3096 = vmatmul.msk.f32.gmra.mxu1 %vm246_vm0, %v194_v40  ;;  %3133 = vmatmul.msk.f32.gmra.mxu2 %vm246_vm0, %v1041_v14  ;;  %v196_v6 = vld [vmem:[%s3442_s27 + $0xc8] sm:$0xff] }
 0x111   : > { %3170 = vmatmul.msk.f32.gmra.mxu3 %vm246_vm0, %v1043_v28  ;;  %3207 = vmatmul.msk.f32.gmra.mxu0 %vm246_vm0, %v1350_v47 }
 0x113   : > { %v897_v7 = vpop.f32.mrf.mxu2 }
 0x114   : > { %v991_v50 = vadd.f32 %v897_v7, %v627_v49  ;;  %v1204_v55 = vpop.f32.mrf.mxu3  ;;  %v1046_v49 = vld [vmem:[%s3442_s27 + $0xe2] sm:$0xff] }
 0x115   : > { %v629_v57 = vpop.f32.mrf.mxu1 }
 0x116   : > { %v1298_v0 = vadd.f32 %v1204_v55, %v991_v50  ;;  %v1514_v54 = vpop.f32.mrf.mxu0  ;;  %v630_v56 = vadd.f32 %v629_v57, %v3703_v63  ;;  %v1353_v50 = vld [vmem:[%s3442_s27 + $0xe3] sm:$0xff] }
 0x118   : > { %v3795_v8 = vadd.f32 %v1511_v29, %v1298_v0  ;;  %3097 = vmatmul.msk.f32.gmra.mxu1 %vm246_vm0, %v195_v62  ;;  %3134 = vmatmul.msk.f32.gmra.mxu2 %vm246_vm0, %v1042_v21  ;;  %v197_v29 = vld [vmem:[%s3442_s27 + $0xd0] sm:$0xff] }
 0x119   : > { %3171 = vmatmul.msk.f32.gmra.mxu3 %vm246_vm0, %v1044_v35  ;;  %3208 = vmatmul.msk.f32.gmra.mxu0 %vm246_vm0, %v1351_v5 }
 0x11b   : > { %v900_v14 = vpop.f32.mrf.mxu2 }
 0x11c   : > { %v992_v12 = vadd.f32 %v900_v14, %v630_v56  ;;  %v1207_v15 = vpop.f32.mrf.mxu3  ;;  %v1047_v56 = vld [vmem:[%s3442_s27 + $0xea] sm:$0xff] }
 0x11d   : > { %v632_v19 = vpop.f32.mrf.mxu1 }
 0x11e   : > { %v1299_v22 = vadd.f32 %v1207_v15, %v992_v12  ;;  %v1517_v13 = vpop.f32.mrf.mxu0  ;;  %v633_v63 = vadd.f32 %v632_v19, %v3579_v4  ;;  %v1354_v12 = vld [vmem:[%s3442_s27 + $0xeb] sm:$0xff] }
 0x120   : > { %v3805_v33 = vadd.f32 %v1514_v54, %v1299_v22  ;;  %3098 = vmatmul.msk.f32.gmra.mxu1 %vm246_vm0, %v196_v6  ;;  %3135 = vmatmul.msk.f32.gmra.mxu2 %vm246_vm0, %v1043_v28  ;;  %v198_v54 = vld [vmem:[%s3442_s27 + $0xd8] sm:$0xff] }
 0x121   : > { %3172 = vmatmul.msk.f32.gmra.mxu3 %vm246_vm0, %v1045_v42  ;;  %3209 = vmatmul.msk.f32.gmra.mxu0 %vm246_vm0, %v1352_v27 }
 0x123   : > { %v903_v21 = vpop.f32.mrf.mxu2 }
 0x124   : > { %v993_v34 = vadd.f32 %v903_v21, %v633_v63  ;;  %v1210_v40 = vpop.f32.mrf.mxu3  ;;  %v1048_v63 = vld [vmem:[%s3442_s27 + $0xf2] sm:$0xff] }
 0x125   : > { %v635_v41 = vpop.f32.mrf.mxu1 }
 0x126   : > { %v1300_v47 = vadd.f32 %v1210_v40, %v993_v34  ;;  %v1520_v7 = vpop.f32.mrf.mxu0  ;;  %v636_v4 = vadd.f32 %v635_v41, %v3594_v11  ;;  %v1355_v34 = vld [vmem:[%s3442_s27 + $0xf3] sm:$0xff] }
 0x128   : > { %v3815_v55 = vadd.f32 %v1517_v13, %v1300_v47  ;;  %3099 = vmatmul.msk.f32.gmra.mxu1 %vm246_vm0, %v197_v29  ;;  %3136 = vmatmul.msk.f32.gmra.mxu2 %vm246_vm0, %v1044_v35  ;;  %v199_v13 = vld [vmem:[%s3442_s27 + $0xe0] sm:$0xff] }
 0x129   : > { %3173 = vmatmul.msk.f32.gmra.mxu3 %vm246_vm0, %v1046_v49  ;;  %3210 = vmatmul.msk.f32.gmra.mxu0 %vm246_vm0, %v1353_v50 }
 0x12b   : > { %v906_v28 = vpop.f32.mrf.mxu2 }
 0x12c   : > { %v994_v57 = vadd.f32 %v906_v28, %v636_v4  ;;  %v1213_v62 = vpop.f32.mrf.mxu3  ;;  %v1049_v4 = vld [vmem:[%s3442_s27 + $0xfa] sm:$0xff] }
 0x12d   : > { %v638_v0 = vpop.f32.mrf.mxu1 }
 0x12e   : > { %v1301_v5 = vadd.f32 %v1213_v62, %v994_v57  ;;  %v1523_v14 = vpop.f32.mrf.mxu0  ;;  %v639_v11 = vadd.f32 %v638_v0, %v3609_v18  ;;  %v1356_v57 = vld [vmem:[%s3442_s27 + $0xfb] sm:$0xff] }
 0x130   : > { %v3825_v15 = vadd.f32 %v1520_v7, %v1301_v5  ;;  %3100 = vmatmul.msk.f32.gmra.mxu1 %vm246_vm0, %v198_v54  ;;  %3137 = vmatmul.msk.f32.gmra.mxu2 %vm246_vm0, %v1045_v42  ;;  %v200_v7 = vld [vmem:[%s3442_s27 + $0xe8] sm:$0xff] }
 0x131   : > { %3174 = vmatmul.msk.f32.gmra.mxu3 %vm246_vm0, %v1047_v56  ;;  %3211 = vmatmul.msk.f32.gmra.mxu0 %vm246_vm0, %v1354_v12 }
 0x133   : > { %v909_v35 = vpop.f32.mrf.mxu2 }
 0x134   : > { %v995_v19 = vadd.f32 %v909_v35, %v639_v11  ;;  %v1216_v6 = vpop.f32.mrf.mxu3  ;;  %v1050_v11 = vld [vmem:[%s3442_s27 + $0x102] sm:$0xff] }
 0x135   : > { %v641_v22 = vpop.f32.mrf.mxu1 }
 0x136   : > { %v1302_v27 = vadd.f32 %v1216_v6, %v995_v19  ;;  %v1526_v21 = vpop.f32.mrf.mxu0  ;;  %v642_v18 = vadd.f32 %v641_v22, %v3624_v25  ;;  %v1357_v19 = vld [vmem:[%s3442_s27 + $0x103] sm:$0xff] }
 0x138   : > { %v3835_v40 = vadd.f32 %v1523_v14, %v1302_v27  ;;  %3101 = vmatmul.msk.f32.gmra.mxu1 %vm246_vm0, %v199_v13  ;;  %3138 = vmatmul.msk.f32.gmra.mxu2 %vm246_vm0, %v1046_v49  ;;  %v201_v14 = vld [vmem:[%s3442_s27 + $0xf0] sm:$0xff] }
 0x139   : > { %3175 = vmatmul.msk.f32.gmra.mxu3 %vm246_vm0, %v1048_v63  ;;  %3212 = vmatmul.msk.f32.gmra.mxu0 %vm246_vm0, %v1355_v34 }
 0x13b   : > { %v912_v42 = vpop.f32.mrf.mxu2 }
 0x13c   : > { %v996_v41 = vadd.f32 %v912_v42, %v642_v18  ;;  %v1219_v29 = vpop.f32.mrf.mxu3  ;;  %v1051_v18 = vld [vmem:[%s3442_s27 + $0x10a] sm:$0xff] }
 0x13d   : > { %v644_v47 = vpop.f32.mrf.mxu1 }
 0x13e   : > { %v1303_v50 = vadd.f32 %v1219_v29, %v996_v41  ;;  %v1529_v28 = vpop.f32.mrf.mxu0  ;;  %v645_v25 = vadd.f32 %v644_v47, %v3639_v32  ;;  %v1358_v41 = vld [vmem:[%s3442_s27 + $0x10b] sm:$0xff] }
 0x140   : > { %v3845_v62 = vadd.f32 %v1526_v21, %v1303_v50  ;;  %3102 = vmatmul.msk.f32.gmra.mxu1 %vm246_vm0, %v200_v7  ;;  %3139 = vmatmul.msk.f32.gmra.mxu2 %vm246_vm0, %v1047_v56  ;;  %v202_v21 = vld [vmem:[%s3442_s27 + $0xf8] sm:$0xff] }
 0x141   : > { %3176 = vmatmul.msk.f32.gmra.mxu3 %vm246_vm0, %v1049_v4  ;;  %3213 = vmatmul.msk.f32.gmra.mxu0 %vm246_vm0, %v1356_v57 }
 0x143   : > { %v915_v49 = vpop.f32.mrf.mxu2 }
 0x144   : > { %v997_v0 = vadd.f32 %v915_v49, %v645_v25  ;;  %v1222_v54 = vpop.f32.mrf.mxu3  ;;  %v1052_v25 = vld [vmem:[%s3442_s27 + $0x112] sm:$0xff] }
 0x145   : > { %v647_v5 = vpop.f32.mrf.mxu1 }
 0x146   : > { %v1304_v12 = vadd.f32 %v1222_v54, %v997_v0  ;;  %v1532_v35 = vpop.f32.mrf.mxu0  ;;  %v648_v32 = vadd.f32 %v647_v5, %v3654_v39  ;;  %v1359_v0 = vld [vmem:[%s3442_s27 + $0x113] sm:$0xff] }
 0x148   : > { %v3855_v6 = vadd.f32 %v1529_v28, %v1304_v12  ;;  %3103 = vmatmul.msk.f32.gmra.mxu1 %vm246_vm0, %v201_v14  ;;  %3140 = vmatmul.msk.f32.gmra.mxu2 %vm246_vm0, %v1048_v63  ;;  %v203_v28 = vld [vmem:[%s3442_s27 + $0x100] sm:$0xff] }
 0x149   : > { %3177 = vmatmul.msk.f32.gmra.mxu3 %vm246_vm0, %v1050_v11  ;;  %3214 = vmatmul.msk.f32.gmra.mxu0 %vm246_vm0, %v1357_v19 }
 0x14b   : > { %v918_v56 = vpop.f32.mrf.mxu2 }
 0x14c   : > { %v998_v22 = vadd.f32 %v918_v56, %v648_v32  ;;  %v1225_v13 = vpop.f32.mrf.mxu3  ;;  %v1053_v32 = vld [vmem:[%s3442_s27 + $0x11a] sm:$0xff] }
 0x14d   : > { %v650_v27 = vpop.f32.mrf.mxu1 }
 0x14e   : > { %v1305_v34 = vadd.f32 %v1225_v13, %v998_v22  ;;  %v1535_v42 = vpop.f32.mrf.mxu0  ;;  %v651_v39 = vadd.f32 %v650_v27, %v3669_v46  ;;  %v1360_v22 = vld [vmem:[%s3442_s27 + $0x11b] sm:$0xff] }
 0x150   : > { %v3865_v29 = vadd.f32 %v1532_v35, %v1305_v34  ;;  %3104 = vmatmul.msk.f32.gmra.mxu1 %vm246_vm0, %v202_v21  ;;  %3141 = vmatmul.msk.f32.gmra.mxu2 %vm246_vm0, %v1049_v4  ;;  %v204_v35 = vld [vmem:[%s3442_s27 + $0x108] sm:$0xff] }
 0x151   : > { %3178 = vmatmul.msk.f32.gmra.mxu3 %vm246_vm0, %v1051_v18  ;;  %3215 = vmatmul.msk.f32.gmra.mxu0 %vm246_vm0, %v1358_v41 }
 0x153   : > { %v921_v63 = vpop.f32.mrf.mxu2 }
 0x154   : > { %v999_v47 = vadd.f32 %v921_v63, %v651_v39  ;;  %v1228_v7 = vpop.f32.mrf.mxu3  ;;  %v1054_v39 = vld [vmem:[%s3442_s27 + $0x122] sm:$0xff] }
 0x155   : > { %v653_v50 = vpop.f32.mrf.mxu1 }
 0x156   : > { %v1306_v57 = vadd.f32 %v1228_v7, %v999_v47  ;;  %v1538_v49 = vpop.f32.mrf.mxu0  ;;  %v654_v46 = vadd.f32 %v653_v50, %v3684_v53  ;;  %v1361_v47 = vld [vmem:[%s3442_s27 + $0x123] sm:$0xff] }
 0x158   : > { %v3875_v54 = vadd.f32 %v1535_v42, %v1306_v57  ;;  %3105 = vmatmul.msk.f32.gmra.mxu1 %vm246_vm0, %v203_v28  ;;  %3142 = vmatmul.msk.f32.gmra.mxu2 %vm246_vm0, %v1050_v11  ;;  %v205_v42 = vld [vmem:[%s3442_s27 + $0x110] sm:$0xff] }
 0x159   : > { %3179 = vmatmul.msk.f32.gmra.mxu3 %vm246_vm0, %v1052_v25  ;;  %3216 = vmatmul.msk.f32.gmra.mxu0 %vm246_vm0, %v1359_v0 }
 0x15b   : > { %v924_v4 = vpop.f32.mrf.mxu2 }
 0x15c   : > { %v1000_v5 = vadd.f32 %v924_v4, %v654_v46  ;;  %v1231_v14 = vpop.f32.mrf.mxu3  ;;  %v1055_v46 = vld [vmem:[%s3442_s27 + $0x12a] sm:$0xff] }
 0x15d   : > { %v656_v12 = vpop.f32.mrf.mxu1 }
 0x15e   : > { %v1307_v19 = vadd.f32 %v1231_v14, %v1000_v5  ;;  %v1541_v56 = vpop.f32.mrf.mxu0  ;;  %v657_v53 = vadd.f32 %v656_v12, %v3699_v60  ;;  %v1362_v5 = vld [vmem:[%s3442_s27 + $0x12b] sm:$0xff] }
 0x160   : > { %v3885_v13 = vadd.f32 %v1538_v49, %v1307_v19  ;;  %3106 = vmatmul.msk.f32.gmra.mxu1 %vm246_vm0, %v204_v35  ;;  %3143 = vmatmul.msk.f32.gmra.mxu2 %vm246_vm0, %v1051_v18  ;;  %v206_v49 = vld [vmem:[%s3442_s27 + $0x118] sm:$0xff] }
 0x161   : > { %3180 = vmatmul.msk.f32.gmra.mxu3 %vm246_vm0, %v1053_v32  ;;  %3217 = vmatmul.msk.f32.gmra.mxu0 %vm246_vm0, %v1360_v22  ;;  %v1941_v22 = vld [vmem:[%s3442_s27 + $0x24] sm:$0xff] }
 0x163   : > { %v927_v11 = vpop.f32.mrf.mxu2 }
 0x164   : > { %v1001_v27 = vadd.f32 %v927_v11, %v657_v53  ;;  %v1234_v21 = vpop.f32.mrf.mxu3  ;;  %v2248_v11 = vld [vmem:[%s3442_s27 + $0x25] sm:$0xff] }
 0x165   : > { %v659_v34 = vpop.f32.mrf.mxu1 }
 0x166   : > { %v1308_v41 = vadd.f32 %v1234_v21, %v1001_v27  ;;  %v1544_v63 = vpop.f32.mrf.mxu0  ;;  %v660_v60 = vadd.f32 %v659_v34, %v3590_v9  ;;  %v2555_v21 = vld [vmem:[%s3442_s27 + $0x26] sm:$0xff] }
 0x168   : > { %v3895_v7 = vadd.f32 %v1541_v56, %v1308_v41  ;;  %3107 = vmatmul.msk.f32.gmra.mxu1 %vm246_vm0, %v205_v42  ;;  %3144 = vmatmul.msk.f32.gmra.mxu2 %vm246_vm0, %v1052_v25  ;;  %v1634_v56 = vld [vmem:[%s3442_s27 + $0x14] sm:$0xff] }
 0x169   : > { %3181 = vmatmul.msk.f32.gmra.mxu3 %vm246_vm0, %v1054_v39  ;;  %3218 = vmatmul.msk.f32.gmra.mxu0 %vm246_vm0, %v1361_v47  ;;  %v1942_v47 = vld [vmem:[%s3442_s27 + $0x2c] sm:$0xff] }
 0x16b   : > { %v930_v18 = vpop.f32.mrf.mxu2 }
 0x16c   : > { %v1002_v50 = vadd.f32 %v930_v18, %v660_v60  ;;  %v1237_v28 = vpop.f32.mrf.mxu3  ;;  %v2249_v18 = vld [vmem:[%s3442_s27 + $0x2d] sm:$0xff] }
 0x16d   : > { %v662_v57 = vpop.f32.mrf.mxu1 }
 0x16e   : > { %v1309_v0 = vadd.f32 %v1237_v28, %v1002_v50  ;;  %v1547_v4 = vpop.f32.mrf.mxu0  ;;  %v663_v9 = vadd.f32 %v662_v57, %v3605_v16  ;;  %v2556_v28 = vld [vmem:[%s3442_s27 + $0x2e] sm:$0xff] }
 0x170   : > { %v3905_v25 = vadd.f32 %v1544_v63, %v1309_v0  ;;  %3108 = vmatmul.msk.f32.gmra.mxu1 %vm246_vm0, %v206_v49  ;;  %3145 = vmatmul.msk.f32.gmra.mxu2 %vm246_vm0, %v1053_v32  ;;  %v1635_v63 = vld [vmem:[%s3442_s27 + $0x1c] sm:$0xff] }
 0x171   : > { %3182 = vmatmul.msk.f32.gmra.mxu3 %vm246_vm0, %v1055_v46  ;;  %3219 = vmatmul.msk.f32.gmra.mxu0 %vm246_vm0, %v1362_v5  ;;  %v1943_v5 = vld [vmem:[%s3442_s27 + $0x34] sm:$0xff] }
 0x173   : > { %v933_v14 = vpop.f32.mrf.mxu2 }
 0x174   : > { %v1003_v12 = vadd.f32 %v933_v14, %v663_v9  ;;  %v1240_v35 = vpop.f32.mrf.mxu3  ;;  %v2250_v14 = vld [vmem:[%s3442_s27 + $0x35] sm:$0xff] }
 0x175   : > { %v665_v19 = vpop.f32.mrf.mxu1 }
 0x176   : > { %v1310_v53 = vadd.f32 %v1240_v35, %v1003_v12  ;;  %v1550_v27 = vpop.f32.mrf.mxu0  ;;  %v666_v16 = vadd.f32 %v665_v19, %v3620_v23  ;;  %v2557_v35 = vld [vmem:[%s3442_s27 + $0x36] sm:$0xff] }
 0x178   : > { %v3916_v32 = vadd.f32 %v1547_v4, %v1310_v53  ;;  %3221 = vmatmul.msk.f32.vlgmr.msra.gmra.mxu1 %vm246_vm0, %v1634_v56  ;;  %3258 = vmatmul.msk.f32.vlgmr.msra.gmra.mxu2 %vm246_vm0, %v1941_v22 }
 0x179   : > { %3295 = vmatmul.msk.f32.vlgmr.msra.gmra.mxu3 %vm246_vm0, %v2248_v11  ;;  %3332 = vmatmul.msk.f32.vlgmr.msra.gmra.mxu0 %vm246_vm0, %v2555_v21  ;;  %v1944_v21 = vld [vmem:[%s3442_s27 + $0x3c] sm:$0xff] }
 0x17b   : > { %v936_v34 = vpop.f32.mrf.mxu2 }
 0x17c   : > { %v1004_v42 = vadd.f32 %v936_v34, %v666_v16  ;;  %v1243_v41 = vpop.f32.mrf.mxu3  ;;  %v2251_v34 = vld [vmem:[%s3442_s27 + $0x3d] sm:$0xff] }
 0x17d   : > { %v668_v39 = vpop.f32.mrf.mxu1 }
 0x17e   : > { %v1311_v60 = vadd.f32 %v1243_v41, %v1004_v42  ;;  %v1553_v50 = vpop.f32.mrf.mxu0  ;;  %v669_v23 = vadd.f32 %v668_v39, %v3635_v30 }
 0x180   : > { %v3927_v57 = vadd.f32 %v1550_v27, %v1311_v60  ;;  %3222 = vmatmul.msk.f32.gmra.mxu1 %vm246_vm0, %v1635_v63  ;;  %3259 = vmatmul.msk.f32.gmra.mxu2 %vm246_vm0, %v1942_v47 }
 0x181   : > { %3296 = vmatmul.msk.f32.gmra.mxu3 %vm246_vm0, %v2249_v18  ;;  %3333 = vmatmul.msk.f32.gmra.mxu0 %vm246_vm0, %v2556_v28 }
 0x183   : > { %v939_v49 = vpop.f32.mrf.mxu2 }
 0x184   : > { %v1005_v0 = vadd.f32 %v939_v49, %v669_v23  ;;  %v1246_v46 = vpop.f32.mrf.mxu3  ;;  %v2252_v23 = vld [vmem:[%s3442_s27 + $0x45] sm:$0xff] }
 0x185   : > { %v671_v4 = vpop.f32.mrf.mxu1 }
 0x186   : > { %v1312_v9 = vadd.f32 %v1246_v46, %v1005_v0  ;;  %v1556_v12 = vpop.f32.mrf.mxu0  ;;  %v672_v30 = vadd.f32 %v671_v4, %v3650_v37 }
 0x188   : > { %v3937_v19 = vadd.f32 %v1553_v50, %v1312_v9  ;;  %3223 = vmatmul.msk.f32.gmra.mxu1 %vm246_vm0, %v1941_v22  ;;  %3260 = vmatmul.msk.f32.gmra.mxu2 %vm246_vm0, %v1943_v5  ;;  %v2558_v22 = vld [vmem:[%s3442_s27 + $0x3e] sm:$0xff] }
 0x189   : > { %3297 = vmatmul.msk.f32.gmra.mxu3 %vm246_vm0, %v2250_v14  ;;  %3334 = vmatmul.msk.f32.gmra.mxu0 %vm246_vm0, %v2557_v35  ;;  %v1945_v50 = vld [vmem:[%s3442_s27 + $0x44] sm:$0xff] }
 0x18b   : > { %v942_v56 = vpop.f32.mrf.mxu2 }
 0x18c   : > { %v1006_v53 = vadd.f32 %v942_v56, %v672_v30  ;;  %v1249_v11 = vpop.f32.mrf.mxu3  ;;  %v2253_v30 = vld [vmem:[%s3442_s27 + $0x4d] sm:$0xff] }
 0x18d   : > { %v674_v27 = vpop.f32.mrf.mxu1 }
 0x18e   : > { %v1313_v16 = vadd.f32 %v1249_v11, %v1006_v53  ;;  %v1559_v42 = vpop.f32.mrf.mxu0  ;;  %v675_v37 = vadd.f32 %v674_v27, %v3665_v44 }
 0x190   : > { %v3947_v41 = vadd.f32 %v1556_v12, %v1313_v16  ;;  %3224 = vmatmul.msk.f32.gmra.mxu1 %vm246_vm0, %v1942_v47  ;;  %3261 = vmatmul.msk.f32.gmra.mxu2 %vm246_vm0, %v1944_v21  ;;  %v2559_v47 = vld [vmem:[%s3442_s27 + $0x46] sm:$0xff] }
 0x191   : > { %3298 = vmatmul.msk.f32.gmra.mxu3 %vm246_vm0, %v2251_v34  ;;  %3335 = vmatmul.msk.f32.gmra.mxu0 %vm246_vm0, %v2558_v22  ;;  %v1946_v12 = vld [vmem:[%s3442_s27 + $0x4c] sm:$0xff] }
 0x193   : > { %v945_v39 = vpop.f32.mrf.mxu2 }
 0x194   : > { %v1007_v63 = vadd.f32 %v945_v39, %v675_v37  ;;  %v1252_v60 = vpop.f32.mrf.mxu3  ;;  %v2254_v37 = vld [vmem:[%s3442_s27 + $0x55] sm:$0xff] }
 0x195   : > { %v677_v18 = vpop.f32.mrf.mxu1 }
 0x196   : > { %v1314_v28 = vadd.f32 %v1252_v60, %v1007_v63  ;;  %v1562_v49 = vpop.f32.mrf.mxu0  ;;  %v678_v44 = vadd.f32 %v677_v18, %v3680_v51 }
 0x198   : > { %v3957_v0 = vadd.f32 %v1559_v42, %v1314_v28  ;;  %3225 = vmatmul.msk.f32.gmra.mxu1 %vm246_vm0, %v1943_v5  ;;  %3262 = vmatmul.msk.f32.gmra.mxu2 %vm246_vm0, %v1945_v50  ;;  %v2560_v5 = vld [vmem:[%s3442_s27 + $0x4e] sm:$0xff] }
 0x199   : > { %3299 = vmatmul.msk.f32.gmra.mxu3 %vm246_vm0, %v2252_v23  ;;  %3336 = vmatmul.msk.f32.gmra.mxu0 %vm246_vm0, %v2559_v47  ;;  %v1947_v42 = vld [vmem:[%s3442_s27 + $0x54] sm:$0xff] }
 0x19b   : > { %v948_v46 = vpop.f32.mrf.mxu2 }
 0x19c   : > { %v1008_v4 = vadd.f32 %v948_v46, %v678_v44  ;;  %v1255_v9 = vpop.f32.mrf.mxu3  ;;  %v2255_v44 = vld [vmem:[%s3442_s27 + $0x5d] sm:$0xff] }
 0x19d   : > { %v680_v14 = vpop.f32.mrf.mxu1 }
 0x19e   : > { %v1315_v35 = vadd.f32 %v1255_v9, %v1008_v4  ;;  %v1565_v56 = vpop.f32.mrf.mxu0  ;;  %v681_v51 = vadd.f32 %v680_v14, %v3695_v58 }
 0x1a0   : > { %v3967_v53 = vadd.f32 %v1562_v49, %v1315_v35  ;;  %3226 = vmatmul.msk.f32.gmra.mxu1 %vm246_vm0, %v1944_v21  ;;  %3263 = vmatmul.msk.f32.gmra.mxu2 %vm246_vm0, %v1946_v12  ;;  %v2561_v21 = vld [vmem:[%s3442_s27 + $0x56] sm:$0xff] }
 0x1a1   : > { %3300 = vmatmul.msk.f32.gmra.mxu3 %vm246_vm0, %v2253_v30  ;;  %3337 = vmatmul.msk.f32.gmra.mxu0 %vm246_vm0, %v2560_v5  ;;  %v1948_v49 = vld [vmem:[%s3442_s27 + $0x5c] sm:$0xff] }
 0x1a3   : > { %v951_v11 = vpop.f32.mrf.mxu2 }
 0x1a4   : > { %v1009_v27 = vadd.f32 %v951_v11, %v681_v51  ;;  %v1258_v16 = vpop.f32.mrf.mxu3  ;;  %v2256_v51 = vld [vmem:[%s3442_s27 + $0x65] sm:$0xff] }
 0x1a5   : > { %v683_v34 = vpop.f32.mrf.mxu1 }
 0x1a6   : > { %v1316_v22 = vadd.f32 %v1258_v16, %v1009_v27  ;;  %v1568_v39 = vpop.f32.mrf.mxu0  ;;  %v684_v58 = vadd.f32 %v683_v34, %v3710_v1 }
 0x1a8   : > { %v3977_v63 = vadd.f32 %v1565_v56, %v1316_v22  ;;  %3227 = vmatmul.msk.f32.gmra.mxu1 %vm246_vm0, %v1945_v50  ;;  %3264 = vmatmul.msk.f32.gmra.mxu2 %vm246_vm0, %v1947_v42  ;;  %v2562_v50 = vld [vmem:[%s3442_s27 + $0x5e] sm:$0xff] }
 0x1a9   : > { %3301 = vmatmul.msk.f32.gmra.mxu3 %vm246_vm0, %v2254_v37  ;;  %3338 = vmatmul.msk.f32.gmra.mxu0 %vm246_vm0, %v2561_v21  ;;  %v1949_v56 = vld [vmem:[%s3442_s27 + $0x64] sm:$0xff] }
 0x1ab   : > { %v954_v60 = vpop.f32.mrf.mxu2 }
 0x1ac   : > { %v1010_v18 = vadd.f32 %v954_v60, %v684_v58  ;;  %v1261_v28 = vpop.f32.mrf.mxu3  ;;  %v2257_v58 = vld [vmem:[%s3442_s27 + $0x6d] sm:$0xff] }
 0x1ad   : > { %v686_v23 = vpop.f32.mrf.mxu1 }
 0x1ae   : > { %v1317_v47 = vadd.f32 %v1261_v28, %v1010_v18  ;;  %v1571_v46 = vpop.f32.mrf.mxu0  ;;  %v687_v1 = vadd.f32 %v686_v23, %v3592_v10 }
 0x1b0   : > { %v3987_v4 = vadd.f32 %v1568_v39, %v1317_v47  ;;  %3228 = vmatmul.msk.f32.gmra.mxu1 %vm246_vm0, %v1946_v12  ;;  %3265 = vmatmul.msk.f32.gmra.mxu2 %vm246_vm0, %v1948_v49  ;;  %v2563_v12 = vld [vmem:[%s3442_s27 + $0x66] sm:$0xff] }
 0x1b1   : > { %3302 = vmatmul.msk.f32.gmra.mxu3 %vm246_vm0, %v2255_v44  ;;  %3339 = vmatmul.msk.f32.gmra.mxu0 %vm246_vm0, %v2562_v50  ;;  %v1950_v39 = vld [vmem:[%s3442_s27 + $0x6c] sm:$0xff] }
 0x1b3   : > { %v957_v9 = vpop.f32.mrf.mxu2 }
 0x1b4   : > { %v1011_v14 = vadd.f32 %v957_v9, %v687_v1  ;;  %v1264_v35 = vpop.f32.mrf.mxu3  ;;  %v2258_v1 = vld [vmem:[%s3442_s27 + $0x75] sm:$0xff] }
 0x1b5   : > { %v689_v30 = vpop.f32.mrf.mxu1 }
 0x1b6   : > { %v1318_v5 = vadd.f32 %v1264_v35, %v1011_v14  ;;  %v1574_v11 = vpop.f32.mrf.mxu0  ;;  %v690_v10 = vadd.f32 %v689_v30, %v3607_v17 }
 0x1b8   : > { %v3997_v27 = vadd.f32 %v1571_v46, %v1318_v5  ;;  %3229 = vmatmul.msk.f32.gmra.mxu1 %vm246_vm0, %v1947_v42  ;;  %3266 = vmatmul.msk.f32.gmra.mxu2 %vm246_vm0, %v1949_v56  ;;  %v2564_v42 = vld [vmem:[%s3442_s27 + $0x6e] sm:$0xff] }
 0x1b9   : > { %3303 = vmatmul.msk.f32.gmra.mxu3 %vm246_vm0, %v2256_v51  ;;  %3340 = vmatmul.msk.f32.gmra.mxu0 %vm246_vm0, %v2563_v12  ;;  %v1951_v46 = vld [vmem:[%s3442_s27 + $0x74] sm:$0xff] }
 0x1bb   : > { %v960_v16 = vpop.f32.mrf.mxu2 }
 0x1bc   : > { %v1012_v34 = vadd.f32 %v960_v16, %v690_v10  ;;  %v1267_v22 = vpop.f32.mrf.mxu3  ;;  %v2259_v10 = vld [vmem:[%s3442_s27 + $0x7d] sm:$0xff] }
 0x1bd   : > { %v692_v37 = vpop.f32.mrf.mxu1 }
 0x1be   : > { %v1319_v21 = vadd.f32 %v1267_v22, %v1012_v34  ;;  %v1577_v60 = vpop.f32.mrf.mxu0  ;;  %v693_v17 = vadd.f32 %v692_v37, %v3622_v24 }
 0x1c0   : > { %v4007_v18 = vadd.f32 %v1574_v11, %v1319_v21  ;;  %3230 = vmatmul.msk.f32.gmra.mxu1 %vm246_vm0, %v1948_v49  ;;  %3267 = vmatmul.msk.f32.gmra.mxu2 %vm246_vm0, %v1950_v39  ;;  %v2565_v49 = vld [vmem:[%s3442_s27 + $0x76] sm:$0xff] }
 0x1c1   : > { %3304 = vmatmul.msk.f32.gmra.mxu3 %vm246_vm0, %v2257_v58  ;;  %3341 = vmatmul.msk.f32.gmra.mxu0 %vm246_vm0, %v2564_v42  ;;  %v1952_v11 = vld [vmem:[%s3442_s27 + $0x7c] sm:$0xff] }
 0x1c3   : > { %v963_v28 = vpop.f32.mrf.mxu2 }
 0x1c4   : > { %v1013_v23 = vadd.f32 %v963_v28, %v693_v17  ;;  %v1270_v47 = vpop.f32.mrf.mxu3  ;;  %v2260_v17 = vld [vmem:[%s3442_s27 + $0x85] sm:$0xff] }
 0x1c5   : > { %v695_v44 = vpop.f32.mrf.mxu1 }
 0x1c6   : > { %v1320_v50 = vadd.f32 %v1270_v47, %v1013_v23  ;;  %v1580_v9 = vpop.f32.mrf.mxu0  ;;  %v696_v24 = vadd.f32 %v695_v44, %v3637_v31 }
 0x1c8   : > { %v4017_v14 = vadd.f32 %v1577_v60, %v1320_v50  ;;  %3231 = vmatmul.msk.f32.gmra.mxu1 %vm246_vm0, %v1949_v56  ;;  %3268 = vmatmul.msk.f32.gmra.mxu2 %vm246_vm0, %v1951_v46  ;;  %v2566_v56 = vld [vmem:[%s3442_s27 + $0x7e] sm:$0xff] }
 0x1c9   : > { %3305 = vmatmul.msk.f32.gmra.mxu3 %vm246_vm0, %v2258_v1  ;;  %3342 = vmatmul.msk.f32.gmra.mxu0 %vm246_vm0, %v2565_v49  ;;  %v1953_v60 = vld [vmem:[%s3442_s27 + $0x84] sm:$0xff] }
 0x1cb   : > { %v966_v35 = vpop.f32.mrf.mxu2 }
 0x1cc   : > { %v1014_v30 = vadd.f32 %v966_v35, %v696_v24  ;;  %v1273_v5 = vpop.f32.mrf.mxu3  ;;  %v2261_v24 = vld [vmem:[%s3442_s27 + $0x8d] sm:$0xff] }
 0x1cd   : > { %v698_v51 = vpop.f32.mrf.mxu1 }
 0x1ce   : > { %v1321_v12 = vadd.f32 %v1273_v5, %v1014_v30  ;;  %v1583_v16 = vpop.f32.mrf.mxu0  ;;  %v699_v31 = vadd.f32 %v698_v51, %v3652_v38 }
 0x1d0   : > { %v4027_v34 = vadd.f32 %v1580_v9, %v1321_v12  ;;  %3232 = vmatmul.msk.f32.gmra.mxu1 %vm246_vm0, %v1950_v39  ;;  %3269 = vmatmul.msk.f32.gmra.mxu2 %vm246_vm0, %v1952_v11  ;;  %v2567_v39 = vld [vmem:[%s3442_s27 + $0x86] sm:$0xff] }
 0x1d1   : > { %3306 = vmatmul.msk.f32.gmra.mxu3 %vm246_vm0, %v2259_v10  ;;  %3343 = vmatmul.msk.f32.gmra.mxu0 %vm246_vm0, %v2566_v56  ;;  %v1954_v9 = vld [vmem:[%s3442_s27 + $0x8c] sm:$0xff] }
 0x1d3   : > { %v969_v22 = vpop.f32.mrf.mxu2 }
 0x1d4   : > { %v1015_v37 = vadd.f32 %v969_v22, %v699_v31  ;;  %v1276_v21 = vpop.f32.mrf.mxu3  ;;  %v2262_v31 = vld [vmem:[%s3442_s27 + $0x95] sm:$0xff] }
 0x1d5   : > { %v701_v58 = vpop.f32.mrf.mxu1 }
 0x1d6   : > { %v1322_v42 = vadd.f32 %v1276_v21, %v1015_v37  ;;  %v1586_v28 = vpop.f32.mrf.mxu0  ;;  %v702_v38 = vadd.f32 %v701_v58, %v3667_v45 }
 0x1d8   : > { %v4037_v23 = vadd.f32 %v1583_v16, %v1322_v42  ;;  %3233 = vmatmul.msk.f32.gmra.mxu1 %vm246_vm0, %v1951_v46  ;;  %3270 = vmatmul.msk.f32.gmra.mxu2 %vm246_vm0, %v1953_v60  ;;  %v2568_v46 = vld [vmem:[%s3442_s27 + $0x8e] sm:$0xff] }
 0x1d9   : > { %3307 = vmatmul.msk.f32.gmra.mxu3 %vm246_vm0, %v2260_v17  ;;  %3344 = vmatmul.msk.f32.gmra.mxu0 %vm246_vm0, %v2567_v39  ;;  %v1955_v16 = vld [vmem:[%s3442_s27 + $0x94] sm:$0xff] }
 0x1db   : > { %v972_v47 = vpop.f32.mrf.mxu2 }
 0x1dc   : > { %v1016_v44 = vadd.f32 %v972_v47, %v702_v38  ;;  %v1279_v50 = vpop.f32.mrf.mxu3  ;;  %v2263_v38 = vld [vmem:[%s3442_s27 + $0x9d] sm:$0xff] }
 0x1dd   : > { %v704_v1 = vpop.f32.mrf.mxu1 }
 0x1de   : > { %v1323_v49 = vadd.f32 %v1279_v50, %v1016_v44  ;;  %v1589_v35 = vpop.f32.mrf.mxu0  ;;  %v705_v45 = vadd.f32 %v704_v1, %v3682_v52 }
 0x1e0   : > { %v4047_v30 = vadd.f32 %v1586_v28, %v1323_v49  ;;  %3234 = vmatmul.msk.f32.gmra.mxu1 %vm246_vm0, %v1952_v11  ;;  %3271 = vmatmul.msk.f32.gmra.mxu2 %vm246_vm0, %v1954_v9  ;;  %v2569_v11 = vld [vmem:[%s3442_s27 + $0x96] sm:$0xff] }
 0x1e1   : > { %3308 = vmatmul.msk.f32.gmra.mxu3 %vm246_vm0, %v2261_v24  ;;  %3345 = vmatmul.msk.f32.gmra.mxu0 %vm246_vm0, %v2568_v46  ;;  %v1956_v28 = vld [vmem:[%s3442_s27 + $0x9c] sm:$0xff] }
 0x1e3   : > { %v975_v5 = vpop.f32.mrf.mxu2 }
 0x1e4   : > { %v1017_v51 = vadd.f32 %v975_v5, %v705_v45  ;;  %v1282_v12 = vpop.f32.mrf.mxu3  ;;  %v2264_v45 = vld [vmem:[%s3442_s27 + $0xa5] sm:$0xff] }
 0x1e5   : > { %v707_v10 = vpop.f32.mrf.mxu1 }
 0x1e6   : > { %v1324_v56 = vadd.f32 %v1282_v12, %v1017_v51  ;;  %v1592_v22 = vpop.f32.mrf.mxu0  ;;  %v708_v52 = vadd.f32 %v707_v10, %v3697_v59  ;;  %v2571_v51 = vld [vmem:[%s3442_s27 + $0xa6] sm:$0xff] }
 0x1e8   : > { %v4057_v37 = vadd.f32 %v1589_v35, %v1324_v56  ;;  %3235 = vmatmul.msk.f32.gmra.mxu1 %vm246_vm0, %v1953_v60  ;;  %3272 = vmatmul.msk.f32.gmra.mxu2 %vm246_vm0, %v1955_v16  ;;  %v2570_v60 = vld [vmem:[%s3442_s27 + $0x9e] sm:$0xff] }
 0x1e9   : > { %3309 = vmatmul.msk.f32.gmra.mxu3 %vm246_vm0, %v2262_v31  ;;  %3346 = vmatmul.msk.f32.gmra.mxu0 %vm246_vm0, %v2569_v11  ;;  %v1957_v35 = vld [vmem:[%s3442_s27 + $0xa4] sm:$0xff] }
 0x1eb   : > { %v978_v21 = vpop.f32.mrf.mxu2 }
 0x1ec   : > { %v1018_v58 = vadd.f32 %v978_v21, %v708_v52  ;;  %v1285_v42 = vpop.f32.mrf.mxu3  ;;  %v4088_v52 = vld [vmem:[%s4342_s2] ss:$0 sm:$0xff] }
 0x1ed   : > { %v710_v17 = vpop.f32.mrf.mxu1 }
 0x1ee   : > { %v1325_v39 = vadd.f32 %v1285_v42, %v1018_v58  ;;  %v1595_v47 = vpop.f32.mrf.mxu0  ;;  %v711_v59 = vadd.f32 %v710_v17, %v3712_v2  ;;  %v2572_v58 = vld [vmem:[%s3442_s27 + $0xae] sm:$0xff] }
 0x1f0   : > { %v4067_v44 = vadd.f32 %v1592_v22, %v1325_v39  ;;  %3236 = vmatmul.msk.f32.gmra.mxu1 %vm246_vm0, %v1954_v9  ;;  %3273 = vmatmul.msk.f32.gmra.mxu2 %vm246_vm0, %v1956_v28  ;;  %v1958_v22 = vld [vmem:[%s3442_s27 + $0xac] sm:$0xff] }
 0x1f1   : > { %3310 = vmatmul.msk.f32.gmra.mxu3 %vm246_vm0, %v2263_v38  ;;  %3347 = vmatmul.msk.f32.gmra.mxu0 %vm246_vm0, %v2570_v60 }
 0x1f3   : > { %v981_v50 = vpop.f32.mrf.mxu2 }
 0x1f4   : > { %v1019_v1 = vadd.f32 %v981_v50, %v711_v59  ;;  %v1288_v49 = vpop.f32.mrf.mxu3  ;;  %v1959_v59 = vld [vmem:[%s3442_s27 + $0xb4] sm:$0xff] }
 0x1f5   : > { %v1797_v24 = vpop.f32.mrf.mxu1 }
 0x1f6   : > { %v1326_v46 = vadd.f32 %v1288_v49, %v1019_v1  ;;  %v2718_v5 = vpop.f32.mrf.mxu0  ;;  %v1905_v2 = vadd.f32 %v1797_v24, %v3725_v36  ;;  %v2266_v1 = vld [vmem:[%s3442_s27 + $0xb5] sm:$0xff] }
 0x1f7   : > { %v2573_v49 = vld [vmem:[%s3442_s27 + $0xb6] sm:$0xff] }
 0x1f8   : > { %v4077_v9 = vadd.f32 %v1595_v47, %v1326_v46  ;;  %3237 = vmatmul.msk.f32.gmra.mxu1 %vm246_vm0, %v1955_v16  ;;  %3274 = vmatmul.msk.f32.gmra.mxu2 %vm246_vm0, %v1957_v35  ;;  %v2265_v16 = vld [vmem:[%s3442_s27 + $0xad] sm:$0xff] }
 0x1f9   : > { %3311 = vmatmul.msk.f32.gmra.mxu3 %vm246_vm0, %v2264_v45  ;;  %3348 = vmatmul.msk.f32.gmra.mxu0 %vm246_vm0, %v2571_v51 }
 0x1fb   : > { %v2104_v12 = vpop.f32.mrf.mxu2 }
 0x1fc   : > { %v2212_v10 = vadd.f32 %v2104_v12, %v1905_v2  ;;  %v2411_v56 = vpop.f32.mrf.mxu3 }
 0x1fd   : > { %v1800_v31 = vpop.f32.mrf.mxu1 }
 0x1fe   : > { %v2519_v11 = vadd.f32 %v2411_v56, %v2212_v10  ;;  %v2721_v21 = vpop.f32.mrf.mxu0  ;;  %v1906_v36 = vadd.f32 %v1800_v31, %v3735_v61  ;;  %v1960_v56 = vld [vmem:[%s3442_s27 + $0xbc] sm:$0xff] }
 0x200   : > { %v2826_v42 = vadd.f32 %v2718_v5, %v2519_v11  ;;  %3238 = vmatmul.msk.f32.gmra.mxu1 %vm246_vm0, %v1956_v28  ;;  %3275 = vmatmul.msk.f32.gmra.mxu2 %vm246_vm0, %v1958_v22 }
 0x201   : > { %3312 = vmatmul.msk.f32.gmra.mxu3 %vm246_vm0, %v2265_v16  ;;  %3349 = vmatmul.msk.f32.gmra.mxu0 %vm246_vm0, %v2572_v58  ;;  %v2574_v16 = vld [vmem:[%s3442_s27 + $0xbe] sm:$0xff] }
 0x202   : > { %v2866_v17 = vadd.f32 %v4088_v52, %v2826_v42 }
 0x203   : > { %v2107_v39 = vpop.f32.mrf.mxu2 }
 0x204   : > { %v2902_v38 = vmax.f32 %v2866_v17, 0.0  ;;  %v2213_v28 = vadd.f32 %v2107_v39, %v1906_v36  ;;  %v2414_v47 = vpop.f32.mrf.mxu3 }
 0x205   : > { %v1803_v60 = vpop.f32.mrf.mxu1 }
 0x206   : > { %2938 = vst [vmem:[%s4102_s16] sm:$0xff] %v2902_v38  ;;  %v2520_v50 = vadd.f32 %v2414_v47, %v2213_v28  ;;  %v2724_v61 = vpop.f32.mrf.mxu0  ;;  %v1907_v46 = vadd.f32 %v1803_v60, %v3745_v20  ;;  %v1961_v28 = vld [vmem:[%s3442_s27 + $0xc4] sm:$0xff] }
 0x208   : > { %v2827_v24 = vadd.f32 %v2721_v21, %v2520_v50  ;;  %3239 = vmatmul.msk.f32.gmra.mxu1 %vm246_vm0, %v1957_v35  ;;  %3276 = vmatmul.msk.f32.gmra.mxu2 %vm246_vm0, %v1959_v59  ;;  %v2267_v35 = vld [vmem:[%s3442_s27 + $0xbd] sm:$0xff]  ;;  %v2575_v50 = vld [vmem:[%s3442_s27 + $0xc6] sm:$0xff] }
 0x209   : > { %3313 = vmatmul.msk.f32.gmra.mxu3 %vm246_vm0, %v2266_v1  ;;  %3350 = vmatmul.msk.f32.gmra.mxu0 %vm246_vm0, %v2573_v49 }
 0x20a   : > { %v2867_v45 = vadd.f32 %v4088_v52, %v2827_v24 }
 0x20b   : > { %v2110_v5 = vpop.f32.mrf.mxu2 }
 0x20c   : > { %v2903_v51 = vmax.f32 %v2867_v45, 0.0  ;;  %v2214_v2 = vadd.f32 %v2110_v5, %v1907_v46  ;;  %v2417_v12 = vpop.f32.mrf.mxu3 }
 0x20d   : > { %v1806_v10 = vpop.f32.mrf.mxu1 }
 0x20e   : > { %2939 = vst [vmem:[%s4102_s16 + $0x8] sm:$0xff] %v2903_v51  ;;  %v2521_v31 = vadd.f32 %v2417_v12, %v2214_v2  ;;  %v2727_v11 = vpop.f32.mrf.mxu0  ;;  %v1908_v20 = vadd.f32 %v1806_v10, %v3755_v43  ;;  %v1962_v51 = vld [vmem:[%s3442_s27 + $0xcc] sm:$0xff] }
 0x20f   : > { %v2576_v10 = vld [vmem:[%s3442_s27 + $0xce] sm:$0xff] }
 0x210   : > { %v2828_v21 = vadd.f32 %v2724_v61, %v2521_v31  ;;  %3240 = vmatmul.msk.f32.gmra.mxu1 %vm246_vm0, %v1958_v22  ;;  %3277 = vmatmul.msk.f32.gmra.mxu2 %vm246_vm0, %v1960_v56  ;;  %v2268_v22 = vld [vmem:[%s3442_s27 + $0xc5] sm:$0xff] }
 0x211   : > { %3314 = vmatmul.msk.f32.gmra.mxu3 %vm246_vm0, %v2267_v35  ;;  %3351 = vmatmul.msk.f32.gmra.mxu0 %vm246_vm0, %v2574_v16 }
 0x212   : > { %v2868_v58 = vadd.f32 %v4088_v52, %v2828_v21 }
 0x213   : > { %v2113_v42 = vpop.f32.mrf.mxu2 }
 0x214   : > { %v2904_v36 = vmax.f32 %v2868_v58, 0.0  ;;  %v2215_v17 = vadd.f32 %v2113_v42, %v1908_v20  ;;  %v2420_v39 = vpop.f32.mrf.mxu3  ;;  %v1963_v42 = vld [vmem:[%s3442_s27 + $0xd4] sm:$0xff] }
 0x215   : > { %v1809_v38 = vpop.f32.mrf.mxu1 }
 0x216   : > { %2940 = vst [vmem:[%s4102_s16 + $0x10] sm:$0xff] %v2904_v36  ;;  %v2522_v47 = vadd.f32 %v2420_v39, %v2215_v17  ;;  %v2730_v60 = vpop.f32.mrf.mxu0  ;;  %v1909_v43 = vadd.f32 %v1809_v38, %v3765_v3  ;;  %v2577_v39 = vld [vmem:[%s3442_s27 + $0xd6] sm:$0xff] }
 0x218   : > { %v2829_v1 = vadd.f32 %v2727_v11, %v2522_v47  ;;  %3241 = vmatmul.msk.f32.gmra.mxu1 %vm246_vm0, %v1959_v59  ;;  %3278 = vmatmul.msk.f32.gmra.mxu2 %vm246_vm0, %v1961_v28  ;;  %v2269_v59 = vld [vmem:[%s3442_s27 + $0xcd] sm:$0xff] }
 0x219   : > { %3315 = vmatmul.msk.f32.gmra.mxu3 %vm246_vm0, %v2268_v22  ;;  %3352 = vmatmul.msk.f32.gmra.mxu0 %vm246_vm0, %v2575_v50 }
 0x21a   : > { %v2869_v61 = vadd.f32 %v4088_v52, %v2829_v1 }
 0x21b   : > { %v2116_v49 = vpop.f32.mrf.mxu2 }
 0x21c   : > { %v2905_v24 = vmax.f32 %v2869_v61, 0.0  ;;  %v2216_v46 = vadd.f32 %v2116_v49, %v1909_v43  ;;  %v2423_v45 = vpop.f32.mrf.mxu3  ;;  %v1964_v61 = vld [vmem:[%s3442_s27 + $0xdc] sm:$0xff] }
 0x21d   : > { %v1812_v5 = vpop.f32.mrf.mxu1 }
 0x21e   : > { %2941 = vst [vmem:[%s4102_s16 + $0x18] sm:$0xff] %v2905_v24  ;;  %v2523_v2 = vadd.f32 %v2423_v45, %v2216_v46  ;;  %v2733_v12 = vpop.f32.mrf.mxu0  ;;  %v1910_v3 = vadd.f32 %v1812_v5, %v3775_v26  ;;  %v2578_v46 = vld [vmem:[%s3442_s27 + $0xde] sm:$0xff] }
 0x220   : > { %v2830_v31 = vadd.f32 %v2730_v60, %v2523_v2  ;;  %3242 = vmatmul.msk.f32.gmra.mxu1 %vm246_vm0, %v1960_v56  ;;  %3279 = vmatmul.msk.f32.gmra.mxu2 %vm246_vm0, %v1962_v51  ;;  %v2270_v56 = vld [vmem:[%s3442_s27 + $0xd5] sm:$0xff] }
 0x221   : > { %3316 = vmatmul.msk.f32.gmra.mxu3 %vm246_vm0, %v2269_v59  ;;  %3353 = vmatmul.msk.f32.gmra.mxu0 %vm246_vm0, %v2576_v10 }
 0x222   : > { %v2870_v35 = vadd.f32 %v4088_v52, %v2830_v31 }
 0x223   : > { %v2119_v11 = vpop.f32.mrf.mxu2 }
 0x224   : > { %v2906_v16 = vmax.f32 %v2870_v35, 0.0  ;;  %v2217_v21 = vadd.f32 %v2119_v11, %v1910_v3  ;;  %v2426_v20 = vpop.f32.mrf.mxu3  ;;  %v1965_v3 = vld [vmem:[%s3442_s27 + $0xe4] sm:$0xff] }
 0x225   : > { %v1815_v58 = vpop.f32.mrf.mxu1 }
 0x226   : > { %2942 = vst [vmem:[%s4102_s16 + $0x20] sm:$0xff] %v2906_v16  ;;  %v2524_v36 = vadd.f32 %v2426_v20, %v2217_v21  ;;  %v2736_v17 = vpop.f32.mrf.mxu0  ;;  %v1911_v26 = vadd.f32 %v1815_v58, %v3785_v48  ;;  %v2579_v16 = vld [vmem:[%s3442_s27 + $0xe6] sm:$0xff] }
 0x228   : > { %v2831_v38 = vadd.f32 %v2733_v12, %v2524_v36  ;;  %3243 = vmatmul.msk.f32.gmra.mxu1 %vm246_vm0, %v1961_v28  ;;  %3280 = vmatmul.msk.f32.gmra.mxu2 %vm246_vm0, %v1963_v42  ;;  %v2271_v28 = vld [vmem:[%s3442_s27 + $0xdd] sm:$0xff] }
 0x229   : > { %3317 = vmatmul.msk.f32.gmra.mxu3 %vm246_vm0, %v2270_v56  ;;  %3354 = vmatmul.msk.f32.gmra.mxu0 %vm246_vm0, %v2577_v39 }
 0x22a   : > { %v2871_v47 = vadd.f32 %v4088_v52, %v2831_v38  ;;  %v1966_v38 = vld [vmem:[%s3442_s27 + $0xec] sm:$0xff] }
 0x22b   : > { %v2122_v22 = vpop.f32.mrf.mxu2 }
 0x22c   : > { %v2907_v60 = vmax.f32 %v2871_v47, 0.0  ;;  %v2218_v50 = vadd.f32 %v2122_v22, %v1911_v26  ;;  %v2429_v1 = vpop.f32.mrf.mxu3  ;;  %v2580_v22 = vld [vmem:[%s3442_s27 + $0xee] sm:$0xff] }
 0x22d   : > { %v1818_v43 = vpop.f32.mrf.mxu1 }
 0x22e   : > { %2943 = vst [vmem:[%s4102_s16 + $0x28] sm:$0xff] %v2907_v60  ;;  %v2525_v49 = vadd.f32 %v2429_v1, %v2218_v50  ;;  %v2739_v24 = vpop.f32.mrf.mxu0  ;;  %v1912_v48 = vadd.f32 %v1818_v43, %v3795_v8 }
 0x230   : > { %v2832_v45 = vadd.f32 %v2736_v17, %v2525_v49  ;;  %3244 = vmatmul.msk.f32.gmra.mxu1 %vm246_vm0, %v1962_v51  ;;  %3281 = vmatmul.msk.f32.gmra.mxu2 %vm246_vm0, %v1964_v61  ;;  %v2272_v51 = vld [vmem:[%s3442_s27 + $0xe5] sm:$0xff] }
 0x231   : > { %3318 = vmatmul.msk.f32.gmra.mxu3 %vm246_vm0, %v2271_v28  ;;  %3355 = vmatmul.msk.f32.gmra.mxu0 %vm246_vm0, %v2578_v46  ;;  %v1967_v46 = vld [vmem:[%s3442_s27 + $0xf4] sm:$0xff] }
 0x232   : > { %v2872_v5 = vadd.f32 %v4088_v52, %v2832_v45 }
 0x233   : > { %v2125_v2 = vpop.f32.mrf.mxu2 }
 0x234   : > { %v2908_v59 = vmax.f32 %v2872_v5, 0.0  ;;  %v2219_v12 = vadd.f32 %v2125_v2, %v1912_v48  ;;  %v2432_v10 = vpop.f32.mrf.mxu3  ;;  %v2581_v5 = vld [vmem:[%s3442_s27 + $0xf6] sm:$0xff] }
 0x235   : > { %v1821_v31 = vpop.f32.mrf.mxu1 }
 0x236   : > { %2944 = vst [vmem:[%s4102_s16 + $0x30] sm:$0xff] %v2908_v59  ;;  %v2526_v35 = vadd.f32 %v2432_v10, %v2219_v12  ;;  %v2742_v11 = vpop.f32.mrf.mxu0  ;;  %v1913_v8 = vadd.f32 %v1821_v31, %v3805_v33 }
 0x238   : > { %v2833_v21 = vadd.f32 %v2739_v24, %v2526_v35  ;;  %3245 = vmatmul.msk.f32.gmra.mxu1 %vm246_vm0, %v1963_v42  ;;  %3282 = vmatmul.msk.f32.gmra.mxu2 %vm246_vm0, %v1965_v3  ;;  %v2273_v42 = vld [vmem:[%s3442_s27 + $0xed] sm:$0xff] }
 0x239   : > { %3319 = vmatmul.msk.f32.gmra.mxu3 %vm246_vm0, %v2272_v51  ;;  %3356 = vmatmul.msk.f32.gmra.mxu0 %vm246_vm0, %v2579_v16 }
 0x23a   : > { %v2873_v20 = vadd.f32 %v4088_v52, %v2833_v21 }
 0x23b   : > { %v2128_v58 = vpop.f32.mrf.mxu2 }
 0x23c   : > { %v2909_v36 = vmax.f32 %v2873_v20, 0.0  ;;  %v2220_v56 = vadd.f32 %v2128_v58, %v1913_v8  ;;  %v2435_v17 = vpop.f32.mrf.mxu3  ;;  %v2582_v8 = vld [vmem:[%s3442_s27 + $0xfe] sm:$0xff] }
 0x23d   : > { %v1824_v39 = vpop.f32.mrf.mxu1 }
 0x23e   : > { %2945 = vst [vmem:[%s4102_s16 + $0x38] sm:$0xff] %v2909_v36  ;;  %v2527_v26 = vadd.f32 %v2435_v17, %v2220_v56  ;;  %v2745_v47 = vpop.f32.mrf.mxu0  ;;  %v1914_v33 = vadd.f32 %v1824_v39, %v3815_v55 }
 0x240   : > { %v2834_v60 = vadd.f32 %v2742_v11, %v2527_v26  ;;  %3246 = vmatmul.msk.f32.gmra.mxu1 %vm246_vm0, %v1964_v61  ;;  %3283 = vmatmul.msk.f32.gmra.mxu2 %vm246_vm0, %v1966_v38  ;;  %v2274_v61 = vld [vmem:[%s3442_s27 + $0xf5] sm:$0xff] }
 0x241   : > { %3320 = vmatmul.msk.f32.gmra.mxu3 %vm246_vm0, %v2273_v42  ;;  %3357 = vmatmul.msk.f32.gmra.mxu0 %vm246_vm0, %v2580_v22  ;;  %v1968_v11 = vld [vmem:[%s3442_s27 + $0xfc] sm:$0xff]  ;;  %v1969_v42 = vld [vmem:[%s3442_s27 + $0x104] sm:$0xff] }
 0x242   : > { %v2874_v50 = vadd.f32 %v4088_v52, %v2834_v60  ;;  %v2583_v60 = vld [vmem:[%s3442_s27 + $0x106] sm:$0xff] }
 0x243   : > { %v2131_v1 = vpop.f32.mrf.mxu2 }
 0x244   : > { %v2910_v43 = vmax.f32 %v2874_v50, 0.0  ;;  %v2221_v49 = vadd.f32 %v2131_v1, %v1914_v33  ;;  %v2438_v28 = vpop.f32.mrf.mxu3 }
 0x245   : > { %v1827_v24 = vpop.f32.mrf.mxu1 }
 0x246   : > { %2946 = vst [vmem:[%s4102_s16 + $0x40] sm:$0xff] %v2910_v43  ;;  %v2528_v45 = vadd.f32 %v2438_v28, %v2221_v49  ;;  %v2748_v48 = vpop.f32.mrf.mxu0  ;;  %v1915_v55 = vadd.f32 %v1827_v24, %v3825_v15 }
 0x248   : > { %v2835_v2 = vadd.f32 %v2745_v47, %v2528_v45  ;;  %3247 = vmatmul.msk.f32.gmra.mxu1 %vm246_vm0, %v1965_v3  ;;  %3284 = vmatmul.msk.f32.gmra.mxu2 %vm246_vm0, %v1967_v46  ;;  %v2275_v3 = vld [vmem:[%s3442_s27 + $0xfd] sm:$0xff]  ;;  %v1970_v45 = vld [vmem:[%s3442_s27 + $0x10c] sm:$0xff] }
 0x249   : > { %3321 = vmatmul.msk.f32.gmra.mxu3 %vm246_vm0, %v2274_v61  ;;  %3358 = vmatmul.msk.f32.gmra.mxu0 %vm246_vm0, %v2581_v5  ;;  %v2584_v5 = vld [vmem:[%s3442_s27 + $0x10e] sm:$0xff] }
 0x24a   : > { %v2875_v59 = vadd.f32 %v4088_v52, %v2835_v2 }
 0x24b   : > { %v2134_v12 = vpop.f32.mrf.mxu2 }
 0x24c   : > { %v2911_v10 = vmax.f32 %v2875_v59, 0.0  ;;  %v2222_v31 = vadd.f32 %v2134_v12, %v1915_v55  ;;  %v2441_v35 = vpop.f32.mrf.mxu3 }
 0x24d   : > { %v1830_v51 = vpop.f32.mrf.mxu1 }
 0x24e   : > { %2947 = vst [vmem:[%s4102_s16 + $0x48] sm:$0xff] %v2911_v10  ;;  %v2529_v16 = vadd.f32 %v2441_v35, %v2222_v31  ;;  %v2751_v21 = vpop.f32.mrf.mxu0  ;;  %v1916_v15 = vadd.f32 %v1830_v51, %v3835_v40  ;;  %v1971_v51 = vld [vmem:[%s3442_s27 + $0x114] sm:$0xff] }
 0x250   : > { %v2836_v20 = vadd.f32 %v2748_v48, %v2529_v16  ;;  %3248 = vmatmul.msk.f32.gmra.mxu1 %vm246_vm0, %v1966_v38  ;;  %3285 = vmatmul.msk.f32.gmra.mxu2 %vm246_vm0, %v1968_v11  ;;  %v2276_v38 = vld [vmem:[%s3442_s27 + $0x105] sm:$0xff] }
 0x251   : > { %3322 = vmatmul.msk.f32.gmra.mxu3 %vm246_vm0, %v2275_v3  ;;  %3359 = vmatmul.msk.f32.gmra.mxu0 %vm246_vm0, %v2582_v8 }
 0x252   : > { %v2876_v58 = vadd.f32 %v4088_v52, %v2836_v20 }
 0x253   : > { %v2137_v36 = vpop.f32.mrf.mxu2 }
 0x254   : > { %v2912_v56 = vmax.f32 %v2876_v58, 0.0  ;;  %v2223_v17 = vadd.f32 %v2137_v36, %v1916_v15  ;;  %v2444_v39 = vpop.f32.mrf.mxu3 }
 0x255   : > { %v1833_v26 = vpop.f32.mrf.mxu1 }
 0x256   : > { %2948 = vst [vmem:[%s4102_s16 + $0x50] sm:$0xff] %v2912_v56  ;;  %v2530_v47 = vadd.f32 %v2444_v39, %v2223_v17  ;;  %v2754_v22 = vpop.f32.mrf.mxu0  ;;  %v1917_v40 = vadd.f32 %v1833_v26, %v3845_v62  ;;  %v1972_v39 = vld [vmem:[%s3442_s27 + $0x11c] sm:$0xff] }
 0x258   : > { %v2837_v33 = vadd.f32 %v2751_v21, %v2530_v47  ;;  %3249 = vmatmul.msk.f32.gmra.mxu1 %vm246_vm0, %v1967_v46  ;;  %3286 = vmatmul.msk.f32.gmra.mxu2 %vm246_vm0, %v1969_v42  ;;  %v2277_v46 = vld [vmem:[%s3442_s27 + $0x10d] sm:$0xff]  ;;  %v2585_v21 = vld [vmem:[%s3442_s27 + $0x116] sm:$0xff] }
 0x259   : > { %3323 = vmatmul.msk.f32.gmra.mxu3 %vm246_vm0, %v2276_v38  ;;  %3360 = vmatmul.msk.f32.gmra.mxu0 %vm246_vm0, %v2583_v60  ;;  %v2586_v38 = vld [vmem:[%s3442_s27 + $0x11e] sm:$0xff] }
 0x25a   : > { %v2877_v50 = vadd.f32 %v4088_v52, %v2837_v33 }
 0x25b   : > { %v2140_v1 = vpop.f32.mrf.mxu2 }
 0x25c   : > { %v2913_v43 = vmax.f32 %v2877_v50, 0.0  ;;  %v2224_v49 = vadd.f32 %v2140_v1, %v1917_v40  ;;  %v2447_v28 = vpop.f32.mrf.mxu3 }
 0x25d   : > { %v1836_v24 = vpop.f32.mrf.mxu1 }
 0x25e   : > { %2949 = vst [vmem:[%s4102_s16 + $0x58] sm:$0xff] %v2913_v43  ;;  %v2531_v61 = vadd.f32 %v2447_v28, %v2224_v49  ;;  %v2757_v48 = vpop.f32.mrf.mxu0  ;;  %v1918_v62 = vadd.f32 %v1836_v24, %v3855_v6  ;;  %v1973_v49 = vld [vmem:[%s3442_s27 + $0x124] sm:$0xff] }
 0x25f   : > { %v2280_v24 = vld [vmem:[%s3442_s27 + $0x125] sm:$0xff] }
 0x260   : > { %v2838_v2 = vadd.f32 %v2754_v22, %v2531_v61  ;;  %3250 = vmatmul.msk.f32.gmra.mxu1 %vm246_vm0, %v1968_v11  ;;  %3287 = vmatmul.msk.f32.gmra.mxu2 %vm246_vm0, %v1970_v45  ;;  %v2278_v11 = vld [vmem:[%s3442_s27 + $0x115] sm:$0xff]  ;;  %v2587_v61 = vld [vmem:[%s3442_s27 + $0x126] sm:$0xff] }
 0x261   : > { %3324 = vmatmul.msk.f32.gmra.mxu3 %vm246_vm0, %v2277_v46  ;;  %3361 = vmatmul.msk.f32.gmra.mxu0 %vm246_vm0, %v2584_v5 }
 0x262   : > { %v2878_v55 = vadd.f32 %v4088_v52, %v2838_v2 }
 0x263   : > { %v2143_v59 = vpop.f32.mrf.mxu2 }
 0x264   : > { %v2914_v12 = vmax.f32 %v2878_v55, 0.0  ;;  %v2225_v10 = vadd.f32 %v2143_v59, %v1918_v62  ;;  %v2450_v31 = vpop.f32.mrf.mxu3 }
 0x265   : > { %v1839_v35 = vpop.f32.mrf.mxu1 }
 0x266   : > { %2950 = vst [vmem:[%s4102_s16 + $0x60] sm:$0xff] %v2914_v12  ;;  %v2532_v16 = vadd.f32 %v2450_v31, %v2225_v10  ;;  %v2760_v3 = vpop.f32.mrf.mxu0  ;;  %v1919_v6 = vadd.f32 %v1839_v35, %v3865_v29  ;;  %v1974_v12 = vld [vmem:[%s3442_s27 + $0x12c] sm:$0xff] }
 0x267   : > { %v2281_v31 = vld [vmem:[%s3442_s27 + $0x12d] sm:$0xff] }
 0x268   : > { %v2839_v8 = vadd.f32 %v2757_v48, %v2532_v16  ;;  %3251 = vmatmul.msk.f32.gmra.mxu1 %vm246_vm0, %v1969_v42  ;;  %3288 = vmatmul.msk.f32.gmra.mxu2 %vm246_vm0, %v1971_v51  ;;  %v2279_v42 = vld [vmem:[%s3442_s27 + $0x11d] sm:$0xff] }
 0x269   : > { %3325 = vmatmul.msk.f32.gmra.mxu3 %vm246_vm0, %v2278_v11  ;;  %3362 = vmatmul.msk.f32.gmra.mxu0 %vm246_vm0, %v2585_v21 }
 0x26a   : > { %v2879_v20 = vadd.f32 %v4088_v52, %v2839_v8 }
 0x26b   : > { %v2146_v15 = vpop.f32.mrf.mxu2 }
 0x26c   : > { %v2915_v58 = vmax.f32 %v2879_v20, 0.0  ;;  %v2226_v36 = vadd.f32 %v2146_v15, %v1919_v6  ;;  %v2453_v56 = vpop.f32.mrf.mxu3  ;;  %v1975_v15 = vld [vmem:[%s3442_s27 + $0x134] sm:$0xff] }
 0x26d   : > { %v1842_v17 = vpop.f32.mrf.mxu1 }
 0x26e   : > { %2951 = vst [vmem:[%s4102_s16 + $0x68] sm:$0xff] %v2915_v58  ;;  %v2533_v26 = vadd.f32 %v2453_v56, %v2226_v36  ;;  %v2763_v47 = vpop.f32.mrf.mxu0  ;;  %v1920_v29 = vadd.f32 %v1842_v17, %v3875_v54  ;;  %v2282_v36 = vld [vmem:[%s3442_s27 + $0x135] sm:$0xff] }
 0x26f   : > { %v2589_v17 = vld [vmem:[%s3442_s27 + $0x136] sm:$0xff] }
 0x270   : > { %v2840_v22 = vadd.f32 %v2760_v3, %v2533_v26  ;;  %3252 = vmatmul.msk.f32.gmra.mxu1 %vm246_vm0, %v1970_v45  ;;  %3289 = vmatmul.msk.f32.gmra.mxu2 %vm246_vm0, %v1972_v39 }
 0x271   : > { %3326 = vmatmul.msk.f32.gmra.mxu3 %vm246_vm0, %v2279_v42  ;;  %3363 = vmatmul.msk.f32.gmra.mxu0 %vm246_vm0, %v2586_v38 }
 0x272   : > { %v2880_v60 = vadd.f32 %v4088_v52, %v2840_v22 }
 0x273   : > { %v2149_v33 = vpop.f32.mrf.mxu2 }
 0x274   : > { %v2916_v40 = vmax.f32 %v2880_v60, 0.0  ;;  %v2227_v50 = vadd.f32 %v2149_v33, %v1920_v29  ;;  %v2456_v1 = vpop.f32.mrf.mxu3  ;;  %v1976_v60 = vld [vmem:[%s3442_s27 + $0x13c] sm:$0xff] }
 0x275   : > { %v1845_v43 = vpop.f32.mrf.mxu1 }
 0x276   : > { %2952 = vst [vmem:[%s4102_s16 + $0x70] sm:$0xff] %v2916_v40  ;;  %v2534_v28 = vadd.f32 %v2456_v1, %v2227_v50  ;;  %v2766_v45 = vpop.f32.mrf.mxu0  ;;  %v1921_v54 = vadd.f32 %v1845_v43, %v3885_v13  ;;  %v2283_v40 = vld [vmem:[%s3442_s27 + $0x13d] sm:$0xff] }
 0x277   : > { %v2590_v1 = vld [vmem:[%s3442_s27 + $0x13e] sm:$0xff] }
 0x278   : > { %v2841_v46 = vadd.f32 %v2763_v47, %v2534_v28  ;;  %3253 = vmatmul.msk.f32.gmra.mxu1 %vm246_vm0, %v1971_v51  ;;  %3290 = vmatmul.msk.f32.gmra.mxu2 %vm246_vm0, %v1973_v49  ;;  %v2588_v51 = vld [vmem:[%s3442_s27 + $0x12e] sm:$0xff] }
 0x279   : > { %3327 = vmatmul.msk.f32.gmra.mxu3 %vm246_vm0, %v2280_v24  ;;  %3364 = vmatmul.msk.f32.gmra.mxu0 %vm246_vm0, %v2587_v61 }
 0x27a   : > { %v2881_v48 = vadd.f32 %v4088_v52, %v2841_v46 }
 0x27b   : > { %v2152_v5 = vpop.f32.mrf.mxu2 }
 0x27c   : > { %v2917_v2 = vmax.f32 %v2881_v48, 0.0  ;;  %v2228_v62 = vadd.f32 %v2152_v5, %v1921_v54  ;;  %v2459_v55 = vpop.f32.mrf.mxu3 }
 0x27d   : > { %v1848_v59 = vpop.f32.mrf.mxu1 }
 0x27e   : > { %2953 = vst [vmem:[%s4102_s16 + $0x78] sm:$0xff] %v2917_v2  ;;  %v2535_v10 = vadd.f32 %v2459_v55, %v2228_v62  ;;  %v2769_v35 = vpop.f32.mrf.mxu0  ;;  %v1922_v13 = vadd.f32 %v1848_v59, %v3895_v7 }
 0x280   : > { %v2842_v16 = vadd.f32 %v2766_v45, %v2535_v10  ;;  %3254 = vmatmul.msk.f32.gmra.mxu1 %vm246_vm0, %v1972_v39  ;;  %3291 = vmatmul.msk.f32.gmra.mxu2 %vm246_vm0, %v1974_v12 }
 0x281   : > { %3328 = vmatmul.msk.f32.gmra.mxu3 %vm246_vm0, %v2281_v31  ;;  %3365 = vmatmul.msk.f32.gmra.mxu0 %vm246_vm0, %v2588_v51 }
 0x282   : > { %v2882_v11 = vadd.f32 %v4088_v52, %v2842_v16 }
 0x283   : > { %v2155_v3 = vpop.f32.mrf.mxu2 }
 0x284   : > { %v2918_v21 = vmax.f32 %v2882_v11, 0.0  ;;  %v2229_v8 = vadd.f32 %v2155_v3, %v1922_v13  ;;  %v2462_v6 = vpop.f32.mrf.mxu3 }
 0x285   : > { %v1851_v20 = vpop.f32.mrf.mxu1 }
 0x286   : > { %2954 = vst [vmem:[%s4102_s16 + $0x80] sm:$0xff] %v2918_v21  ;;  %v2536_v58 = vadd.f32 %v2462_v6, %v2229_v8  ;;  %v2772_v56 = vpop.f32.mrf.mxu0  ;;  %v1923_v7 = vadd.f32 %v1851_v20, %v3905_v25 }
 0x288   : > { %v2843_v39 = vadd.f32 %v2769_v35, %v2536_v58  ;;  %3255 = vmatmul.msk.f32.gmra.mxu1 %vm246_vm0, %v1973_v49  ;;  %3292 = vmatmul.msk.f32.gmra.mxu2 %vm246_vm0, %v1975_v15 }
 0x289   : > { %3329 = vmatmul.msk.f32.gmra.mxu3 %vm246_vm0, %v2282_v36  ;;  %3366 = vmatmul.msk.f32.gmra.mxu0 %vm246_vm0, %v2589_v17 }
 0x28a   : > { %v2883_v26 = vadd.f32 %v4088_v52, %v2843_v39 }
 0x28b   : > { %v2158_v42 = vpop.f32.mrf.mxu2 }
 0x28c   : > { %v2919_v47 = vmax.f32 %v2883_v26, 0.0  ;;  %v2230_v38 = vadd.f32 %v2158_v42, %v1923_v7  ;;  %v2465_v22 = vpop.f32.mrf.mxu3 }
 0x28d   : > { %v1854_v29 = vpop.f32.mrf.mxu1 }
 0x28e   : > { %2955 = vst [vmem:[%s4102_s16 + $0x88] sm:$0xff] %v2919_v47  ;;  %v2537_v33 = vadd.f32 %v2465_v22, %v2230_v38  ;;  %v2775_v50 = vpop.f32.mrf.mxu0  ;;  %v1924_v25 = vadd.f32 %v1854_v29, %v3916_v32 }
 0x290   : > { %v2844_v43 = vadd.f32 %v2772_v56, %v2537_v33  ;;  %3256 = vmatmul.msk.f32.gmra.mxu1 %vm246_vm0, %v1974_v12  ;;  %3293 = vmatmul.msk.f32.gmra.mxu2 %vm246_vm0, %v1976_v60 }
 0x291   : > { %3330 = vmatmul.msk.f32.gmra.mxu3 %vm246_vm0, %v2283_v40  ;;  %3367 = vmatmul.msk.f32.gmra.mxu0 %vm246_vm0, %v2590_v1 }
 0x292   : > { %v2884_v49 = vadd.f32 %v4088_v52, %v2844_v43 }
 0x293   : > { %v2161_v28 = vpop.f32.mrf.mxu2 }
 0x294   : > { %v2920_v24 = vmax.f32 %v2884_v49, 0.0  ;;  %v2231_v45 = vadd.f32 %v2161_v28, %v1924_v25  ;;  %v2468_v61 = vpop.f32.mrf.mxu3 }
 0x295   : > { %v1857_v46 = vpop.f32.mrf.mxu1 }
 0x296   : > { %2956 = vst [vmem:[%s4102_s16 + $0x90] sm:$0xff] %v2920_v24  ;;  %v2538_v54 = vadd.f32 %v2468_v61, %v2231_v45  ;;  %v2778_v48 = vpop.f32.mrf.mxu0  ;;  %v1925_v2 = vadd.f32 %v1857_v46, %v3927_v57 }
 0x298   : > { %v2845_v5 = vadd.f32 %v2775_v50, %v2538_v54 }
 0x29a   : > { %v2885_v62 = vadd.f32 %v4088_v52, %v2845_v5 }
 0x29b   : > { %v2164_v55 = vpop.f32.mrf.mxu2 }
 0x29c   : > { %v2921_v59 = vmax.f32 %v2885_v62, 0.0  ;;  %v2232_v32 = vadd.f32 %v2164_v55, %v1925_v2  ;;  %v2471_v12 = vpop.f32.mrf.mxu3 }
 0x29d   : > { %v1860_v10 = vpop.f32.mrf.mxu1 }
 0x29e   : > { %2957 = vst [vmem:[%s4102_s16 + $0x98] sm:$0xff] %v2921_v59  ;;  %v2539_v31 = vadd.f32 %v2471_v12, %v2232_v32  ;;  %v2781_v35 = vpop.f32.mrf.mxu0  ;;  %v1926_v16 = vadd.f32 %v1860_v10, %v3937_v19 }
 0x2a0   : > { %v2846_v51 = vadd.f32 %v2778_v48, %v2539_v31 }
 0x2a2   : > { %v2886_v13 = vadd.f32 %v4088_v52, %v2846_v51 }
 0x2a3   : > { %v2167_v11 = vpop.f32.mrf.mxu2 }
 0x2a4   : > { %v2922_v3 = vmax.f32 %v2886_v13, 0.0  ;;  %v2233_v57 = vadd.f32 %v2167_v11, %v1926_v16  ;;  %v2474_v21 = vpop.f32.mrf.mxu3 }
 0x2a5   : > { %v1863_v8 = vpop.f32.mrf.mxu1 }
 0x2a6   : > { %2958 = vst [vmem:[%s4102_s16 + $0xa0] sm:$0xff] %v2922_v3  ;;  %v2540_v6 = vadd.f32 %v2474_v21, %v2233_v57  ;;  %v2784_v20 = vpop.f32.mrf.mxu0  ;;  %v1927_v58 = vadd.f32 %v1863_v8, %v3947_v41 }
 0x2a8   : > { %v2847_v15 = vadd.f32 %v2781_v35, %v2540_v6 }
 0x2aa   : > { %v2887_v36 = vadd.f32 %v4088_v52, %v2847_v15 }
 0x2ab   : > { %v2170_v56 = vpop.f32.mrf.mxu2 }
 0x2ac   : > { %v2923_v17 = vmax.f32 %v2887_v36, 0.0  ;;  %v2234_v19 = vadd.f32 %v2170_v56, %v1927_v58  ;;  %v2477_v39 = vpop.f32.mrf.mxu3 }
 0x2ad   : > { %v1866_v7 = vpop.f32.mrf.mxu1 }
 0x2ae   : > { %2959 = vst [vmem:[%s4102_s16 + $0xa8] sm:$0xff] %v2923_v17  ;;  %v2541_v26 = vadd.f32 %v2477_v39, %v2234_v19  ;;  %v2787_v42 = vpop.f32.mrf.mxu0  ;;  %v1928_v38 = vadd.f32 %v1866_v7, %v3957_v0 }
 0x2b0   : > { %v2848_v47 = vadd.f32 %v2784_v20, %v2541_v26 }
 0x2b2   : > { %v2888_v22 = vadd.f32 %v4088_v52, %v2848_v47 }
 0x2b3   : > { %v2173_v29 = vpop.f32.mrf.mxu2 }
 0x2b4   : > { %v2924_v60 = vmax.f32 %v2888_v22, 0.0  ;;  %v2235_v41 = vadd.f32 %v2173_v29, %v1928_v38  ;;  %v2480_v33 = vpop.f32.mrf.mxu3 }
 0x2b5   : > { %v1869_v40 = vpop.f32.mrf.mxu1 }
 0x2b6   : > { %2960 = vst [vmem:[%s4102_s16 + $0xb0] sm:$0xff] %v2924_v60  ;;  %v2542_v50 = vadd.f32 %v2480_v33, %v2235_v41  ;;  %v2790_v1 = vpop.f32.mrf.mxu0  ;;  %v1929_v25 = vadd.f32 %v1869_v40, %v3967_v53 }
 0x2b8   : > { %v2849_v43 = vadd.f32 %v2787_v42, %v2542_v50 }
 0x2ba   : > { %v2889_v49 = vadd.f32 %v4088_v52, %v2849_v43 }
 0x2bb   : > { %v2176_v28 = vpop.f32.mrf.mxu2 }
 0x2bc   : > { %v2925_v24 = vmax.f32 %v2889_v49, 0.0  ;;  %v2236_v0 = vadd.f32 %v2176_v28, %v1929_v25  ;;  %v2483_v45 = vpop.f32.mrf.mxu3 }
 0x2bd   : > { %v1872_v61 = vpop.f32.mrf.mxu1 }
 0x2be   : > { %2961 = vst [vmem:[%s4102_s16 + $0xb8] sm:$0xff] %v2925_v24  ;;  %v2543_v46 = vadd.f32 %v2483_v45, %v2236_v0  ;;  %v2793_v54 = vpop.f32.mrf.mxu0  ;;  %v1930_v5 = vadd.f32 %v1872_v61, %v3977_v63 }
 0x2c0   : > { %v2850_v48 = vadd.f32 %v2790_v1, %v2543_v46 }
 0x2c2   : > { %v2890_v2 = vadd.f32 %v4088_v52, %v2850_v48 }
 0x2c3   : > { %v2179_v62 = vpop.f32.mrf.mxu2 }
 0x2c4   : > { %v2926_v55 = vmax.f32 %v2890_v2, 0.0  ;;  %v2237_v53 = vadd.f32 %v2179_v62, %v1930_v5  ;;  %v2486_v59 = vpop.f32.mrf.mxu3 }
 0x2c5   : > { %v1875_v32 = vpop.f32.mrf.mxu1 }
 0x2c6   : > { %2962 = vst [vmem:[%s4102_s16 + $0xc0] sm:$0xff] %v2926_v55  ;;  %v2544_v12 = vadd.f32 %v2486_v59, %v2237_v53  ;;  %v2796_v10 = vpop.f32.mrf.mxu0  ;;  %v1931_v35 = vadd.f32 %v1875_v32, %v3987_v4 }
 0x2c8   : > { %v2851_v31 = vadd.f32 %v2793_v54, %v2544_v12 }
 0x2ca   : > { %v2891_v51 = vadd.f32 %v4088_v52, %v2851_v31 }
 0x2cb   : > { %v2182_v16 = vpop.f32.mrf.mxu2 }
 0x2cc   : > { %v2927_v13 = vmax.f32 %v2891_v51, 0.0  ;;  %v2238_v63 = vadd.f32 %v2182_v16, %v1931_v35  ;;  %v2489_v11 = vpop.f32.mrf.mxu3 }
 0x2cd   : > { %v1878_v3 = vpop.f32.mrf.mxu1 }
 0x2ce   : > { %2963 = vst [vmem:[%s4102_s16 + $0xc8] sm:$0xff] %v2927_v13  ;;  %v2545_v57 = vadd.f32 %v2489_v11, %v2238_v63  ;;  %v2799_v21 = vpop.f32.mrf.mxu0  ;;  %v1932_v6 = vadd.f32 %v1878_v3, %v3997_v27 }
 0x2d0   : > { %v2852_v8 = vadd.f32 %v2796_v10, %v2545_v57 }
 0x2d2   : > { %v2892_v20 = vadd.f32 %v4088_v52, %v2852_v8 }
 0x2d3   : > { %v2185_v15 = vpop.f32.mrf.mxu2 }
 0x2d4   : > { %v2928_v58 = vmax.f32 %v2892_v20, 0.0  ;;  %v2239_v4 = vadd.f32 %v2185_v15, %v1932_v6  ;;  %v2492_v36 = vpop.f32.mrf.mxu3 }
 0x2d5   : > { %v1881_v56 = vpop.f32.mrf.mxu1 }
 0x2d6   : > { %2964 = vst [vmem:[%s4102_s16 + $0xd0] sm:$0xff] %v2928_v58  ;;  %v2546_v17 = vadd.f32 %v2492_v36, %v2239_v4  ;;  %v2802_v19 = vpop.f32.mrf.mxu0  ;;  %v1933_v7 = vadd.f32 %v1881_v56, %v4007_v18 }
 0x2d8   : > { %v2853_v39 = vadd.f32 %v2799_v21, %v2546_v17 }
 0x2da   : > { %v2893_v26 = vadd.f32 %v4088_v52, %v2853_v39 }
 0x2db   : > { %v2188_v42 = vpop.f32.mrf.mxu2 }
 0x2dc   : > { %v2929_v47 = vmax.f32 %v2893_v26, 0.0  ;;  %v2240_v27 = vadd.f32 %v2188_v42, %v1933_v7  ;;  %v2495_v38 = vpop.f32.mrf.mxu3 }
 0x2dd   : > { %v1884_v22 = vpop.f32.mrf.mxu1 }
 0x2de   : > { %2965 = vst [vmem:[%s4102_s16 + $0xd8] sm:$0xff] %v2929_v47  ;;  %v2547_v29 = vadd.f32 %v2495_v38, %v2240_v27  ;;  %v2805_v60 = vpop.f32.mrf.mxu0  ;;  %v1934_v33 = vadd.f32 %v1884_v22, %v4017_v14 }
 0x2e0   : > { %v2854_v41 = vadd.f32 %v2802_v19, %v2547_v29 }
 0x2e2   : > { %v2894_v40 = vadd.f32 %v4088_v52, %v2854_v41 }
 0x2e3   : > { %v2191_v50 = vpop.f32.mrf.mxu2 }
 0x2e4   : > { %v2930_v1 = vmax.f32 %v2894_v40, 0.0  ;;  %v2241_v18 = vadd.f32 %v2191_v50, %v1934_v33  ;;  %v2498_v43 = vpop.f32.mrf.mxu3 }
 0x2e5   : > { %v1887_v25 = vpop.f32.mrf.mxu1 }
 0x2e6   : > { %2966 = vst [vmem:[%s4102_s16 + $0xe0] sm:$0xff] %v2930_v1  ;;  %v2548_v49 = vadd.f32 %v2498_v43, %v2241_v18  ;;  %v2808_v28 = vpop.f32.mrf.mxu0  ;;  %v1935_v0 = vadd.f32 %v1887_v25, %v4027_v34  ;;  %v3384_v25 = vld [vmem:[%s4342_s2] ss:$0 sm:$0xff] }
 0x2e8   : > { %v2855_v24 = vadd.f32 %v2805_v60, %v2548_v49 }
 0x2ea   : > { %v2895_v45 = vadd.f32 %v4088_v52, %v2855_v24 }
 0x2eb   : > { %v2194_v61 = vpop.f32.mrf.mxu2 }
 0x2ec   : > { %v2931_v46 = vmax.f32 %v2895_v45, 0.0  ;;  %v2242_v14 = vadd.f32 %v2194_v61, %v1935_v0  ;;  %v2501_v54 = vpop.f32.mrf.mxu3 }
 0x2ed   : > { %v1890_v48 = vpop.f32.mrf.mxu1 }
 0x2ee   : > { %2967 = vst [vmem:[%s4102_s16 + $0xe8] sm:$0xff] %v2931_v46  ;;  %v2549_v5 = vadd.f32 %v2501_v54, %v2242_v14  ;;  %v2811_v2 = vpop.f32.mrf.mxu0  ;;  %v1936_v55 = vadd.f32 %v1890_v48, %v4037_v23 }
 0x2f0   : > { %v2856_v62 = vadd.f32 %v2808_v28, %v2549_v5 }
 0x2f2   : > { %v2896_v53 = vadd.f32 %v4088_v52, %v2856_v62 }
 0x2f3   : > { %v2197_v59 = vpop.f32.mrf.mxu2 }
 0x2f4   : > { %v2932_v32 = vmax.f32 %v2896_v53, 0.0  ;;  %v2243_v34 = vadd.f32 %v2197_v59, %v1936_v55  ;;  %v2504_v12 = vpop.f32.mrf.mxu3 }
 0x2f5   : > { %v1893_v10 = vpop.f32.mrf.mxu1 }
 0x2f6   : > { %2968 = vst [vmem:[%s4102_s16 + $0xf0] sm:$0xff] %v2932_v32  ;;  %v2550_v31 = vadd.f32 %v2504_v12, %v2243_v34  ;;  %v2814_v35 = vpop.f32.mrf.mxu0  ;;  %v1937_v16 = vadd.f32 %v1893_v10, %v4047_v30 }
 0x2f8   : > { %v2857_v51 = vadd.f32 %v2811_v2, %v2550_v31 }
 0x2fa   : > { %v2897_v13 = vadd.f32 %v4088_v52, %v2857_v51 }
 0x2fb   : > { %v2200_v63 = vpop.f32.mrf.mxu2 }
 0x2fc   : > { %v2933_v11 = vmax.f32 %v2897_v13, 0.0  ;;  %v2244_v23 = vadd.f32 %v2200_v63, %v1937_v16  ;;  %v2507_v3 = vpop.f32.mrf.mxu3 }
 0x2fd   : > { %v1896_v57 = vpop.f32.mrf.mxu1 }
 0x2fe   : > { %2969 = vst [vmem:[%s4102_s16 + $0xf8] sm:$0xff] %v2933_v11  ;;  %v2551_v21 = vadd.f32 %v2507_v3, %v2244_v23  ;;  %v2817_v6 = vpop.f32.mrf.mxu0  ;;  %v1938_v20 = vadd.f32 %v1896_v57, %v4057_v37 }
 0x300   : > { %v2858_v8 = vadd.f32 %v2814_v35, %v2551_v21 }
 0x302   : > { %v2898_v15 = vadd.f32 %v4088_v52, %v2858_v8 }
 0x303   : > { %v2203_v58 = vpop.f32.mrf.mxu2 }
 0x304   : > { %v2934_v4 = vmax.f32 %v2898_v15, 0.0  ;;  %v2245_v30 = vadd.f32 %v2203_v58, %v1938_v20  ;;  %v2510_v36 = vpop.f32.mrf.mxu3 }
 0x305   : > { %v1899_v56 = vpop.f32.mrf.mxu1 }
 0x306   : > { %2970 = vst [vmem:[%s4102_s16 + $0x100] sm:$0xff] %v2934_v4  ;;  %v2552_v17 = vadd.f32 %v2510_v36, %v2245_v30  ;;  %v1939_v39 = vadd.f32 %v1899_v56, %v4067_v44  ;;  %v2820_v42 = vpop.f32.mrf.mxu0 }
 0x308   : > { %v2859_v19 = vadd.f32 %v2817_v6, %v2552_v17 }
 0x30a   : > { %v2899_v7 = vadd.f32 %v4088_v52, %v2859_v19 }
 0x30b   : > { %v2206_v26 = vpop.f32.mrf.mxu2 }
 0x30c   : > { %v2935_v47 = vmax.f32 %v2899_v7, 0.0  ;;  %v2246_v37 = vadd.f32 %v2206_v26, %v1939_v39  ;;  %v2513_v27 = vpop.f32.mrf.mxu3 }
 0x30d   : > { %v1902_v22 = vpop.f32.mrf.mxu1 }
 0x30e   : > { %2971 = vst [vmem:[%s4102_s16 + $0x108] sm:$0xff] %v2935_v47  ;;  %v2553_v38 = vadd.f32 %v2513_v27, %v2246_v37  ;;  %v1940_v60 = vadd.f32 %v1902_v22, %v4077_v9  ;;  %v2823_v1 = vpop.f32.mrf.mxu0 }
 0x310   : > { %v2860_v29 = vadd.f32 %v2820_v42, %v2553_v38 }
 0x312   : > { %v2900_v41 = vadd.f32 %v4088_v52, %v2860_v29 }
 0x313   : > { %v2209_v33 = vpop.f32.mrf.mxu2 }
 0x314   : > { %v2936_v40 = vmax.f32 %v2900_v41, 0.0  ;;  %v2247_v44 = vadd.f32 %v2209_v33, %v1940_v60  ;;  %v2516_v50 = vpop.f32.mrf.mxu3 }
 0x316   : > { %2972 = vst [vmem:[%s4102_s16 + $0x110] sm:$0xff] %v2936_v40  ;;  %v2554_v18 = vadd.f32 %v2516_v50, %v2247_v44 }
 0x318   : > { %v2861_v43 = vadd.f32 %v2823_v1, %v2554_v18 }
 0x31a   : > { %v2901_v49 = vadd.f32 %v3384_v25, %v2861_v43 }
 0x31c   : > { %v2937_v28 = vmax.f32 %v2901_v49, 0.0 }
 0x31e   : > { %2973 = vst [vmem:[%s4102_s16 + $0x118] sm:$0xff] %v2937_v28 }
 0x31f PF: > { %s13_s12 = sadd.s32 1, %s3391_s12  }
 0x320   : > { %p10_p4 = scmp.ge.s32.totalorder %s13_s12, 4  }
 0x322   :  { %12 = sbr.rel (!%p10_p4) target bundleno = 1 (0x1), region = 70 }

// kernel: conv_bn_relu.2
= control target key start
LH: loop header
LB: loop body
LE: loop exit
PB: predicated region body
PF: predicated region fallthrough
CT: control target
= control target key end

     0   :  { %s3746_s12 = smov 0   ;;  %s3748_s13 = smov 0   ;;  %s4720_s0 = inlined_call_operand.vmem [shape: f32[2,328,8], index: 0, kind: input, shape index: {}]   ;;  %s4721_s1 = inlined_call_operand.vmem [shape: f32[9,8,128], index: 1, kind: input, shape index: {}]   ;;  %s4722_s2 = inlined_call_operand.vmem [shape: f32[288,1], index: 2, kind: input, shape index: {}]   ;;  %s4723_s3 = inlined_call_operand.vmem [shape: f32[2,2,128], index: 3, kind: output, shape index: {}]  }
   0x1   :  { %s3750_s14 = smov 0  }
   0x2 LB: > { %s25_s15 = sadd.s32 1, %s3718_s13  ;;  %p3330_p0 = scmp.ge.s32.totalorder %s3722_s14, 1  ;;  %s3722_s14 = sphi %s3750_s14, %s13_s14   ;;  %s3718_s13 = sphi %s3748_s13, %s4725_s13   ;;  %s3714_s12 = sphi %s3746_s12, %s4724_s12  }
   0x3   : > { %p27_p1 = scmp.ge.s32.totalorder %s25_s15, 2  ;;  %p153_p2 = scmp.lt.s32.totalorder %s3722_s14, 3 }
   0x5   : > { %s4727_s15 = smov (%p27_p1, %s25_s15), 0  ;;  %p154_p3 = pnand %p3330_p0, %p153_p2 }
   0x6   : > { %p178_p4 = scmp.lt.s32.totalorder (!%p154_p3), %s3714_s12, 1 }
   0x7   : > { %157 = sbr.rel (%p154_p3) target bundleno = 824 (0x338), region = 32 }
   0xc   : > { %v3333_v0 = vld [vmem:[%s4721_s1 + $0x8] sm:$0xff]  ;;  %v3406_v1 = vld [vmem:[%s4721_s1 + $0x10] sm:$0xff]  ;;  %v3443_v2 = vld [vmem:[%s4721_s1 + $0x18] sm:$0xff]  ;;  %s4729_s12 = smov (!%p178_p4, %s3714_s12), 1  ;;  %vm268_vm0 = vcmask 64512  }
   0xd   : > { %3667 = vmatpush.msra.mxu1 %v3333_v0  ;;  %3668 = vmatpush.msra.mxu2 %v3333_v0  ;;  %v229_v3 = vld [vmem:[%s4721_s1] sm:$0xff]  ;;  %s3670_s26 = smul.u32 328, %s4729_s12  ;;  %v3554_v29 = vld [vmem:[%s4721_s1 + $0x30] sm:$0xff]  ;;  %v3591_v30 = vld [vmem:[%s4721_s1 + $0x38] sm:$0xff] }
   0xe   : > { %3669 = vmatpush.msra.mxu3 %v3333_v0  ;;  %v3480_v4 = vld [vmem:[%s4721_s1 + $0x20] sm:$0xff]  ;;  %392 = vmatpush.msra.mxu0 %v3333_v0  ;;  %v3517_v31 = vld [vmem:[%s4721_s1 + $0x28] sm:$0xff] }
   0xf   : > { %896 = vmatpush.msrb.mxu2 %v3406_v1  ;;  %625 = vmatpush.msrb.mxu1 %v229_v3  ;;  %s3785_s29 = scalar_lea.vmem %s4720_s0, %s3670_s26  ;;  %v3628_v36 = vld [vmem:[%s4721_s1 + $0x40] sm:$0xff] }
  0x10   : > { %1203 = vmatpush.msrb.mxu3 %v3443_v2  ;;  %1510 = vmatpush.msrb.mxu0 %v3480_v4  ;;  %v239_v5 = vld [vmem:[%s3785_s29 + $0x49] sm:$0xff]  ;;  %v248_v6 = vld [vmem:[%s3785_s29 + $0x91] sm:$0xff]  ;;  %v257_v7 = vld [vmem:[%s3785_s29 + $0xd9] sm:$0xff] }
  0x11   : > { %3343 = vmatmul.msk.f32.vlgmr.msra.gmra.mxu1 %vm268_vm0, %v239_v5  ;;  %3352 = vmatmul.msk.f32.vlgmr.msra.gmra.mxu2 %vm268_vm0, %v248_v6  ;;  %v230_v8 = vld [vmem:[%s3785_s29 + $0x1] sm:$0xff]  ;;  %v240_v9 = vld [vmem:[%s3785_s29 + $0x51] sm:$0xff]  ;;  %v249_v10 = vld [vmem:[%s3785_s29 + $0x99] sm:$0xff] }
  0x12   : > { %3361 = vmatmul.msk.f32.vlgmr.msra.gmra.mxu3 %vm268_vm0, %v257_v7  ;;  %3334 = vmatmul.msk.f32.vlgmr.msra.gmra.mxu0 %vm268_vm0, %v230_v8  ;;  %v258_v11 = vld [vmem:[%s3785_s29 + $0xe1] sm:$0xff]  ;;  %v231_v12 = vld [vmem:[%s3785_s29 + $0x9] sm:$0xff]  ;;  %v241_v13 = vld [vmem:[%s3785_s29 + $0x59] sm:$0xff] }
  0x13   : > { %v250_v14 = vld [vmem:[%s3785_s29 + $0xa1] sm:$0xff]  ;;  %v259_v15 = vld [vmem:[%s3785_s29 + $0xe9] sm:$0xff]  ;;  %v232_v16 = vld [vmem:[%s3785_s29 + $0x11] sm:$0xff]  ;;  %2124 = vmatpush.msra.mxu2 %v3554_v29  ;;  %2431 = vmatpush.msra.mxu3 %v3591_v30 }
  0x14   : > { %v242_v17 = vld [vmem:[%s3785_s29 + $0x61] sm:$0xff]  ;;  %v251_v18 = vld [vmem:[%s3785_s29 + $0xa9] sm:$0xff]  ;;  %v260_v19 = vld [vmem:[%s3785_s29 + $0xf1] sm:$0xff]  ;;  %1817 = vmatpush.msra.mxu1 %v3517_v31  ;;  %2738 = vmatpush.msra.mxu0 %v3628_v36 }
  0x15   : > { %v233_v20 = vld [vmem:[%s3785_s29 + $0x19] sm:$0xff]  ;;  %v243_v21 = vld [vmem:[%s3785_s29 + $0x69] sm:$0xff]  ;;  %v252_v22 = vld [vmem:[%s3785_s29 + $0xb1] sm:$0xff] }
  0x16   : > { %v261_v23 = vld [vmem:[%s3785_s29 + $0xf9] sm:$0xff]  ;;  %v234_v24 = vld [vmem:[%s3785_s29 + $0x21] sm:$0xff]  ;;  %v244_v25 = vld [vmem:[%s3785_s29 + $0x71] sm:$0xff] }
  0x17   : > { %v253_v26 = vld [vmem:[%s3785_s29 + $0xb9] sm:$0xff]  ;;  %v262_v27 = vld [vmem:[%s3785_s29 + $0x101] sm:$0xff]  ;;  %v235_v28 = vld [vmem:[%s3785_s29 + $0x29] sm:$0xff] }
  0x18   : > { %v245_v32 = vld [vmem:[%s3785_s29 + $0x79] sm:$0xff]  ;;  %v254_v33 = vld [vmem:[%s3785_s29 + $0xc1] sm:$0xff]  ;;  %v263_v34 = vld [vmem:[%s3785_s29 + $0x109] sm:$0xff] }
  0x19   : > { %3344 = vmatmul.msk.f32.gmra.mxu1 %vm268_vm0, %v240_v9  ;;  %3353 = vmatmul.msk.f32.gmra.mxu2 %vm268_vm0, %v249_v10  ;;  %v236_v35 = vld [vmem:[%s3785_s29 + $0x31] sm:$0xff]  ;;  %v246_v37 = vld [vmem:[%s3785_s29 + $0x81] sm:$0xff]  ;;  %v255_v38 = vld [vmem:[%s3785_s29 + $0xc9] sm:$0xff] }
  0x1a   : > { %3362 = vmatmul.msk.f32.gmra.mxu3 %vm268_vm0, %v258_v11  ;;  %3335 = vmatmul.msk.f32.gmra.mxu0 %vm268_vm0, %v231_v12  ;;  %v264_v39 = vld [vmem:[%s3785_s29 + $0x111] sm:$0xff]  ;;  %v237_v40 = vld [vmem:[%s3785_s29 + $0x39] sm:$0xff]  ;;  %v247_v41 = vld [vmem:[%s3785_s29 + $0x89] sm:$0xff] }
  0x1b   : > { %v256_v42 = vld [vmem:[%s3785_s29 + $0xd1] sm:$0xff]  ;;  %v265_v43 = vld [vmem:[%s3785_s29 + $0x119] sm:$0xff]  ;;  %v238_v44 = vld [vmem:[%s3785_s29 + $0x41] sm:$0xff] }
  0x1c   : > { %v193_v45 = vld [vmem:[%s3785_s29] sm:$0xff]  ;;  %v1042_v47 = vld [vmem:[%s3785_s29 + $0x12] sm:$0xff]  ;;  %v194_v49 = vld [vmem:[%s3785_s29 + $0x8] sm:$0xff] }
  0x1d   : > { %v735_v46 = vld [vmem:[%s3785_s29 + $0x2] sm:$0xff]  ;;  %v1349_v48 = vld [vmem:[%s3785_s29 + $0x13] sm:$0xff]  ;;  %v736_v50 = vld [vmem:[%s3785_s29 + $0xa] sm:$0xff] }
  0x1e   : > { %v1043_v51 = vld [vmem:[%s3785_s29 + $0x1a] sm:$0xff]  ;;  %v195_v53 = vld [vmem:[%s3785_s29 + $0x10] sm:$0xff]  ;;  %v1044_v54 = vld [vmem:[%s3785_s29 + $0x22] sm:$0xff] }
  0x1f   : > { %v1350_v52 = vld [vmem:[%s3785_s29 + $0x1b] sm:$0xff]  ;;  %v1351_v55 = vld [vmem:[%s3785_s29 + $0x23] sm:$0xff]  ;;  %v1352_v58 = vld [vmem:[%s3785_s29 + $0x2b] sm:$0xff] }
  0x20   : > { %v196_v56 = vld [vmem:[%s3785_s29 + $0x18] sm:$0xff]  ;;  %v1045_v57 = vld [vmem:[%s3785_s29 + $0x2a] sm:$0xff]  ;;  %v197_v59 = vld [vmem:[%s3785_s29 + $0x20] sm:$0xff] }
  0x21   : > { %3345 = vmatmul.msk.f32.gmra.mxu1 %vm268_vm0, %v241_v13  ;;  %3354 = vmatmul.msk.f32.gmra.mxu2 %vm268_vm0, %v250_v14  ;;  %v1046_v60 = vld [vmem:[%s3785_s29 + $0x32] sm:$0xff]  ;;  %v198_v62 = vld [vmem:[%s3785_s29 + $0x28] sm:$0xff]  ;;  %v1047_v63 = vld [vmem:[%s3785_s29 + $0x3a] sm:$0xff] }
  0x22   : > { %3363 = vmatmul.msk.f32.gmra.mxu3 %vm268_vm0, %v259_v15  ;;  %3336 = vmatmul.msk.f32.gmra.mxu0 %vm268_vm0, %v232_v16  ;;  %v1353_v61 = vld [vmem:[%s3785_s29 + $0x33] sm:$0xff]  ;;  %v1354_v0 = vld [vmem:[%s3785_s29 + $0x3b] sm:$0xff]  ;;  %v1355_v3 = vld [vmem:[%s3785_s29 + $0x43] sm:$0xff] }
  0x23   : > { %v199_v1 = vld [vmem:[%s3785_s29 + $0x30] sm:$0xff]  ;;  %v1048_v2 = vld [vmem:[%s3785_s29 + $0x42] sm:$0xff]  ;;  %v200_v5 = vld [vmem:[%s3785_s29 + $0x38] sm:$0xff] }
  0x24   : > { %v1049_v6 = vld [vmem:[%s3785_s29 + $0x4a] sm:$0xff]  ;;  %v201_v12 = vld [vmem:[%s3785_s29 + $0x40] sm:$0xff]  ;;  %v1050_v13 = vld [vmem:[%s3785_s29 + $0x52] sm:$0xff] }
  0x25   : > { %v1356_v8 = vld [vmem:[%s3785_s29 + $0x4b] sm:$0xff]  ;;  %v1357_v15 = vld [vmem:[%s3785_s29 + $0x53] sm:$0xff]  ;;  %v1359_v29 = vld [vmem:[%s3785_s29 + $0x63] sm:$0xff] }
  0x26   : > { %v1360_v36 = vld [vmem:[%s3785_s29 + $0x6b] sm:$0xff] }
  0x29   : > { %3346 = vmatmul.msk.f32.gmra.mxu1 %vm268_vm0, %v242_v17  ;;  %3355 = vmatmul.msk.f32.gmra.mxu2 %vm268_vm0, %v251_v18 }
  0x2a   : > { %3364 = vmatmul.msk.f32.gmra.mxu3 %vm268_vm0, %v260_v19  ;;  %3337 = vmatmul.msk.f32.gmra.mxu0 %vm268_vm0, %v233_v20  ;;  %v202_v19 = vld [vmem:[%s3785_s29 + $0x48] sm:$0xff]  ;;  %v1051_v20 = vld [vmem:[%s3785_s29 + $0x5a] sm:$0xff] }
  0x31   : > { %3347 = vmatmul.msk.f32.gmra.mxu1 %vm268_vm0, %v243_v21  ;;  %3356 = vmatmul.msk.f32.gmra.mxu2 %vm268_vm0, %v252_v22  ;;  %v1358_v22 = vld [vmem:[%s3785_s29 + $0x5b] sm:$0xff] }
  0x32   : > { %3365 = vmatmul.msk.f32.gmra.mxu3 %vm268_vm0, %v261_v23  ;;  %3338 = vmatmul.msk.f32.gmra.mxu0 %vm268_vm0, %v234_v24 }
  0x39   : > { %3348 = vmatmul.msk.f32.gmra.mxu1 %vm268_vm0, %v244_v25  ;;  %3357 = vmatmul.msk.f32.gmra.mxu2 %vm268_vm0, %v253_v26  ;;  %v203_v26 = vld [vmem:[%s3785_s29 + $0x50] sm:$0xff] }
  0x3a   : > { %3366 = vmatmul.msk.f32.gmra.mxu3 %vm268_vm0, %v262_v27  ;;  %3339 = vmatmul.msk.f32.gmra.mxu0 %vm268_vm0, %v235_v28  ;;  %v1052_v27 = vld [vmem:[%s3785_s29 + $0x62] sm:$0xff] }
  0x41   : > { %3349 = vmatmul.msk.f32.gmra.mxu1 %vm268_vm0, %v245_v32  ;;  %3358 = vmatmul.msk.f32.gmra.mxu2 %vm268_vm0, %v254_v33  ;;  %v204_v33 = vld [vmem:[%s3785_s29 + $0x58] sm:$0xff] }
  0x42   : > { %3367 = vmatmul.msk.f32.gmra.mxu3 %vm268_vm0, %v263_v34  ;;  %3340 = vmatmul.msk.f32.gmra.mxu0 %vm268_vm0, %v236_v35  ;;  %v1053_v34 = vld [vmem:[%s3785_s29 + $0x6a] sm:$0xff] }
  0x49   : > { %3350 = vmatmul.msk.f32.gmra.mxu1 %vm268_vm0, %v246_v37  ;;  %3359 = vmatmul.msk.f32.gmra.mxu2 %vm268_vm0, %v255_v38 }
  0x4a   : > { %3368 = vmatmul.msk.f32.gmra.mxu3 %vm268_vm0, %v264_v39  ;;  %3341 = vmatmul.msk.f32.gmra.mxu0 %vm268_vm0, %v237_v40  ;;  %v205_v40 = vld [vmem:[%s3785_s29 + $0x60] sm:$0xff] }
  0x51   : > { %3351 = vmatmul.msk.f32.gmra.mxu1 %vm268_vm0, %v247_v41  ;;  %3360 = vmatmul.msk.f32.gmra.mxu2 %vm268_vm0, %v256_v42  ;;  %v1054_v41 = vld [vmem:[%s3785_s29 + $0x72] sm:$0xff] }
  0x52   : > { %3369 = vmatmul.msk.f32.gmra.mxu3 %vm268_vm0, %v265_v43  ;;  %3342 = vmatmul.msk.f32.gmra.mxu0 %vm268_vm0, %v238_v44  ;;  %v1361_v43 = vld [vmem:[%s3785_s29 + $0x73] sm:$0xff] }
  0x59   : > { %3370 = vmatmul.msk.f32.vlgmr.msrb.gmra.mxu1 %vm268_vm0, %v193_v45  ;;  %3407 = vmatmul.msk.f32.vlgmr.msrb.gmra.mxu2 %vm268_vm0, %v735_v46 }
  0x5a   : > { %3444 = vmatmul.msk.f32.vlgmr.msrb.gmra.mxu3 %vm268_vm0, %v1042_v47  ;;  %3481 = vmatmul.msk.f32.vlgmr.msrb.gmra.mxu0 %vm268_vm0, %v1349_v48  ;;  %v1055_v48 = vld [vmem:[%s3785_s29 + $0x7a] sm:$0xff] }
  0x61   : > { %3371 = vmatmul.msk.f32.gmra.mxu1 %vm268_vm0, %v194_v49  ;;  %3408 = vmatmul.msk.f32.gmra.mxu2 %vm268_vm0, %v736_v50  ;;  %v1362_v50 = vld [vmem:[%s3785_s29 + $0x7b] sm:$0xff] }
  0x62   : > { %3445 = vmatmul.msk.f32.gmra.mxu3 %vm268_vm0, %v1043_v51  ;;  %3482 = vmatmul.msk.f32.gmra.mxu0 %vm268_vm0, %v1350_v52 }
  0x69   : > { %3372 = vmatmul.msk.f32.gmra.mxu1 %vm268_vm0, %v195_v53  ;;  %3409 = vmatmul.msk.f32.gmra.mxu2 %vm268_vm0, %v1042_v47  ;;  %v206_v47 = vld [vmem:[%s3785_s29 + $0x68] sm:$0xff] }
  0x6a   : > { %3446 = vmatmul.msk.f32.gmra.mxu3 %vm268_vm0, %v1044_v54  ;;  %3483 = vmatmul.msk.f32.gmra.mxu0 %vm268_vm0, %v1351_v55  ;;  %v1056_v55 = vld [vmem:[%s3785_s29 + $0x82] sm:$0xff] }
  0x71   : > { %3373 = vmatmul.msk.f32.gmra.mxu1 %vm268_vm0, %v196_v56  ;;  %3410 = vmatmul.msk.f32.gmra.mxu2 %vm268_vm0, %v1043_v51 }
  0x72   : > { %3447 = vmatmul.msk.f32.gmra.mxu3 %vm268_vm0, %v1045_v57  ;;  %3484 = vmatmul.msk.f32.gmra.mxu0 %vm268_vm0, %v1352_v58 }
  0x79   : > { %3374 = vmatmul.msk.f32.gmra.mxu1 %vm268_vm0, %v197_v59  ;;  %3411 = vmatmul.msk.f32.gmra.mxu2 %vm268_vm0, %v1044_v54  ;;  %v207_v54 = vld [vmem:[%s3785_s29 + $0x70] sm:$0xff] }
  0x7a   : > { %3448 = vmatmul.msk.f32.gmra.mxu3 %vm268_vm0, %v1046_v60  ;;  %3485 = vmatmul.msk.f32.gmra.mxu0 %vm268_vm0, %v1353_v61  ;;  %v208_v61 = vld [vmem:[%s3785_s29 + $0x78] sm:$0xff] }
  0x81   : > { %3375 = vmatmul.msk.f32.gmra.mxu1 %vm268_vm0, %v198_v62  ;;  %3412 = vmatmul.msk.f32.gmra.mxu2 %vm268_vm0, %v1045_v57  ;;  %v1363_v57 = vld [vmem:[%s3785_s29 + $0x83] sm:$0xff] }
  0x82   : > { %3449 = vmatmul.msk.f32.gmra.mxu3 %vm268_vm0, %v1047_v63  ;;  %3486 = vmatmul.msk.f32.gmra.mxu0 %vm268_vm0, %v1354_v0  ;;  %v1057_v62 = vld [vmem:[%s3785_s29 + $0x8a] sm:$0xff] }
  0x83   : > { %v1364_v0 = vld [vmem:[%s3785_s29 + $0x8b] sm:$0xff] }
  0x89   : > { %3376 = vmatmul.msk.f32.gmra.mxu1 %vm268_vm0, %v199_v1  ;;  %3413 = vmatmul.msk.f32.gmra.mxu2 %vm268_vm0, %v1046_v60 }
  0x8a   : > { %3450 = vmatmul.msk.f32.gmra.mxu3 %vm268_vm0, %v1048_v2  ;;  %3487 = vmatmul.msk.f32.gmra.mxu0 %vm268_vm0, %v1355_v3 }
  0x8e   : > { %v3922_v4 = vpop.f32.mrf.mxu1 }
  0x8f   : > { %v3926_v7 = vpop.f32.mrf.mxu0 }
  0x91   : > { %3377 = vmatmul.msk.f32.gmra.mxu1 %vm268_vm0, %v200_v5  ;;  %3414 = vmatmul.msk.f32.gmra.mxu2 %vm268_vm0, %v1047_v63  ;;  %v209_v5 = vld [vmem:[%s3785_s29 + $0x80] sm:$0xff] }
  0x92   : > { %3451 = vmatmul.msk.f32.gmra.mxu3 %vm268_vm0, %v1049_v6  ;;  %3488 = vmatmul.msk.f32.gmra.mxu0 %vm268_vm0, %v1356_v8 }
  0x94   : > { %v3933_v9 = vpop.f32.mrf.mxu2 }
  0x95   : > { %v3935_v10 = vpop.f32.mrf.mxu3 }
  0x96   : > { %v3937_v11 = vpop.f32.mrf.mxu1 }
  0x97   : > { %v3941_v14 = vpop.f32.mrf.mxu0 }
  0x99   : > { %3378 = vmatmul.msk.f32.gmra.mxu1 %vm268_vm0, %v201_v12  ;;  %3415 = vmatmul.msk.f32.gmra.mxu2 %vm268_vm0, %v1048_v2  ;;  %v1365_v12 = vld [vmem:[%s3785_s29 + $0x93] sm:$0xff] }
  0x9a   : > { %3452 = vmatmul.msk.f32.gmra.mxu3 %vm268_vm0, %v1050_v13  ;;  %3489 = vmatmul.msk.f32.gmra.mxu0 %vm268_vm0, %v1357_v15 }
  0x9c   : > { %v3948_v16 = vpop.f32.mrf.mxu2 }
  0x9d   : > { %v3950_v17 = vpop.f32.mrf.mxu3 }
  0x9e   : > { %v3952_v18 = vpop.f32.mrf.mxu1 }
  0x9f   : > { %v3956_v21 = vpop.f32.mrf.mxu0 }
  0xa1   : > { %3379 = vmatmul.msk.f32.gmra.mxu1 %vm268_vm0, %v202_v19  ;;  %3416 = vmatmul.msk.f32.gmra.mxu2 %vm268_vm0, %v1049_v6  ;;  %v1058_v6 = vld [vmem:[%s3785_s29 + $0x92] sm:$0xff] }
  0xa2   : > { %3453 = vmatmul.msk.f32.gmra.mxu3 %vm268_vm0, %v1051_v20  ;;  %3490 = vmatmul.msk.f32.gmra.mxu0 %vm268_vm0, %v1358_v22 }
  0xa4   : > { %v3963_v23 = vpop.f32.mrf.mxu2 }
  0xa5   : > { %v3965_v24 = vpop.f32.mrf.mxu3 }
  0xa6   : > { %v3967_v25 = vpop.f32.mrf.mxu1 }
  0xa7   : > { %v3971_v28 = vpop.f32.mrf.mxu0 }
  0xa9   : > { %3380 = vmatmul.msk.f32.gmra.mxu1 %vm268_vm0, %v203_v26  ;;  %3417 = vmatmul.msk.f32.gmra.mxu2 %vm268_vm0, %v1050_v13  ;;  %v210_v26 = vld [vmem:[%s3785_s29 + $0x88] sm:$0xff] }
  0xaa   : > { %3454 = vmatmul.msk.f32.gmra.mxu3 %vm268_vm0, %v1052_v27  ;;  %3491 = vmatmul.msk.f32.gmra.mxu0 %vm268_vm0, %v1359_v29  ;;  %v1059_v29 = vld [vmem:[%s3785_s29 + $0x9a] sm:$0xff] }
  0xac   : > { %v3978_v30 = vpop.f32.mrf.mxu2 }
  0xad   : > { %v3980_v31 = vpop.f32.mrf.mxu3 }
  0xae   : > { %v3982_v32 = vpop.f32.mrf.mxu1 }
  0xaf   : > { %v3986_v35 = vpop.f32.mrf.mxu0 }
  0xb1   : > { %3381 = vmatmul.msk.f32.gmra.mxu1 %vm268_vm0, %v204_v33  ;;  %3418 = vmatmul.msk.f32.gmra.mxu2 %vm268_vm0, %v1051_v20 }
  0xb2   : > { %3455 = vmatmul.msk.f32.gmra.mxu3 %vm268_vm0, %v1053_v34  ;;  %3492 = vmatmul.msk.f32.gmra.mxu0 %vm268_vm0, %v1360_v36 }
  0xb4   : > { %v3993_v37 = vpop.f32.mrf.mxu2 }
  0xb5   : > { %v3995_v38 = vpop.f32.mrf.mxu3 }
  0xb6   : > { %v3997_v39 = vpop.f32.mrf.mxu1 }
  0xb7   : > { %v4001_v42 = vpop.f32.mrf.mxu0 }
  0xb9   : > { %3382 = vmatmul.msk.f32.gmra.mxu1 %vm268_vm0, %v205_v40  ;;  %3419 = vmatmul.msk.f32.gmra.mxu2 %vm268_vm0, %v1052_v27 }
  0xba   : > { %3456 = vmatmul.msk.f32.gmra.mxu3 %vm268_vm0, %v1054_v41  ;;  %3493 = vmatmul.msk.f32.gmra.mxu0 %vm268_vm0, %v1361_v43 }
  0xbc   : > { %v4008_v44 = vpop.f32.mrf.mxu2 }
  0xbd   : > { %v4010_v45 = vpop.f32.mrf.mxu3 }
  0xbe   : > { %v4012_v46 = vpop.f32.mrf.mxu1 }
  0xbf   : > { %v4016_v49 = vpop.f32.mrf.mxu0 }
  0xc1   : > { %3383 = vmatmul.msk.f32.gmra.mxu1 %vm268_vm0, %v206_v47  ;;  %3420 = vmatmul.msk.f32.gmra.mxu2 %vm268_vm0, %v1053_v34  ;;  %v1366_v34 = vld [vmem:[%s3785_s29 + $0x9b] sm:$0xff] }
  0xc2   : > { %3457 = vmatmul.msk.f32.gmra.mxu3 %vm268_vm0, %v1055_v48  ;;  %3494 = vmatmul.msk.f32.gmra.mxu0 %vm268_vm0, %v1362_v50 }
  0xc4   : > { %v4023_v51 = vpop.f32.mrf.mxu2 }
  0xc5   : > { %v4025_v52 = vpop.f32.mrf.mxu3 }
  0xc6   : > { %v4027_v53 = vpop.f32.mrf.mxu1 }
  0xc7   : > { %v4031_v56 = vpop.f32.mrf.mxu0 }
  0xc9   : > { %3384 = vmatmul.msk.f32.gmra.mxu1 %vm268_vm0, %v207_v54  ;;  %3421 = vmatmul.msk.f32.gmra.mxu2 %vm268_vm0, %v1054_v41  ;;  %v1060_v54 = vld [vmem:[%s3785_s29 + $0xa2] sm:$0xff] }
  0xca   : > { %3458 = vmatmul.msk.f32.gmra.mxu3 %vm268_vm0, %v1056_v55  ;;  %3495 = vmatmul.msk.f32.gmra.mxu0 %vm268_vm0, %v1363_v57  ;;  %v1367_v57 = vld [vmem:[%s3785_s29 + $0xa3] sm:$0xff] }
  0xcc   : > { %v4038_v58 = vpop.f32.mrf.mxu2 }
  0xcd   : > { %v4040_v59 = vpop.f32.mrf.mxu3 }
  0xce   : > { %v4042_v60 = vpop.f32.mrf.mxu1 }
  0xcf   : > { %v4046_v63 = vpop.f32.mrf.mxu0 }
  0xd1   : > { %3385 = vmatmul.msk.f32.gmra.mxu1 %vm268_vm0, %v208_v61  ;;  %3422 = vmatmul.msk.f32.gmra.mxu2 %vm268_vm0, %v1055_v48  ;;  %v211_v48 = vld [vmem:[%s3785_s29 + $0x90] sm:$0xff] }
  0xd2   : > { %3459 = vmatmul.msk.f32.gmra.mxu3 %vm268_vm0, %v1057_v62  ;;  %3496 = vmatmul.msk.f32.gmra.mxu0 %vm268_vm0, %v1364_v0 }
  0xd4   : > { %v4053_v1 = vpop.f32.mrf.mxu2 }
  0xd5   : > { %v4055_v2 = vpop.f32.mrf.mxu3 }
  0xd6   : > { %v627_v3 = vpop.f32.mrf.mxu1 }
  0xd7   : > { %v1512_v8 = vpop.f32.mrf.mxu0  ;;  %v628_v13 = vadd.f32 %v627_v3, %v3926_v7 }
  0xd9   : > { %3386 = vmatmul.msk.f32.gmra.mxu1 %vm268_vm0, %v209_v5  ;;  %3423 = vmatmul.msk.f32.gmra.mxu2 %vm268_vm0, %v1056_v55 }
  0xda   : > { %3460 = vmatmul.msk.f32.gmra.mxu3 %vm268_vm0, %v1058_v6  ;;  %3497 = vmatmul.msk.f32.gmra.mxu0 %vm268_vm0, %v1365_v12 }
  0xdc   : > { %v898_v15 = vpop.f32.mrf.mxu2 }
  0xdd   : > { %v1006_v19 = vadd.f32 %v898_v15, %v628_v13  ;;  %v1205_v20 = vpop.f32.mrf.mxu3  ;;  %v1061_v13 = vld [vmem:[%s3785_s29 + $0xaa] sm:$0xff] }
  0xde   : > { %v630_v22 = vpop.f32.mrf.mxu1 }
  0xdf   : > { %v1313_v27 = vadd.f32 %v1205_v20, %v1006_v19  ;;  %v1515_v33 = vpop.f32.mrf.mxu0  ;;  %v631_v7 = vadd.f32 %v630_v22, %v3941_v14  ;;  %v1368_v19 = vld [vmem:[%s3785_s29 + $0xab] sm:$0xff] }
  0xe1   : > { %v4068_v36 = vadd.f32 %v1512_v8, %v1313_v27  ;;  %3387 = vmatmul.msk.f32.gmra.mxu1 %vm268_vm0, %v210_v26  ;;  %3424 = vmatmul.msk.f32.gmra.mxu2 %vm268_vm0, %v1057_v62  ;;  %v212_v8 = vld [vmem:[%s3785_s29 + $0x98] sm:$0xff] }
  0xe2   : > { %3461 = vmatmul.msk.f32.gmra.mxu3 %vm268_vm0, %v1059_v29  ;;  %3498 = vmatmul.msk.f32.gmra.mxu0 %vm268_vm0, %v1366_v34 }
  0xe4   : > { %v901_v40 = vpop.f32.mrf.mxu2 }
  0xe5   : > { %v1007_v41 = vadd.f32 %v901_v40, %v631_v7  ;;  %v1208_v43 = vpop.f32.mrf.mxu3  ;;  %v1062_v7 = vld [vmem:[%s3785_s29 + $0xb2] sm:$0xff] }
  0xe6   : > { %v633_v47 = vpop.f32.mrf.mxu1 }
  0xe7   : > { %v1314_v50 = vadd.f32 %v1208_v43, %v1007_v41  ;;  %v1518_v55 = vpop.f32.mrf.mxu0  ;;  %v634_v14 = vadd.f32 %v633_v47, %v3956_v21  ;;  %v1369_v41 = vld [vmem:[%s3785_s29 + $0xb3] sm:$0xff] }
  0xe9   : > { %v4078_v61 = vadd.f32 %v1515_v33, %v1314_v50  ;;  %3388 = vmatmul.msk.f32.gmra.mxu1 %vm268_vm0, %v211_v48  ;;  %3425 = vmatmul.msk.f32.gmra.mxu2 %vm268_vm0, %v1058_v6  ;;  %v213_v33 = vld [vmem:[%s3785_s29 + $0xa0] sm:$0xff] }
  0xea   : > { %3462 = vmatmul.msk.f32.gmra.mxu3 %vm268_vm0, %v1060_v54  ;;  %3499 = vmatmul.msk.f32.gmra.mxu0 %vm268_vm0, %v1367_v57 }
  0xec   : > { %v904_v62 = vpop.f32.mrf.mxu2 }
  0xed   : > { %v1008_v0 = vadd.f32 %v904_v62, %v634_v14  ;;  %v1211_v3 = vpop.f32.mrf.mxu3  ;;  %v1063_v14 = vld [vmem:[%s3785_s29 + $0xba] sm:$0xff] }
  0xee   : > { %v636_v5 = vpop.f32.mrf.mxu1 }
  0xef   : > { %v1315_v12 = vadd.f32 %v1211_v3, %v1008_v0  ;;  %v1521_v15 = vpop.f32.mrf.mxu0  ;;  %v637_v21 = vadd.f32 %v636_v5, %v3971_v28  ;;  %v1370_v0 = vld [vmem:[%s3785_s29 + $0xbb] sm:$0xff] }
  0xf1   : > { %v4088_v20 = vadd.f32 %v1518_v55, %v1315_v12  ;;  %3389 = vmatmul.msk.f32.gmra.mxu1 %vm268_vm0, %v212_v8  ;;  %3426 = vmatmul.msk.f32.gmra.mxu2 %vm268_vm0, %v1059_v29  ;;  %v214_v55 = vld [vmem:[%s3785_s29 + $0xa8] sm:$0xff] }
  0xf2   : > { %3463 = vmatmul.msk.f32.gmra.mxu3 %vm268_vm0, %v1061_v13  ;;  %3500 = vmatmul.msk.f32.gmra.mxu0 %vm268_vm0, %v1368_v19 }
  0xf4   : > { %v907_v6 = vpop.f32.mrf.mxu2 }
  0xf5   : > { %v1009_v22 = vadd.f32 %v907_v6, %v637_v21  ;;  %v1214_v26 = vpop.f32.mrf.mxu3  ;;  %v1064_v21 = vld [vmem:[%s3785_s29 + $0xc2] sm:$0xff] }
  0xf6   : > { %v639_v27 = vpop.f32.mrf.mxu1 }
  0xf7   : > { %v1316_v34 = vadd.f32 %v1214_v26, %v1009_v22  ;;  %v1524_v40 = vpop.f32.mrf.mxu0  ;;  %v640_v28 = vadd.f32 %v639_v27, %v3986_v35  ;;  %v1371_v22 = vld [vmem:[%s3785_s29 + $0xc3] sm:$0xff] }
  0xf9   : > { %v4098_v43 = vadd.f32 %v1521_v15, %v1316_v34  ;;  %3390 = vmatmul.msk.f32.gmra.mxu1 %vm268_vm0, %v213_v33  ;;  %3427 = vmatmul.msk.f32.gmra.mxu2 %vm268_vm0, %v1060_v54  ;;  %v215_v15 = vld [vmem:[%s3785_s29 + $0xb0] sm:$0xff] }
  0xfa   : > { %3464 = vmatmul.msk.f32.gmra.mxu3 %vm268_vm0, %v1062_v7  ;;  %3501 = vmatmul.msk.f32.gmra.mxu0 %vm268_vm0, %v1369_v41 }
  0xfc   : > { %v910_v29 = vpop.f32.mrf.mxu2 }
  0xfd   : > { %v1010_v47 = vadd.f32 %v910_v29, %v640_v28  ;;  %v1217_v48 = vpop.f32.mrf.mxu3  ;;  %v1065_v28 = vld [vmem:[%s3785_s29 + $0xca] sm:$0xff] }
  0xfe   : > { %v642_v50 = vpop.f32.mrf.mxu1 }
  0xff   : > { %v1317_v57 = vadd.f32 %v1217_v48, %v1010_v47  ;;  %v1527_v62 = vpop.f32.mrf.mxu0  ;;  %v643_v35 = vadd.f32 %v642_v50, %v4001_v42  ;;  %v1372_v47 = vld [vmem:[%s3785_s29 + $0xcb] sm:$0xff] }
 0x101   : > { %v4108_v3 = vadd.f32 %v1524_v40, %v1317_v57  ;;  %3391 = vmatmul.msk.f32.gmra.mxu1 %vm268_vm0, %v214_v55  ;;  %3428 = vmatmul.msk.f32.gmra.mxu2 %vm268_vm0, %v1061_v13  ;;  %v216_v40 = vld [vmem:[%s3785_s29 + $0xb8] sm:$0xff] }
 0x102   : > { %3465 = vmatmul.msk.f32.gmra.mxu3 %vm268_vm0, %v1063_v14  ;;  %3502 = vmatmul.msk.f32.gmra.mxu0 %vm268_vm0, %v1370_v0 }
 0x104   : > { %v913_v54 = vpop.f32.mrf.mxu2 }
 0x105   : > { %v1011_v5 = vadd.f32 %v913_v54, %v643_v35  ;;  %v1220_v8 = vpop.f32.mrf.mxu3  ;;  %v1066_v35 = vld [vmem:[%s3785_s29 + $0xd2] sm:$0xff] }
 0x106   : > { %v645_v12 = vpop.f32.mrf.mxu1 }
 0x107   : > { %v1318_v19 = vadd.f32 %v1220_v8, %v1011_v5  ;;  %v1530_v6 = vpop.f32.mrf.mxu0  ;;  %v646_v42 = vadd.f32 %v645_v12, %v4016_v49  ;;  %v1373_v5 = vld [vmem:[%s3785_s29 + $0xd3] sm:$0xff] }
 0x109   : > { %v4118_v26 = vadd.f32 %v1527_v62, %v1318_v19  ;;  %3392 = vmatmul.msk.f32.gmra.mxu1 %vm268_vm0, %v215_v15  ;;  %3429 = vmatmul.msk.f32.gmra.mxu2 %vm268_vm0, %v1062_v7  ;;  %v217_v62 = vld [vmem:[%s3785_s29 + $0xc0] sm:$0xff] }
 0x10a   : > { %3466 = vmatmul.msk.f32.gmra.mxu3 %vm268_vm0, %v1064_v21  ;;  %3503 = vmatmul.msk.f32.gmra.mxu0 %vm268_vm0, %v1371_v22 }
 0x10c   : > { %v916_v13 = vpop.f32.mrf.mxu2 }
 0x10d   : > { %v1012_v27 = vadd.f32 %v916_v13, %v646_v42  ;;  %v1223_v33 = vpop.f32.mrf.mxu3  ;;  %v1067_v42 = vld [vmem:[%s3785_s29 + $0xda] sm:$0xff] }
 0x10e   : > { %v648_v34 = vpop.f32.mrf.mxu1 }
 0x10f   : > { %v1319_v41 = vadd.f32 %v1223_v33, %v1012_v27  ;;  %v1533_v29 = vpop.f32.mrf.mxu0  ;;  %v649_v49 = vadd.f32 %v648_v34, %v4031_v56  ;;  %v1374_v27 = vld [vmem:[%s3785_s29 + $0xdb] sm:$0xff] }
 0x111   : > { %v4128_v48 = vadd.f32 %v1530_v6, %v1319_v41  ;;  %3393 = vmatmul.msk.f32.gmra.mxu1 %vm268_vm0, %v216_v40  ;;  %3430 = vmatmul.msk.f32.gmra.mxu2 %vm268_vm0, %v1063_v14  ;;  %v218_v6 = vld [vmem:[%s3785_s29 + $0xc8] sm:$0xff] }
 0x112   : > { %3467 = vmatmul.msk.f32.gmra.mxu3 %vm268_vm0, %v1065_v28  ;;  %3504 = vmatmul.msk.f32.gmra.mxu0 %vm268_vm0, %v1372_v47 }
 0x114   : > { %v919_v7 = vpop.f32.mrf.mxu2 }
 0x115   : > { %v1013_v50 = vadd.f32 %v919_v7, %v649_v49  ;;  %v1226_v55 = vpop.f32.mrf.mxu3  ;;  %v1068_v49 = vld [vmem:[%s3785_s29 + $0xe2] sm:$0xff] }
 0x116   : > { %v651_v57 = vpop.f32.mrf.mxu1 }
 0x117   : > { %v1320_v0 = vadd.f32 %v1226_v55, %v1013_v50  ;;  %v1536_v54 = vpop.f32.mrf.mxu0  ;;  %v652_v56 = vadd.f32 %v651_v57, %v4046_v63  ;;  %v1375_v50 = vld [vmem:[%s3785_s29 + $0xe3] sm:$0xff] }
 0x119   : > { %v4138_v8 = vadd.f32 %v1533_v29, %v1320_v0  ;;  %3394 = vmatmul.msk.f32.gmra.mxu1 %vm268_vm0, %v217_v62  ;;  %3431 = vmatmul.msk.f32.gmra.mxu2 %vm268_vm0, %v1064_v21  ;;  %v219_v29 = vld [vmem:[%s3785_s29 + $0xd0] sm:$0xff] }
 0x11a   : > { %3468 = vmatmul.msk.f32.gmra.mxu3 %vm268_vm0, %v1066_v35  ;;  %3505 = vmatmul.msk.f32.gmra.mxu0 %vm268_vm0, %v1373_v5 }
 0x11c   : > { %v922_v14 = vpop.f32.mrf.mxu2 }
 0x11d   : > { %v1014_v12 = vadd.f32 %v922_v14, %v652_v56  ;;  %v1229_v15 = vpop.f32.mrf.mxu3  ;;  %v1069_v56 = vld [vmem:[%s3785_s29 + $0xea] sm:$0xff] }
 0x11e   : > { %v654_v19 = vpop.f32.mrf.mxu1 }
 0x11f   : > { %v1321_v22 = vadd.f32 %v1229_v15, %v1014_v12  ;;  %v1539_v13 = vpop.f32.mrf.mxu0  ;;  %v655_v63 = vadd.f32 %v654_v19, %v3922_v4  ;;  %v1376_v12 = vld [vmem:[%s3785_s29 + $0xeb] sm:$0xff] }
 0x121   : > { %v4148_v33 = vadd.f32 %v1536_v54, %v1321_v22  ;;  %3395 = vmatmul.msk.f32.gmra.mxu1 %vm268_vm0, %v218_v6  ;;  %3432 = vmatmul.msk.f32.gmra.mxu2 %vm268_vm0, %v1065_v28  ;;  %v220_v54 = vld [vmem:[%s3785_s29 + $0xd8] sm:$0xff] }
 0x122   : > { %3469 = vmatmul.msk.f32.gmra.mxu3 %vm268_vm0, %v1067_v42  ;;  %3506 = vmatmul.msk.f32.gmra.mxu0 %vm268_vm0, %v1374_v27 }
 0x124   : > { %v925_v21 = vpop.f32.mrf.mxu2 }
 0x125   : > { %v1015_v34 = vadd.f32 %v925_v21, %v655_v63  ;;  %v1232_v40 = vpop.f32.mrf.mxu3  ;;  %v1070_v63 = vld [vmem:[%s3785_s29 + $0xf2] sm:$0xff] }
 0x126   : > { %v657_v41 = vpop.f32.mrf.mxu1 }
 0x127   : > { %v1322_v47 = vadd.f32 %v1232_v40, %v1015_v34  ;;  %v1542_v7 = vpop.f32.mrf.mxu0  ;;  %v658_v4 = vadd.f32 %v657_v41, %v3937_v11  ;;  %v1377_v34 = vld [vmem:[%s3785_s29 + $0xf3] sm:$0xff] }
 0x129   : > { %v4158_v55 = vadd.f32 %v1539_v13, %v1322_v47  ;;  %3396 = vmatmul.msk.f32.gmra.mxu1 %vm268_vm0, %v219_v29  ;;  %3433 = vmatmul.msk.f32.gmra.mxu2 %vm268_vm0, %v1066_v35  ;;  %v221_v13 = vld [vmem:[%s3785_s29 + $0xe0] sm:$0xff] }
 0x12a   : > { %3470 = vmatmul.msk.f32.gmra.mxu3 %vm268_vm0, %v1068_v49  ;;  %3507 = vmatmul.msk.f32.gmra.mxu0 %vm268_vm0, %v1375_v50 }
 0x12c   : > { %v928_v28 = vpop.f32.mrf.mxu2 }
 0x12d   : > { %v1016_v57 = vadd.f32 %v928_v28, %v658_v4  ;;  %v1235_v62 = vpop.f32.mrf.mxu3  ;;  %v1071_v4 = vld [vmem:[%s3785_s29 + $0xfa] sm:$0xff] }
 0x12e   : > { %v660_v0 = vpop.f32.mrf.mxu1 }
 0x12f   : > { %v1323_v5 = vadd.f32 %v1235_v62, %v1016_v57  ;;  %v1545_v14 = vpop.f32.mrf.mxu0  ;;  %v661_v11 = vadd.f32 %v660_v0, %v3952_v18  ;;  %v1378_v57 = vld [vmem:[%s3785_s29 + $0xfb] sm:$0xff] }
 0x131   : > { %v4168_v15 = vadd.f32 %v1542_v7, %v1323_v5  ;;  %3397 = vmatmul.msk.f32.gmra.mxu1 %vm268_vm0, %v220_v54  ;;  %3434 = vmatmul.msk.f32.gmra.mxu2 %vm268_vm0, %v1067_v42  ;;  %v222_v7 = vld [vmem:[%s3785_s29 + $0xe8] sm:$0xff] }
 0x132   : > { %3471 = vmatmul.msk.f32.gmra.mxu3 %vm268_vm0, %v1069_v56  ;;  %3508 = vmatmul.msk.f32.gmra.mxu0 %vm268_vm0, %v1376_v12 }
 0x134   : > { %v931_v35 = vpop.f32.mrf.mxu2 }
 0x135   : > { %v1017_v19 = vadd.f32 %v931_v35, %v661_v11  ;;  %v1238_v6 = vpop.f32.mrf.mxu3  ;;  %v1072_v11 = vld [vmem:[%s3785_s29 + $0x102] sm:$0xff] }
 0x136   : > { %v663_v22 = vpop.f32.mrf.mxu1 }
 0x137   : > { %v1324_v27 = vadd.f32 %v1238_v6, %v1017_v19  ;;  %v1548_v21 = vpop.f32.mrf.mxu0  ;;  %v664_v18 = vadd.f32 %v663_v22, %v3967_v25  ;;  %v1379_v19 = vld [vmem:[%s3785_s29 + $0x103] sm:$0xff] }
 0x139   : > { %v4178_v40 = vadd.f32 %v1545_v14, %v1324_v27  ;;  %3398 = vmatmul.msk.f32.gmra.mxu1 %vm268_vm0, %v221_v13  ;;  %3435 = vmatmul.msk.f32.gmra.mxu2 %vm268_vm0, %v1068_v49  ;;  %v223_v14 = vld [vmem:[%s3785_s29 + $0xf0] sm:$0xff] }
 0x13a   : > { %3472 = vmatmul.msk.f32.gmra.mxu3 %vm268_vm0, %v1070_v63  ;;  %3509 = vmatmul.msk.f32.gmra.mxu0 %vm268_vm0, %v1377_v34 }
 0x13c   : > { %v934_v42 = vpop.f32.mrf.mxu2 }
 0x13d   : > { %v1018_v41 = vadd.f32 %v934_v42, %v664_v18  ;;  %v1241_v29 = vpop.f32.mrf.mxu3  ;;  %v1073_v18 = vld [vmem:[%s3785_s29 + $0x10a] sm:$0xff] }
 0x13e   : > { %v666_v47 = vpop.f32.mrf.mxu1 }
 0x13f   : > { %v1325_v50 = vadd.f32 %v1241_v29, %v1018_v41  ;;  %v1551_v28 = vpop.f32.mrf.mxu0  ;;  %v667_v25 = vadd.f32 %v666_v47, %v3982_v32  ;;  %v1380_v41 = vld [vmem:[%s3785_s29 + $0x10b] sm:$0xff] }
 0x141   : > { %v4188_v62 = vadd.f32 %v1548_v21, %v1325_v50  ;;  %3399 = vmatmul.msk.f32.gmra.mxu1 %vm268_vm0, %v222_v7  ;;  %3436 = vmatmul.msk.f32.gmra.mxu2 %vm268_vm0, %v1069_v56  ;;  %v224_v21 = vld [vmem:[%s3785_s29 + $0xf8] sm:$0xff] }
 0x142   : > { %3473 = vmatmul.msk.f32.gmra.mxu3 %vm268_vm0, %v1071_v4  ;;  %3510 = vmatmul.msk.f32.gmra.mxu0 %vm268_vm0, %v1378_v57 }
 0x144   : > { %v937_v49 = vpop.f32.mrf.mxu2 }
 0x145   : > { %v1019_v0 = vadd.f32 %v937_v49, %v667_v25  ;;  %v1244_v54 = vpop.f32.mrf.mxu3  ;;  %v1074_v25 = vld [vmem:[%s3785_s29 + $0x112] sm:$0xff] }
 0x146   : > { %v669_v5 = vpop.f32.mrf.mxu1 }
 0x147   : > { %v1326_v12 = vadd.f32 %v1244_v54, %v1019_v0  ;;  %v1554_v35 = vpop.f32.mrf.mxu0  ;;  %v670_v32 = vadd.f32 %v669_v5, %v3997_v39  ;;  %v1381_v0 = vld [vmem:[%s3785_s29 + $0x113] sm:$0xff] }
 0x149   : > { %v4198_v6 = vadd.f32 %v1551_v28, %v1326_v12  ;;  %3400 = vmatmul.msk.f32.gmra.mxu1 %vm268_vm0, %v223_v14  ;;  %3437 = vmatmul.msk.f32.gmra.mxu2 %vm268_vm0, %v1070_v63  ;;  %v225_v28 = vld [vmem:[%s3785_s29 + $0x100] sm:$0xff] }
 0x14a   : > { %3474 = vmatmul.msk.f32.gmra.mxu3 %vm268_vm0, %v1072_v11  ;;  %3511 = vmatmul.msk.f32.gmra.mxu0 %vm268_vm0, %v1379_v19 }
 0x14c   : > { %v940_v56 = vpop.f32.mrf.mxu2 }
 0x14d   : > { %v1020_v22 = vadd.f32 %v940_v56, %v670_v32  ;;  %v1247_v13 = vpop.f32.mrf.mxu3  ;;  %v1075_v32 = vld [vmem:[%s3785_s29 + $0x11a] sm:$0xff] }
 0x14e   : > { %v672_v27 = vpop.f32.mrf.mxu1 }
 0x14f   : > { %v1327_v34 = vadd.f32 %v1247_v13, %v1020_v22  ;;  %v1557_v42 = vpop.f32.mrf.mxu0  ;;  %v673_v39 = vadd.f32 %v672_v27, %v4012_v46  ;;  %v1382_v22 = vld [vmem:[%s3785_s29 + $0x11b] sm:$0xff] }
 0x151   : > { %v4208_v29 = vadd.f32 %v1554_v35, %v1327_v34  ;;  %3401 = vmatmul.msk.f32.gmra.mxu1 %vm268_vm0, %v224_v21  ;;  %3438 = vmatmul.msk.f32.gmra.mxu2 %vm268_vm0, %v1071_v4  ;;  %v226_v35 = vld [vmem:[%s3785_s29 + $0x108] sm:$0xff] }
 0x152   : > { %3475 = vmatmul.msk.f32.gmra.mxu3 %vm268_vm0, %v1073_v18  ;;  %3512 = vmatmul.msk.f32.gmra.mxu0 %vm268_vm0, %v1380_v41 }
 0x154   : > { %v943_v63 = vpop.f32.mrf.mxu2 }
 0x155   : > { %v1021_v47 = vadd.f32 %v943_v63, %v673_v39  ;;  %v1250_v7 = vpop.f32.mrf.mxu3  ;;  %v1076_v39 = vld [vmem:[%s3785_s29 + $0x122] sm:$0xff] }
 0x156   : > { %v675_v50 = vpop.f32.mrf.mxu1 }
 0x157   : > { %v1328_v57 = vadd.f32 %v1250_v7, %v1021_v47  ;;  %v1560_v49 = vpop.f32.mrf.mxu0  ;;  %v676_v46 = vadd.f32 %v675_v50, %v4027_v53  ;;  %v1383_v47 = vld [vmem:[%s3785_s29 + $0x123] sm:$0xff] }
 0x159   : > { %v4218_v54 = vadd.f32 %v1557_v42, %v1328_v57  ;;  %3402 = vmatmul.msk.f32.gmra.mxu1 %vm268_vm0, %v225_v28  ;;  %3439 = vmatmul.msk.f32.gmra.mxu2 %vm268_vm0, %v1072_v11  ;;  %v227_v42 = vld [vmem:[%s3785_s29 + $0x110] sm:$0xff] }
 0x15a   : > { %3476 = vmatmul.msk.f32.gmra.mxu3 %vm268_vm0, %v1074_v25  ;;  %3513 = vmatmul.msk.f32.gmra.mxu0 %vm268_vm0, %v1381_v0 }
 0x15c   : > { %v946_v4 = vpop.f32.mrf.mxu2 }
 0x15d   : > { %v1022_v5 = vadd.f32 %v946_v4, %v676_v46  ;;  %v1253_v14 = vpop.f32.mrf.mxu3  ;;  %v1077_v46 = vld [vmem:[%s3785_s29 + $0x12a] sm:$0xff] }
 0x15e   : > { %v678_v12 = vpop.f32.mrf.mxu1 }
 0x15f   : > { %v1329_v19 = vadd.f32 %v1253_v14, %v1022_v5  ;;  %v1563_v56 = vpop.f32.mrf.mxu0  ;;  %v679_v53 = vadd.f32 %v678_v12, %v4042_v60  ;;  %v1384_v5 = vld [vmem:[%s3785_s29 + $0x12b] sm:$0xff]  ;;  %v3724_v14 = vmov 0  }
 0x160   : > { %3697 = vset.pattern.permute.xlu0 %v3724_v14  ;;  %3698 = vset.pattern.permute.xlu1 %v3724_v14 }
 0x161   : > { %v4228_v13 = vadd.f32 %v1560_v49, %v1329_v19  ;;  %3403 = vmatmul.msk.f32.gmra.mxu1 %vm268_vm0, %v226_v35  ;;  %3440 = vmatmul.msk.f32.gmra.mxu2 %vm268_vm0, %v1073_v18  ;;  %v228_v49 = vld [vmem:[%s3785_s29 + $0x118] sm:$0xff] }
 0x162   : > { %3477 = vmatmul.msk.f32.gmra.mxu3 %vm268_vm0, %v1075_v32  ;;  %3514 = vmatmul.msk.f32.gmra.mxu0 %vm268_vm0, %v1382_v22 }
 0x163   : > { %3699 = vset.pattern.permute.xlu2 %v3724_v14 }
 0x164   : > { %v949_v11 = vpop.f32.mrf.mxu2 }
 0x165   : > { %v1023_v27 = vadd.f32 %v949_v11, %v679_v53  ;;  %v1256_v21 = vpop.f32.mrf.mxu3  ;;  %v1656_v53 = vld [vmem:[%s3785_s29 + $0x14] sm:$0xff]  ;;  %v1963_v11 = vld [vmem:[%s3785_s29 + $0x24] sm:$0xff] }
 0x166   : > { %v681_v34 = vpop.f32.mrf.mxu1 }
 0x167   : > { %v1330_v41 = vadd.f32 %v1256_v21, %v1023_v27  ;;  %v1566_v63 = vpop.f32.mrf.mxu0  ;;  %v682_v60 = vadd.f32 %v681_v34, %v3933_v9  ;;  %v2270_v21 = vld [vmem:[%s3785_s29 + $0x25] sm:$0xff] }
 0x169   : > { %v4238_v7 = vadd.f32 %v1563_v56, %v1330_v41  ;;  %3404 = vmatmul.msk.f32.gmra.mxu1 %vm268_vm0, %v227_v42  ;;  %3441 = vmatmul.msk.f32.gmra.mxu2 %vm268_vm0, %v1074_v25  ;;  %v2884_v25 = vld [vmem:[%s4722_s2] sm:$0xff] }
 0x16a   : > { %3478 = vmatmul.msk.f32.gmra.mxu3 %vm268_vm0, %v1076_v39  ;;  %3515 = vmatmul.msk.f32.gmra.mxu0 %vm268_vm0, %v1383_v47  ;;  %v2577_v42 = vld [vmem:[%s3785_s29 + $0x26] sm:$0xff] }
 0x16b   : > { %2922 = vperm.xlu0 %3697, %v2884_v25  }
 0x16c   : > { %v952_v18 = vpop.f32.mrf.mxu2 }
 0x16d   : > { %v1024_v50 = vadd.f32 %v952_v18, %v682_v60  ;;  %v1259_v28 = vpop.f32.mrf.mxu3  ;;  %v1657_v18 = vld [vmem:[%s3785_s29 + $0x1c] sm:$0xff] }
 0x16e   : > { %v684_v57 = vpop.f32.mrf.mxu1 }
 0x16f   : > { %v1331_v0 = vadd.f32 %v1259_v28, %v1024_v50  ;;  %v1569_v4 = vpop.f32.mrf.mxu0  ;;  %v685_v12 = vadd.f32 %v684_v57, %v3948_v16  ;;  %v1964_v50 = vld [vmem:[%s3785_s29 + $0x2c] sm:$0xff] }
 0x170   : > { %v2271_v57 = vld [vmem:[%s3785_s29 + $0x2d] sm:$0xff] }
 0x171   : > { %v4251_v9 = vadd.f32 %v1566_v63, %v1331_v0  ;;  %3405 = vmatmul.msk.f32.gmra.mxu1 %vm268_vm0, %v228_v49  ;;  %3442 = vmatmul.msk.f32.gmra.mxu2 %vm268_vm0, %v1075_v32  ;;  %v2885_v32 = vld [vmem:[%s4722_s2 + $0x8] sm:$0xff] }
 0x172   : > { %3479 = vmatmul.msk.f32.gmra.mxu3 %vm268_vm0, %v1077_v46  ;;  %3516 = vmatmul.msk.f32.gmra.mxu0 %vm268_vm0, %v1384_v5  ;;  %v2578_v0 = vld [vmem:[%s3785_s29 + $0x2e] sm:$0xff] }
 0x173   : > { %2927 = vperm.xlu0 %3697, %v2885_v32   ;;  %v2886_v46 = vld [vmem:[%s4722_s2 + $0x10] sm:$0xff] }
 0x174   : > { %v955_v35 = vpop.f32.mrf.mxu2  ;;  %2932 = vperm.xlu1 %3698, %v2886_v46   ;;  %v1967_v46 = vld [vmem:[%s3785_s29 + $0x44] sm:$0xff] }
 0x175   : > { %v1025_v19 = vadd.f32 %v955_v35, %v685_v12  ;;  %v1262_v56 = vpop.f32.mrf.mxu3  ;;  %v1965_v35 = vld [vmem:[%s3785_s29 + $0x34] sm:$0xff] }
 0x176   : > { %v687_v22 = vpop.f32.mrf.mxu1 }
 0x177   : > { %v1332_v27 = vadd.f32 %v1262_v56, %v1025_v19  ;;  %v1572_v34 = vpop.f32.mrf.mxu0  ;;  %v688_v41 = vadd.f32 %v687_v22, %v3963_v23  ;;  %v2272_v56 = vld [vmem:[%s3785_s29 + $0x35] sm:$0xff] }
 0x179   : > { %v4265_v16 = vadd.f32 %v1569_v4, %v1332_v27  ;;  %3518 = vmatmul.msk.f32.vlgmr.msra.gmra.mxu1 %vm268_vm0, %v1656_v53  ;;  %3555 = vmatmul.msk.f32.vlgmr.msra.gmra.mxu2 %vm268_vm0, %v1963_v11  ;;  %v2579_v53 = vld [vmem:[%s3785_s29 + $0x36] sm:$0xff] }
 0x17a   : > { %3592 = vmatmul.msk.f32.vlgmr.msra.gmra.mxu3 %vm268_vm0, %v2270_v21  ;;  %3629 = vmatmul.msk.f32.vlgmr.msra.gmra.mxu0 %vm268_vm0, %v2577_v42  ;;  %v2887_v27 = vld [vmem:[%s4722_s2 + $0x18] sm:$0xff] }
 0x17c   : > { %v958_v39 = vpop.f32.mrf.mxu2  ;;  %2937 = vperm.xlu1 %3698, %v2887_v27  }
 0x17d   : > { %v1026_v63 = vadd.f32 %v958_v39, %v688_v41  ;;  %v1265_v47 = vpop.f32.mrf.mxu3  ;;  %v1966_v39 = vld [vmem:[%s3785_s29 + $0x3c] sm:$0xff] }
 0x17e   : > { %v690_v60 = vpop.f32.mrf.mxu1 }
 0x17f   : > { %v1333_v28 = vadd.f32 %v1265_v47, %v1026_v63  ;;  %v1575_v49 = vpop.f32.mrf.mxu0  ;;  %v691_v23 = vadd.f32 %v690_v60, %v3978_v30  ;;  %v2273_v47 = vld [vmem:[%s3785_s29 + $0x3d] sm:$0xff] }
 0x181   : > { %v4279_v4 = vadd.f32 %v1572_v34, %v1333_v28  ;;  %3519 = vmatmul.msk.f32.gmra.mxu1 %vm268_vm0, %v1657_v18  ;;  %3556 = vmatmul.msk.f32.gmra.mxu2 %vm268_vm0, %v1964_v50 }
 0x182   : > { %3593 = vmatmul.msk.f32.gmra.mxu3 %vm268_vm0, %v2271_v57  ;;  %3630 = vmatmul.msk.f32.gmra.mxu0 %vm268_vm0, %v2578_v0 }
 0x184   : > { %v961_v5 = vpop.f32.mrf.mxu2 }
 0x185   : > { %v1027_v14 = vadd.f32 %v961_v5, %v691_v23  ;;  %v1268_v25 = vpop.f32.mrf.mxu3  ;;  %v2274_v5 = vld [vmem:[%s3785_s29 + $0x45] sm:$0xff] }
 0x186   : > { %v693_v12 = vpop.f32.mrf.mxu1 }
 0x187   : > { %v1334_v19 = vadd.f32 %v1268_v25, %v1027_v14  ;;  %v1578_v22 = vpop.f32.mrf.mxu0  ;;  %v694_v30 = vadd.f32 %v693_v12, %v3993_v37 }
 0x189   : > { %v4292_v21 = vadd.f32 %v1575_v49, %v1334_v19  ;;  %3520 = vmatmul.msk.f32.gmra.mxu1 %vm268_vm0, %v1963_v11  ;;  %3557 = vmatmul.msk.f32.gmra.mxu2 %vm268_vm0, %v1965_v35  ;;  %v2580_v11 = vld [vmem:[%s3785_s29 + $0x3e] sm:$0xff] }
 0x18a   : > { %3594 = vmatmul.msk.f32.gmra.mxu3 %vm268_vm0, %v2272_v56  ;;  %3631 = vmatmul.msk.f32.gmra.mxu0 %vm268_vm0, %v2579_v53  ;;  %v1968_v53 = vld [vmem:[%s3785_s29 + $0x4c] sm:$0xff] }
 0x18c   : > { %v964_v34 = vpop.f32.mrf.mxu2 }
 0x18d   : > { %v1028_v42 = vadd.f32 %v964_v34, %v694_v30  ;;  %v1271_v32 = vpop.f32.mrf.mxu3  ;;  %v2275_v30 = vld [vmem:[%s3785_s29 + $0x4d] sm:$0xff] }
 0x18e   : > { %v696_v41 = vpop.f32.mrf.mxu1 }
 0x18f   : > { %v1335_v63 = vadd.f32 %v1271_v32, %v1028_v42  ;;  %v1581_v60 = vpop.f32.mrf.mxu0  ;;  %v697_v37 = vadd.f32 %v696_v41, %v4008_v44  ;;  %v2582_v42 = vld [vmem:[%s3785_s29 + $0x4e] sm:$0xff] }
 0x191   : > { %v4302_v18 = vadd.f32 %v1578_v22, %v1335_v63  ;;  %3521 = vmatmul.msk.f32.gmra.mxu1 %vm268_vm0, %v1964_v50  ;;  %3558 = vmatmul.msk.f32.gmra.mxu2 %vm268_vm0, %v1966_v39  ;;  %v2581_v50 = vld [vmem:[%s3785_s29 + $0x46] sm:$0xff] }
 0x192   : > { %3595 = vmatmul.msk.f32.gmra.mxu3 %vm268_vm0, %v2273_v47  ;;  %3632 = vmatmul.msk.f32.gmra.mxu0 %vm268_vm0, %v2580_v11  ;;  %v1969_v11 = vld [vmem:[%s3785_s29 + $0x54] sm:$0xff] }
 0x194   : > { %v967_v28 = vpop.f32.mrf.mxu2 }
 0x195   : > { %v1029_v57 = vadd.f32 %v967_v28, %v697_v37  ;;  %v1274_v49 = vpop.f32.mrf.mxu3  ;;  %v2276_v37 = vld [vmem:[%s3785_s29 + $0x55] sm:$0xff] }
 0x196   : > { %v699_v0 = vpop.f32.mrf.mxu1 }
 0x197   : > { %v1336_v23 = vadd.f32 %v1274_v49, %v1029_v57  ;;  %v1584_v14 = vpop.f32.mrf.mxu0  ;;  %v700_v44 = vadd.f32 %v699_v0, %v4023_v51  ;;  %v2583_v49 = vld [vmem:[%s3785_s29 + $0x56] sm:$0xff] }
 0x198   : > { %v2891_v0 = vld [vmem:[%s4722_s2 + $0x38] sm:$0xff] }
 0x199   : > { %v4312_v25 = vadd.f32 %v1581_v60, %v1336_v23  ;;  %3522 = vmatmul.msk.f32.gmra.mxu1 %vm268_vm0, %v1965_v35  ;;  %3559 = vmatmul.msk.f32.gmra.mxu2 %vm268_vm0, %v1967_v46  ;;  %v2890_v35 = vld [vmem:[%s4722_s2 + $0x30] sm:$0xff] }
 0x19a   : > { %3596 = vmatmul.msk.f32.gmra.mxu3 %vm268_vm0, %v2274_v5  ;;  %3633 = vmatmul.msk.f32.gmra.mxu0 %vm268_vm0, %v2581_v50 }
 0x19b   : > { %2952 = vperm.xlu0 %3697, %v2890_v35   ;;  %2957 = vperm.xlu1 %3698, %v2891_v0  }
 0x19c   : > { %v970_v12 = vpop.f32.mrf.mxu2 }
 0x19d   : > { %v1030_v19 = vadd.f32 %v970_v12, %v700_v44  ;;  %v1277_v56 = vpop.f32.mrf.mxu3  ;;  %v1970_v12 = vld [vmem:[%s3785_s29 + $0x5c] sm:$0xff] }
 0x19e   : > { %v702_v22 = vpop.f32.mrf.mxu1 }
 0x19f   : > { %v1337_v27 = vadd.f32 %v1277_v56, %v1030_v19  ;;  %v1587_v34 = vpop.f32.mrf.mxu0  ;;  %v703_v51 = vadd.f32 %v702_v22, %v4038_v58  ;;  %v2277_v56 = vld [vmem:[%s3785_s29 + $0x5d] sm:$0xff] }
 0x1a1   : > { %v4325_v32 = vadd.f32 %v1584_v14, %v1337_v27  ;;  %3523 = vmatmul.msk.f32.gmra.mxu1 %vm268_vm0, %v1966_v39  ;;  %3560 = vmatmul.msk.f32.gmra.mxu2 %vm268_vm0, %v1968_v53  ;;  %v2888_v39 = vld [vmem:[%s4722_s2 + $0x20] sm:$0xff] }
 0x1a2   : > { %3597 = vmatmul.msk.f32.gmra.mxu3 %vm268_vm0, %v2275_v30  ;;  %3634 = vmatmul.msk.f32.gmra.mxu0 %vm268_vm0, %v2582_v42  ;;  %v2584_v27 = vld [vmem:[%s3785_s29 + $0x5e] sm:$0xff] }
 0x1a3   : > { %2942 = vperm.xlu2 %3699, %v2888_v39  }
 0x1a4   : > { %v973_v41 = vpop.f32.mrf.mxu2 }
 0x1a5   : > { %v1031_v63 = vadd.f32 %v973_v41, %v703_v51  ;;  %v1280_v47 = vpop.f32.mrf.mxu3  ;;  %v1971_v41 = vld [vmem:[%s3785_s29 + $0x64] sm:$0xff] }
 0x1a6   : > { %v705_v60 = vpop.f32.mrf.mxu1 }
 0x1a7   : > { %v1338_v28 = vadd.f32 %v1280_v47, %v1031_v63  ;;  %v1590_v57 = vpop.f32.mrf.mxu0  ;;  %v706_v23 = vadd.f32 %v705_v60, %v4053_v1  ;;  %v2278_v47 = vld [vmem:[%s3785_s29 + $0x65] sm:$0xff] }
 0x1a9   : > { %v4341_v58 = vadd.f32 %v1587_v34, %v1338_v28  ;;  %3524 = vmatmul.msk.f32.gmra.mxu1 %vm268_vm0, %v1967_v46  ;;  %3561 = vmatmul.msk.f32.gmra.mxu2 %vm268_vm0, %v1969_v11  ;;  %v2889_v46 = vld [vmem:[%s4722_s2 + $0x28] sm:$0xff] }
 0x1aa   : > { %3598 = vmatmul.msk.f32.gmra.mxu3 %vm268_vm0, %v2276_v37  ;;  %3635 = vmatmul.msk.f32.gmra.mxu0 %vm268_vm0, %v2583_v49  ;;  %v2585_v37 = vld [vmem:[%s3785_s29 + $0x66] sm:$0xff] }
 0x1ab   : > { %2947 = vperm.xlu2 %3699, %v2889_v46  }
 0x1ac   : > { %v976_v5 = vpop.f32.mrf.mxu2 }
 0x1ad   : > { %v1032_v14 = vadd.f32 %v976_v5, %v706_v23  ;;  %v1283_v50 = vpop.f32.mrf.mxu3  ;;  %v1972_v23 = vld [vmem:[%s3785_s29 + $0x6c] sm:$0xff] }
 0x1ae   : > { %v708_v44 = vpop.f32.mrf.mxu1 }
 0x1af   : > { %v1339_v19 = vadd.f32 %v1283_v50, %v1032_v14  ;;  %v1593_v22 = vpop.f32.mrf.mxu0  ;;  %v709_v1 = vadd.f32 %v708_v44, %v3935_v10  ;;  %v2279_v14 = vld [vmem:[%s3785_s29 + $0x6d] sm:$0xff] }
 0x1b0   : > { %v2586_v44 = vld [vmem:[%s3785_s29 + $0x6e] sm:$0xff] }
 0x1b1   : > { %v4354_v30 = vadd.f32 %v1590_v57, %v1339_v19  ;;  %3525 = vmatmul.msk.f32.gmra.mxu1 %vm268_vm0, %v1968_v53  ;;  %3562 = vmatmul.msk.f32.gmra.mxu2 %vm268_vm0, %v1970_v12  ;;  %v2893_v53 = vld [vmem:[%s4722_s2 + $0x48] sm:$0xff] }
 0x1b2   : > { %3599 = vmatmul.msk.f32.gmra.mxu3 %vm268_vm0, %v2277_v56  ;;  %3636 = vmatmul.msk.f32.gmra.mxu0 %vm268_vm0, %v2584_v27 }
 0x1b3   : > { %2967 = vperm.xlu0 %3697, %v2893_v53  }
 0x1b4   : > { %v979_v34 = vpop.f32.mrf.mxu2 }
 0x1b5   : > { %v1033_v42 = vadd.f32 %v979_v34, %v709_v1  ;;  %v1286_v35 = vpop.f32.mrf.mxu3  ;;  %v1973_v1 = vld [vmem:[%s3785_s29 + $0x74] sm:$0xff] }
 0x1b6   : > { %v711_v51 = vpop.f32.mrf.mxu1 }
 0x1b7   : > { %v1340_v63 = vadd.f32 %v1286_v35, %v1033_v42  ;;  %v1596_v60 = vpop.f32.mrf.mxu0  ;;  %v712_v10 = vadd.f32 %v711_v51, %v3950_v17  ;;  %v2280_v42 = vld [vmem:[%s3785_s29 + $0x75] sm:$0xff] }
 0x1b8   : > { %v2587_v51 = vld [vmem:[%s3785_s29 + $0x76] sm:$0xff] }
 0x1b9   : > { %v4367_v28 = vadd.f32 %v1593_v22, %v1340_v63  ;;  %3526 = vmatmul.msk.f32.gmra.mxu1 %vm268_vm0, %v1969_v11  ;;  %3563 = vmatmul.msk.f32.gmra.mxu2 %vm268_vm0, %v1971_v41  ;;  %v2894_v11 = vld [vmem:[%s4722_s2 + $0x50] sm:$0xff] }
 0x1ba   : > { %3600 = vmatmul.msk.f32.gmra.mxu3 %vm268_vm0, %v2278_v47  ;;  %3637 = vmatmul.msk.f32.gmra.mxu0 %vm268_vm0, %v2585_v37 }
 0x1bb   : > { %2972 = vperm.xlu1 %3698, %v2894_v11  }
 0x1bc   : > { %v982_v57 = vpop.f32.mrf.mxu2 }
 0x1bd   : > { %v1034_v49 = vadd.f32 %v982_v57, %v712_v10  ;;  %v1289_v39 = vpop.f32.mrf.mxu3  ;;  %v1974_v10 = vld [vmem:[%s3785_s29 + $0x7c] sm:$0xff] }
 0x1be   : > { %v714_v0 = vpop.f32.mrf.mxu1 }
 0x1bf   : > { %v1341_v5 = vadd.f32 %v1289_v39, %v1034_v49  ;;  %v1599_v50 = vpop.f32.mrf.mxu0  ;;  %v715_v17 = vadd.f32 %v714_v0, %v3965_v24  ;;  %v2281_v49 = vld [vmem:[%s3785_s29 + $0x7d] sm:$0xff] }
 0x1c0   : > { %v2588_v0 = vld [vmem:[%s3785_s29 + $0x7e] sm:$0xff] }
 0x1c1   : > { %v4380_v19 = vadd.f32 %v1596_v60, %v1341_v5  ;;  %3527 = vmatmul.msk.f32.gmra.mxu1 %vm268_vm0, %v1970_v12  ;;  %3564 = vmatmul.msk.f32.gmra.mxu2 %vm268_vm0, %v1972_v23  ;;  %v2892_v12 = vld [vmem:[%s4722_s2 + $0x40] sm:$0xff] }
 0x1c2   : > { %3601 = vmatmul.msk.f32.gmra.mxu3 %vm268_vm0, %v2279_v14  ;;  %3638 = vmatmul.msk.f32.gmra.mxu0 %vm268_vm0, %v2586_v44 }
 0x1c3   : > { %2962 = vperm.xlu2 %3699, %v2892_v12  }
 0x1c4   : > { %v985_v56 = vpop.f32.mrf.mxu2 }
 0x1c5   : > { %v1035_v22 = vadd.f32 %v985_v56, %v715_v17  ;;  %v1292_v27 = vpop.f32.mrf.mxu3  ;;  %v1975_v17 = vld [vmem:[%s3785_s29 + $0x84] sm:$0xff] }
 0x1c6   : > { %v717_v46 = vpop.f32.mrf.mxu1 }
 0x1c7   : > { %v1342_v34 = vadd.f32 %v1292_v27, %v1035_v22  ;;  %v1602_v35 = vpop.f32.mrf.mxu0  ;;  %v718_v24 = vadd.f32 %v717_v46, %v3980_v31  ;;  %v2282_v22 = vld [vmem:[%s3785_s29 + $0x85] sm:$0xff] }
 0x1c8   : > { %v2589_v46 = vld [vmem:[%s3785_s29 + $0x86] sm:$0xff] }
 0x1c9   : > { %v4393_v63 = vadd.f32 %v1599_v50, %v1342_v34  ;;  %3528 = vmatmul.msk.f32.gmra.mxu1 %vm268_vm0, %v1971_v41  ;;  %3565 = vmatmul.msk.f32.gmra.mxu2 %vm268_vm0, %v1973_v1  ;;  %v2896_v41 = vld [vmem:[%s4722_s2 + $0x60] sm:$0xff] }
 0x1ca   : > { %3602 = vmatmul.msk.f32.gmra.mxu3 %vm268_vm0, %v2280_v42  ;;  %3639 = vmatmul.msk.f32.gmra.mxu0 %vm268_vm0, %v2587_v51 }
 0x1cb   : > { %2982 = vperm.xlu0 %3697, %v2896_v41  }
 0x1cc   : > { %v988_v47 = vpop.f32.mrf.mxu2 }
 0x1cd   : > { %v1036_v60 = vadd.f32 %v988_v47, %v718_v24  ;;  %v1295_v37 = vpop.f32.mrf.mxu3  ;;  %v1976_v24 = vld [vmem:[%s3785_s29 + $0x8c] sm:$0xff] }
 0x1ce   : > { %v720_v53 = vpop.f32.mrf.mxu1 }
 0x1cf   : > { %v1343_v57 = vadd.f32 %v1295_v37, %v1036_v60  ;;  %v1605_v39 = vpop.f32.mrf.mxu0  ;;  %v721_v31 = vadd.f32 %v720_v53, %v3995_v38  ;;  %v2283_v60 = vld [vmem:[%s3785_s29 + $0x8d] sm:$0xff] }
 0x1d0   : > { %v2590_v53 = vld [vmem:[%s3785_s29 + $0x8e] sm:$0xff] }
 0x1d1   : > { %v4406_v5 = vadd.f32 %v1602_v35, %v1343_v57  ;;  %3529 = vmatmul.msk.f32.gmra.mxu1 %vm268_vm0, %v1972_v23  ;;  %3566 = vmatmul.msk.f32.gmra.mxu2 %vm268_vm0, %v1974_v10  ;;  %v2897_v23 = vld [vmem:[%s4722_s2 + $0x68] sm:$0xff] }
 0x1d2   : > { %3603 = vmatmul.msk.f32.gmra.mxu3 %vm268_vm0, %v2281_v49  ;;  %3640 = vmatmul.msk.f32.gmra.mxu0 %vm268_vm0, %v2588_v0 }
 0x1d3   : > { %2987 = vperm.xlu1 %3698, %v2897_v23  }
 0x1d4   : > { %v991_v14 = vpop.f32.mrf.mxu2 }
 0x1d5   : > { %v1037_v50 = vadd.f32 %v991_v14, %v721_v31  ;;  %v1298_v44 = vpop.f32.mrf.mxu3  ;;  %v1977_v31 = vld [vmem:[%s3785_s29 + $0x94] sm:$0xff] }
 0x1d6   : > { %v723_v11 = vpop.f32.mrf.mxu1 }
 0x1d7   : > { %v1344_v56 = vadd.f32 %v1298_v44, %v1037_v50  ;;  %v1608_v27 = vpop.f32.mrf.mxu0  ;;  %v724_v38 = vadd.f32 %v723_v11, %v4010_v45  ;;  %v2284_v50 = vld [vmem:[%s3785_s29 + $0x95] sm:$0xff] }
 0x1d8   : > { %v2591_v11 = vld [vmem:[%s3785_s29 + $0x96] sm:$0xff] }
 0x1d9   : > { %v4419_v34 = vadd.f32 %v1605_v39, %v1344_v56  ;;  %3530 = vmatmul.msk.f32.gmra.mxu1 %vm268_vm0, %v1973_v1  ;;  %3567 = vmatmul.msk.f32.gmra.mxu2 %vm268_vm0, %v1975_v17  ;;  %v2895_v1 = vld [vmem:[%s4722_s2 + $0x58] sm:$0xff] }
 0x1da   : > { %3604 = vmatmul.msk.f32.gmra.mxu3 %vm268_vm0, %v2282_v22  ;;  %3641 = vmatmul.msk.f32.gmra.mxu0 %vm268_vm0, %v2589_v46 }
 0x1db   : > { %2977 = vperm.xlu2 %3699, %v2895_v1  }
 0x1dc   : > { %v994_v42 = vpop.f32.mrf.mxu2 }
 0x1dd   : > { %v1038_v35 = vadd.f32 %v994_v42, %v724_v38  ;;  %v1301_v51 = vpop.f32.mrf.mxu3  ;;  %v1978_v38 = vld [vmem:[%s3785_s29 + $0x9c] sm:$0xff] }
 0x1de   : > { %v726_v12 = vpop.f32.mrf.mxu1 }
 0x1df   : > { %v1345_v47 = vadd.f32 %v1301_v51, %v1038_v35  ;;  %v1611_v37 = vpop.f32.mrf.mxu0  ;;  %v727_v45 = vadd.f32 %v726_v12, %v4025_v52  ;;  %v2285_v35 = vld [vmem:[%s3785_s29 + $0x9d] sm:$0xff] }
 0x1e0   : > { %v2592_v12 = vld [vmem:[%s3785_s29 + $0x9e] sm:$0xff] }
 0x1e1   : > { %v4432_v57 = vadd.f32 %v1608_v27, %v1345_v47  ;;  %3531 = vmatmul.msk.f32.gmra.mxu1 %vm268_vm0, %v1974_v10  ;;  %3568 = vmatmul.msk.f32.gmra.mxu2 %vm268_vm0, %v1976_v24  ;;  %v2899_v10 = vld [vmem:[%s4722_s2 + $0x78] sm:$0xff] }
 0x1e2   : > { %3605 = vmatmul.msk.f32.gmra.mxu3 %vm268_vm0, %v2283_v60  ;;  %3642 = vmatmul.msk.f32.gmra.mxu0 %vm268_vm0, %v2590_v53 }
 0x1e3   : > { %2997 = vperm.xlu0 %3697, %v2899_v10  }
 0x1e4   : > { %v997_v49 = vpop.f32.mrf.mxu2 }
 0x1e5   : > { %v1039_v39 = vadd.f32 %v997_v49, %v727_v45  ;;  %v1304_v0 = vpop.f32.mrf.mxu3  ;;  %v1979_v45 = vld [vmem:[%s3785_s29 + $0xa4] sm:$0xff] }
 0x1e6   : > { %v729_v41 = vpop.f32.mrf.mxu1 }
 0x1e7   : > { %v1346_v14 = vadd.f32 %v1304_v0, %v1039_v39  ;;  %v1614_v44 = vpop.f32.mrf.mxu0  ;;  %v730_v52 = vadd.f32 %v729_v41, %v4040_v59  ;;  %v2286_v39 = vld [vmem:[%s3785_s29 + $0xa5] sm:$0xff] }
 0x1e8   : > { %v2593_v41 = vld [vmem:[%s3785_s29 + $0xa6] sm:$0xff] }
 0x1e9   : > { %v4445_v56 = vadd.f32 %v1611_v37, %v1346_v14  ;;  %3532 = vmatmul.msk.f32.gmra.mxu1 %vm268_vm0, %v1975_v17  ;;  %3569 = vmatmul.msk.f32.gmra.mxu2 %vm268_vm0, %v1977_v31  ;;  %v2900_v17 = vld [vmem:[%s4722_s2 + $0x80] sm:$0xff] }
 0x1ea   : > { %3606 = vmatmul.msk.f32.gmra.mxu3 %vm268_vm0, %v2284_v50  ;;  %3643 = vmatmul.msk.f32.gmra.mxu0 %vm268_vm0, %v2591_v11 }
 0x1eb   : > { %3002 = vperm.xlu1 %3698, %v2900_v17  }
 0x1ec   : > { %v1000_v22 = vpop.f32.mrf.mxu2 }
 0x1ed   : > { %v1040_v27 = vadd.f32 %v1000_v22, %v730_v52  ;;  %v1307_v46 = vpop.f32.mrf.mxu3  ;;  %v1980_v52 = vld [vmem:[%s3785_s29 + $0xac] sm:$0xff]  ;;  %v2923_v22 = vpop.permute.xlu0 %2922 }
 0x1ee   : > { %v732_v23 = vpop.f32.mrf.mxu1 }
 0x1ef   : > { %v1347_v42 = vadd.f32 %v1307_v46, %v1040_v27  ;;  %v1617_v51 = vpop.f32.mrf.mxu0  ;;  %v733_v59 = vadd.f32 %v732_v23, %v4055_v2  ;;  %v2287_v46 = vld [vmem:[%s3785_s29 + $0xad] sm:$0xff] }
 0x1f1   : > { %v4458_v47 = vadd.f32 %v1614_v44, %v1347_v42  ;;  %3533 = vmatmul.msk.f32.gmra.mxu1 %vm268_vm0, %v1976_v24  ;;  %3570 = vmatmul.msk.f32.gmra.mxu2 %vm268_vm0, %v1978_v38  ;;  %v2898_v24 = vld [vmem:[%s4722_s2 + $0x70] sm:$0xff] }
 0x1f2   : > { %3607 = vmatmul.msk.f32.gmra.mxu3 %vm268_vm0, %v2285_v35  ;;  %3644 = vmatmul.msk.f32.gmra.mxu0 %vm268_vm0, %v2592_v12  ;;  %v2594_v42 = vld [vmem:[%s3785_s29 + $0xae] sm:$0xff] }
 0x1f3   : > { %2992 = vperm.xlu2 %3699, %v2898_v24  }
 0x1f4   : > { %v1003_v60 = vpop.f32.mrf.mxu2 }
 0x1f5   : > { %v1041_v37 = vadd.f32 %v1003_v60, %v733_v59  ;;  %v1310_v53 = vpop.f32.mrf.mxu3  ;;  %v2903_v59 = vld [vmem:[%s4722_s2 + $0x98] sm:$0xff] }
 0x1f6   : > { %v1819_v1 = vpop.f32.mrf.mxu1  ;;  %3017 = vperm.xlu1 %3698, %v2903_v59  }
 0x1f7   : > { %v1348_v49 = vadd.f32 %v1310_v53, %v1041_v37  ;;  %v2740_v0 = vpop.f32.mrf.mxu0  ;;  %v1927_v2 = vadd.f32 %v1819_v1, %v4068_v36  ;;  %v1981_v37 = vld [vmem:[%s3785_s29 + $0xb4] sm:$0xff] }
 0x1f9   : > { %v4471_v14 = vadd.f32 %v1617_v51, %v1348_v49  ;;  %3534 = vmatmul.msk.f32.gmra.mxu1 %vm268_vm0, %v1977_v31  ;;  %3571 = vmatmul.msk.f32.gmra.mxu2 %vm268_vm0, %v1979_v45  ;;  %v2902_v31 = vld [vmem:[%s4722_s2 + $0x90] sm:$0xff] }
 0x1fa   : > { %3608 = vmatmul.msk.f32.gmra.mxu3 %vm268_vm0, %v2286_v39  ;;  %3645 = vmatmul.msk.f32.gmra.mxu0 %vm268_vm0, %v2593_v41  ;;  %v2595_v49 = vld [vmem:[%s3785_s29 + $0xb6] sm:$0xff]  ;;  %v2928_v39 = vpop.permute.xlu0 %2927 }
 0x1fb   : > { %3012 = vperm.xlu0 %3697, %v2902_v31  }
 0x1fc   : > { %v2126_v50 = vpop.f32.mrf.mxu2 }
 0x1fd   : > { %v2234_v44 = vadd.f32 %v2126_v50, %v1927_v2  ;;  %v2433_v11 = vpop.f32.mrf.mxu3  ;;  %v2905_v2 = vld [vmem:[%s4722_s2 + $0xa8] sm:$0xff] }
 0x1fe   : > { %v1822_v10 = vpop.f32.mrf.mxu1 }
 0x1ff   : > { %v2541_v27 = vadd.f32 %v2433_v11, %v2234_v44  ;;  %v2743_v23 = vpop.f32.mrf.mxu0  ;;  %v1928_v36 = vadd.f32 %v1822_v10, %v4078_v61 }
 0x201   : > { %v2848_v35 = vadd.f32 %v2740_v0, %v2541_v27  ;;  %3535 = vmatmul.msk.f32.gmra.mxu1 %vm268_vm0, %v1978_v38  ;;  %3572 = vmatmul.msk.f32.gmra.mxu2 %vm268_vm0, %v1980_v52  ;;  %v2288_v38 = vld [vmem:[%s3785_s29 + $0xb5] sm:$0xff] }
 0x202   : > { %3609 = vmatmul.msk.f32.gmra.mxu3 %vm268_vm0, %v2287_v46  ;;  %3646 = vmatmul.msk.f32.gmra.mxu0 %vm268_vm0, %v2594_v42  ;;  %v2906_v27 = vld [vmem:[%s4722_s2 + $0xb0] sm:$0xff] }
 0x203   : > { %v3100_v0 = vmul.f32 %v2923_v22, %v2848_v35  ;;  %3027 = vperm.xlu0 %3697, %v2905_v2   ;;  %3032 = vperm.xlu1 %3698, %v2906_v27   ;;  %v2289_v35 = vld [vmem:[%s3785_s29 + $0xbd] sm:$0xff]  ;;  %v2290_v2 = vld [vmem:[%s3785_s29 + $0xc5] sm:$0xff] }
 0x204   : > { %v2129_v51 = vpop.f32.mrf.mxu2  ;;  %v2911_v27 = vld [vmem:[%s4722_s2 + $0xd8] sm:$0xff] }
 0x205   : > { %v2235_v12 = vadd.f32 %v2129_v51, %v1928_v36  ;;  %v2436_v17 = vpop.f32.mrf.mxu3  ;;  %v3181_v44 = vmul.f32 %v3100_v0, %v3100_v0  ;;  %v2596_v51 = vld [vmem:[%s3785_s29 + $0xbe] sm:$0xff] }
 0x206   : > { %v1825_v60 = vpop.f32.mrf.mxu1 }
 0x207   : > { %v2542_v53 = vadd.f32 %v2436_v17, %v2235_v12  ;;  %v2746_v1 = vpop.f32.mrf.mxu0  ;;  %v1929_v61 = vadd.f32 %v1825_v60, %v4088_v20  ;;  %v1982_v20 = vld [vmem:[%s3785_s29 + $0xbc] sm:$0xff]  ;;  %v2901_v12 = vld [vmem:[%s4722_s2 + $0x88] sm:$0xff] }
 0x208   : > { %3007 = vperm.xlu2 %3699, %v2901_v12  }
 0x209   : > { %v2849_v41 = vadd.f32 %v2743_v23, %v2542_v53  ;;  %3536 = vmatmul.msk.f32.gmra.mxu1 %vm268_vm0, %v1979_v45  ;;  %3573 = vmatmul.msk.f32.gmra.mxu2 %vm268_vm0, %v1981_v37  ;;  %v2933_v23 = vpop.permute.xlu1 %2932  ;;  %v2908_v53 = vld [vmem:[%s4722_s2 + $0xc0] sm:$0xff] }
 0x20a   : > { %3610 = vmatmul.msk.f32.gmra.mxu3 %vm268_vm0, %v2288_v38  ;;  %3647 = vmatmul.msk.f32.gmra.mxu0 %vm268_vm0, %v2595_v49 }
 0x20b   : > { %v3101_v24 = vmul.f32 %v2928_v39, %v2849_v41  ;;  %3042 = vperm.xlu0 %3697, %v2908_v53   ;;  %v2598_v53 = vld [vmem:[%s3785_s29 + $0xce] sm:$0xff] }
 0x20c   : > { %v2132_v50 = vpop.f32.mrf.mxu2 }
 0x20d   : > { %v3137_v45 = vadd.f32 %v3101_v24, %v3100_v0  ;;  %v3182_v11 = vmul.f32 %v3101_v24, %v3101_v24  ;;  %v2236_v10 = vadd.f32 %v2132_v50, %v1929_v61  ;;  %v2439_v22 = vpop.f32.mrf.mxu3  ;;  %v2909_v0 = vld [vmem:[%s4722_s2 + $0xc8] sm:$0xff] }
 0x20e   : > { %v1828_v46 = vpop.f32.mrf.mxu1  ;;  %v1983_v61 = vld [vmem:[%s3785_s29 + $0xc4] sm:$0xff]  ;;  %3047 = vperm.xlu1 %3698, %v2909_v0  }
 0x20f   : > { %v3217_v42 = vadd.f32 %v3182_v11, %v3181_v44  ;;  %v2543_v31 = vadd.f32 %v2439_v22, %v2236_v10  ;;  %v2749_v36 = vpop.f32.mrf.mxu0  ;;  %v1930_v59 = vadd.f32 %v1828_v46, %v4098_v43  ;;  %v2597_v44 = vld [vmem:[%s3785_s29 + $0xc6] sm:$0xff] }
 0x211   : > { %v2850_v17 = vadd.f32 %v2746_v1, %v2543_v31  ;;  %3537 = vmatmul.msk.f32.gmra.mxu1 %vm268_vm0, %v1980_v52  ;;  %3574 = vmatmul.msk.f32.gmra.mxu2 %vm268_vm0, %v1982_v20  ;;  %v2938_v11 = vpop.permute.xlu1 %2937 }
 0x212   : > { %3611 = vmatmul.msk.f32.gmra.mxu3 %vm268_vm0, %v2289_v35  ;;  %3648 = vmatmul.msk.f32.gmra.mxu0 %vm268_vm0, %v2596_v51  ;;  %v2912_v35 = vld [vmem:[%s4722_s2 + $0xe0] sm:$0xff]  ;;  %v4538_v51 = vld [vmem:[%s3785_s29 + $0xcc] sm:$0xff] }
 0x213   : > { %v3102_v60 = vmul.f32 %v2933_v23, %v2850_v17  ;;  %3057 = vperm.xlu0 %3697, %v2911_v27   ;;  %v2907_v27 = vld [vmem:[%s4722_s2 + $0xb8] sm:$0xff] }
 0x214   : > { %v2135_v38 = vpop.f32.mrf.mxu2 }
 0x215   : > { %v3138_v1 = vadd.f32 %v3137_v45, %v3102_v60  ;;  %v3183_v49 = vmul.f32 %v3102_v60, %v3102_v60  ;;  %v2237_v52 = vadd.f32 %v2135_v38, %v1930_v59  ;;  %v2442_v39 = vpop.f32.mrf.mxu3  ;;  %v2291_v59 = vld [vmem:[%s3785_s29 + $0xcd] sm:$0xff]  ;;  %v2904_v38 = vld [vmem:[%s4722_s2 + $0xa0] sm:$0xff] }
 0x216   : > { %v1831_v41 = vpop.f32.mrf.mxu1  ;;  %3062 = vperm.xlu1 %3698, %v2912_v35   ;;  %3022 = vperm.xlu2 %3699, %v2904_v38   ;;  %v2293_v38 = vld [vmem:[%s3785_s29 + $0xdd] sm:$0xff] }
 0x217   : > { %v3218_v43 = vadd.f32 %v3217_v42, %v3183_v49  ;;  %v2544_v24 = vadd.f32 %v2442_v39, %v2237_v52  ;;  %v2752_v50 = vpop.f32.mrf.mxu0  ;;  %v1931_v45 = vadd.f32 %v1831_v41, %v4108_v3  ;;  %v2943_v3 = vpop.permute.xlu2 %2942  ;;  %v2914_v39 = vld [vmem:[%s4722_s2 + $0xf0] sm:$0xff] }
 0x219   : > { %v2851_v10 = vadd.f32 %v2749_v36, %v2544_v24  ;;  %3538 = vmatmul.msk.f32.gmra.mxu1 %vm268_vm0, %v1981_v37  ;;  %3575 = vmatmul.msk.f32.gmra.mxu2 %vm268_vm0, %v1983_v61 }
 0x21a   : > { %3612 = vmatmul.msk.f32.gmra.mxu3 %vm268_vm0, %v2290_v2  ;;  %3649 = vmatmul.msk.f32.gmra.mxu0 %vm268_vm0, %v2597_v44  ;;  %v2915_v2 = vld [vmem:[%s4722_s2 + $0xf8] sm:$0xff] }
 0x21b   : > { %v3103_v22 = vmul.f32 %v2938_v11, %v2851_v10  ;;  %3072 = vperm.xlu0 %3697, %v2914_v39   ;;  %v1985_v44 = vld [vmem:[%s3785_s29 + $0xd4] sm:$0xff]  ;;  %v2953_v39 = vpop.permute.xlu0 %2952 }
 0x21c   : > { %v2138_v46 = vpop.f32.mrf.mxu2  ;;  %v2292_v10 = vld [vmem:[%s3785_s29 + $0xd5] sm:$0xff] }
 0x21d   : > { %v3139_v23 = vadd.f32 %v3138_v1, %v3103_v22  ;;  %v3184_v42 = vmul.f32 %v3103_v22, %v3103_v22  ;;  %v2238_v37 = vadd.f32 %v2138_v46, %v1931_v45  ;;  %v2445_v31 = vpop.f32.mrf.mxu3  ;;  %v2599_v22 = vld [vmem:[%s3785_s29 + $0xd6] sm:$0xff] }
 0x21e   : > { %v1834_v36 = vpop.f32.mrf.mxu1  ;;  %3077 = vperm.xlu1 %3698, %v2915_v2   ;;  %3037 = vperm.xlu2 %3699, %v2907_v27  }
 0x21f   : > { %v3219_v12 = vadd.f32 %v3218_v43, %v3184_v42  ;;  %v2545_v17 = vadd.f32 %v2445_v31, %v2238_v37  ;;  %v2755_v60 = vpop.f32.mrf.mxu0  ;;  %v1932_v49 = vadd.f32 %v1834_v36, %v4118_v26  ;;  %v2948_v46 = vpop.permute.xlu2 %2947  ;;  %v2917_v31 = vld [vmem:[%s4722_s2 + $0x108] sm:$0xff] }
 0x221   : > { %v2852_v1 = vadd.f32 %v2752_v50, %v2545_v17  ;;  %3539 = vmatmul.msk.f32.gmra.mxu1 %vm268_vm0, %v1982_v20  ;;  %3576 = vmatmul.msk.f32.gmra.mxu2 %vm268_vm0, %v4538_v51  ;;  %v2918_v17 = vld [vmem:[%s4722_s2 + $0x110] sm:$0xff] }
 0x222   : > { %3613 = vmatmul.msk.f32.gmra.mxu3 %vm268_vm0, %v2291_v59  ;;  %3650 = vmatmul.msk.f32.gmra.mxu0 %vm268_vm0, %v2598_v53 }
 0x223   : > { %v3104_v52 = vmul.f32 %v2943_v3, %v2852_v1  ;;  %3087 = vperm.xlu0 %3697, %v2917_v31  }
 0x224   : > { %v2141_v0 = vpop.f32.mrf.mxu2 }
 0x225   : > { %v3140_v41 = vadd.f32 %v3139_v23, %v3104_v52  ;;  %v3185_v20 = vmul.f32 %v3104_v52, %v3104_v52  ;;  %v2239_v43 = vadd.f32 %v2141_v0, %v1932_v49  ;;  %v2448_v24 = vpop.f32.mrf.mxu3  ;;  %v2600_v49 = vld [vmem:[%s3785_s29 + $0xde] sm:$0xff]  ;;  %v2910_v52 = vld [vmem:[%s4722_s2 + $0xd0] sm:$0xff] }
 0x226   : > { %v1837_v50 = vpop.f32.mrf.mxu1  ;;  %3092 = vperm.xlu1 %3698, %v2918_v17   ;;  %3052 = vperm.xlu2 %3699, %v2910_v52  }
 0x227   : > { %v3220_v26 = vadd.f32 %v3219_v12, %v3185_v20  ;;  %v2546_v11 = vadd.f32 %v2448_v24, %v2239_v43  ;;  %v2758_v45 = vpop.f32.mrf.mxu0  ;;  %v1933_v42 = vadd.f32 %v1837_v50, %v4128_v48  ;;  %v2963_v52 = vpop.permute.xlu2 %2962 }
 0x229   : > { %v2853_v23 = vadd.f32 %v2755_v60, %v2546_v11  ;;  %3540 = vmatmul.msk.f32.gmra.mxu1 %vm268_vm0, %v1983_v61  ;;  %3577 = vmatmul.msk.f32.gmra.mxu2 %vm268_vm0, %v1985_v44  ;;  %v1986_v60 = vld [vmem:[%s3785_s29 + $0xdc] sm:$0xff] }
 0x22a   : > { %3614 = vmatmul.msk.f32.gmra.mxu3 %vm268_vm0, %v2292_v10  ;;  %3651 = vmatmul.msk.f32.gmra.mxu0 %vm268_vm0, %v2599_v22  ;;  %v1987_v10 = vld [vmem:[%s3785_s29 + $0xe4] sm:$0xff] }
 0x22b   : > { %v3105_v37 = vmul.f32 %v2948_v46, %v2853_v23  ;;  %v2601_v46 = vld [vmem:[%s3785_s29 + $0xe6] sm:$0xff] }
 0x22c   : > { %v2144_v35 = vpop.f32.mrf.mxu2  ;;  %v2913_v23 = vld [vmem:[%s4722_s2 + $0xe8] sm:$0xff] }
 0x22d   : > { %v3141_v36 = vadd.f32 %v3140_v41, %v3105_v37  ;;  %v3186_v3 = vmul.f32 %v3105_v37, %v3105_v37  ;;  %v2240_v61 = vadd.f32 %v2144_v35, %v1933_v42  ;;  %v2451_v12 = vpop.f32.mrf.mxu3  ;;  %v2958_v42 = vpop.permute.xlu1 %2957 }
 0x22e   : > { %v1840_v59 = vpop.f32.mrf.mxu1  ;;  %3067 = vperm.xlu2 %3699, %v2913_v23  }
 0x22f   : > { %v3221_v48 = vadd.f32 %v3220_v26, %v3186_v3  ;;  %v2547_v53 = vadd.f32 %v2451_v12, %v2240_v61  ;;  %v2761_v1 = vpop.f32.mrf.mxu0  ;;  %v1934_v41 = vadd.f32 %v1840_v59, %v4138_v8  ;;  %v1988_v59 = vld [vmem:[%s3785_s29 + $0xec] sm:$0xff] }
 0x231   : > { %v2854_v0 = vadd.f32 %v2758_v45, %v2547_v53  ;;  %3541 = vmatmul.msk.f32.gmra.mxu1 %vm268_vm0, %v4538_v51  ;;  %3578 = vmatmul.msk.f32.gmra.mxu2 %vm268_vm0, %v1986_v60  ;;  %v2294_v51 = vld [vmem:[%s3785_s29 + $0xe5] sm:$0xff] }
 0x232   : > { %3615 = vmatmul.msk.f32.gmra.mxu3 %vm268_vm0, %v2293_v38  ;;  %3652 = vmatmul.msk.f32.gmra.mxu0 %vm268_vm0, %v2600_v49  ;;  %v2916_v49 = vld [vmem:[%s4722_s2 + $0x100] sm:$0xff] }
 0x233   : > { %v3106_v20 = vmul.f32 %v2953_v39, %v2854_v0 }
 0x234   : > { %v2147_v43 = vpop.f32.mrf.mxu2 }
 0x235   : > { %v3142_v24 = vadd.f32 %v3141_v36, %v3106_v20  ;;  %v3187_v2 = vmul.f32 %v3106_v20, %v3106_v20  ;;  %v2241_v50 = vadd.f32 %v2147_v43, %v1934_v41  ;;  %v2454_v26 = vpop.f32.mrf.mxu3 }
 0x236   : > { %v1843_v11 = vpop.f32.mrf.mxu1  ;;  %3082 = vperm.xlu2 %3699, %v2916_v49  }
 0x237   : > { %v3222_v45 = vadd.f32 %v3221_v48, %v3187_v2  ;;  %v2548_v22 = vadd.f32 %v2454_v26, %v2241_v50  ;;  %v2764_v27 = vpop.f32.mrf.mxu0  ;;  %v1935_v37 = vadd.f32 %v1843_v11, %v4148_v33  ;;  %v1989_v26 = vld [vmem:[%s3785_s29 + $0xf4] sm:$0xff] }
 0x239   : > { %v2855_v8 = vadd.f32 %v2761_v1, %v2548_v22  ;;  %3542 = vmatmul.msk.f32.gmra.mxu1 %vm268_vm0, %v1985_v44  ;;  %3579 = vmatmul.msk.f32.gmra.mxu2 %vm268_vm0, %v1987_v10  ;;  %v2295_v44 = vld [vmem:[%s3785_s29 + $0xed] sm:$0xff] }
 0x23a   : > { %3616 = vmatmul.msk.f32.gmra.mxu3 %vm268_vm0, %v2294_v51  ;;  %3653 = vmatmul.msk.f32.gmra.mxu0 %vm268_vm0, %v2601_v46  ;;  %v2602_v1 = vld [vmem:[%s3785_s29 + $0xee] sm:$0xff]  ;;  %v2603_v51 = vld [vmem:[%s3785_s29 + $0xf6] sm:$0xff]  ;;  %v2968_v46 = vpop.permute.xlu0 %2967 }
 0x23b   : > { %v3107_v31 = vmul.f32 %v2958_v42, %v2855_v8 }
 0x23c   : > { %v2150_v35 = vpop.f32.mrf.mxu2 }
 0x23d   : > { %v3143_v36 = vadd.f32 %v3142_v24, %v3107_v31  ;;  %v3188_v3 = vmul.f32 %v3107_v31, %v3107_v31  ;;  %v2242_v61 = vadd.f32 %v2150_v35, %v1935_v37  ;;  %v2457_v12 = vpop.f32.mrf.mxu3 }
 0x23e   : > { %v1846_v17 = vpop.f32.mrf.mxu1 }
 0x23f   : > { %v3223_v48 = vadd.f32 %v3222_v45, %v3188_v3  ;;  %v2549_v53 = vadd.f32 %v2457_v12, %v2242_v61  ;;  %v2767_v38 = vpop.f32.mrf.mxu0  ;;  %v1936_v39 = vadd.f32 %v1846_v17, %v4158_v55  ;;  %v1990_v61 = vld [vmem:[%s3785_s29 + $0xfc] sm:$0xff] }
 0x241   : > { %v2856_v33 = vadd.f32 %v2764_v27, %v2549_v53  ;;  %3543 = vmatmul.msk.f32.gmra.mxu1 %vm268_vm0, %v1986_v60  ;;  %3580 = vmatmul.msk.f32.gmra.mxu2 %vm268_vm0, %v1988_v59  ;;  %v2296_v60 = vld [vmem:[%s3785_s29 + $0xf5] sm:$0xff]  ;;  %v2604_v53 = vld [vmem:[%s3785_s29 + $0xfe] sm:$0xff] }
 0x242   : > { %3617 = vmatmul.msk.f32.gmra.mxu3 %vm268_vm0, %v2295_v44  ;;  %3654 = vmatmul.msk.f32.gmra.mxu0 %vm268_vm0, %v2602_v1  ;;  %v2919_v27 = vld [vmem:[%s4722_s2 + $0x118] sm:$0xff]  ;;  %v2973_v44 = vpop.permute.xlu1 %2972 }
 0x243   : > { %v3108_v0 = vmul.f32 %v2963_v52, %v2856_v33  ;;  %3097 = vperm.xlu2 %3699, %v2919_v27  }
 0x244   : > { %v2153_v41 = vpop.f32.mrf.mxu2 }
 0x245   : > { %v3144_v20 = vadd.f32 %v3143_v36, %v3108_v0  ;;  %v3189_v43 = vmul.f32 %v3108_v0, %v3108_v0  ;;  %v2243_v24 = vadd.f32 %v2153_v41, %v1936_v39  ;;  %v2460_v2 = vpop.f32.mrf.mxu3 }
 0x246   : > { %v1849_v50 = vpop.f32.mrf.mxu1 }
 0x247   : > { %v3224_v11 = vadd.f32 %v3223_v48, %v3189_v43  ;;  %v2550_v45 = vadd.f32 %v2460_v2, %v2243_v24  ;;  %v2770_v22 = vpop.f32.mrf.mxu0  ;;  %v1937_v23 = vadd.f32 %v1849_v50, %v4168_v15  ;;  %v2298_v2 = vld [vmem:[%s3785_s29 + $0x105] sm:$0xff] }
 0x249   : > { %v2857_v55 = vadd.f32 %v2767_v38, %v2550_v45  ;;  %3544 = vmatmul.msk.f32.gmra.mxu1 %vm268_vm0, %v1987_v10  ;;  %3581 = vmatmul.msk.f32.gmra.mxu2 %vm268_vm0, %v1989_v26  ;;  %v2297_v10 = vld [vmem:[%s3785_s29 + $0xfd] sm:$0xff]  ;;  %v2978_v45 = vpop.permute.xlu2 %2977 }
 0x24a   : > { %3618 = vmatmul.msk.f32.gmra.mxu3 %vm268_vm0, %v2296_v60  ;;  %3655 = vmatmul.msk.f32.gmra.mxu0 %vm268_vm0, %v2603_v51 }
 0x24b   : > { %v3109_v42 = vmul.f32 %v2968_v46, %v2857_v55 }
 0x24c   : > { %v2156_v8 = vpop.f32.mrf.mxu2 }
 0x24d   : > { %v3145_v37 = vadd.f32 %v3144_v20, %v3109_v42  ;;  %v3190_v31 = vmul.f32 %v3109_v42, %v3109_v42  ;;  %v2244_v35 = vadd.f32 %v2156_v8, %v1937_v23  ;;  %v2463_v36 = vpop.f32.mrf.mxu3  ;;  %v1991_v20 = vld [vmem:[%s3785_s29 + $0x104] sm:$0xff]  ;;  %v1992_v23 = vld [vmem:[%s3785_s29 + $0x10c] sm:$0xff] }
 0x24e   : > { %v1852_v3 = vpop.f32.mrf.mxu1 }
 0x24f   : > { %v3225_v12 = vadd.f32 %v3224_v11, %v3190_v31  ;;  %v2551_v17 = vadd.f32 %v2463_v36, %v2244_v35  ;;  %v2773_v48 = vpop.f32.mrf.mxu0  ;;  %v1938_v15 = vadd.f32 %v1852_v3, %v4178_v40  ;;  %v2605_v11 = vld [vmem:[%s3785_s29 + $0x106] sm:$0xff]  ;;  %v2606_v35 = vld [vmem:[%s3785_s29 + $0x10e] sm:$0xff]  ;;  %v2983_v36 = vpop.permute.xlu0 %2982 }
 0x251   : > { %v2858_v38 = vadd.f32 %v2770_v22, %v2551_v17  ;;  %3545 = vmatmul.msk.f32.gmra.mxu1 %vm268_vm0, %v1988_v59  ;;  %3582 = vmatmul.msk.f32.gmra.mxu2 %vm268_vm0, %v1990_v61 }
 0x252   : > { %3619 = vmatmul.msk.f32.gmra.mxu3 %vm268_vm0, %v2297_v10  ;;  %3656 = vmatmul.msk.f32.gmra.mxu0 %vm268_vm0, %v2604_v53 }
 0x253   : > { %v3110_v1 = vmul.f32 %v2973_v44, %v2858_v38  ;;  %v1993_v38 = vld [vmem:[%s3785_s29 + $0x114] sm:$0xff] }
 0x254   : > { %v2159_v49 = vpop.f32.mrf.mxu2 }
 0x255   : > { %v3146_v52 = vadd.f32 %v3145_v37, %v3110_v1  ;;  %v3191_v33 = vmul.f32 %v3110_v1, %v3110_v1  ;;  %v2245_v39 = vadd.f32 %v2159_v49, %v1938_v15  ;;  %v2466_v0 = vpop.f32.mrf.mxu3 }
 0x256   : > { %v1855_v41 = vpop.f32.mrf.mxu1 }
 0x257   : > { %v3226_v43 = vadd.f32 %v3225_v12, %v3191_v33  ;;  %v1939_v59 = vadd.f32 %v1855_v41, %v4188_v62  ;;  %v2552_v24 = vadd.f32 %v2466_v0, %v2245_v39  ;;  %v2776_v50 = vpop.f32.mrf.mxu0  ;;  %v2607_v33 = vld [vmem:[%s3785_s29 + $0x116] sm:$0xff]  ;;  %v2988_v39 = vpop.permute.xlu1 %2987 }
 0x259   : > { %v2859_v60 = vadd.f32 %v2773_v48, %v2552_v24  ;;  %3546 = vmatmul.msk.f32.gmra.mxu1 %vm268_vm0, %v1989_v26  ;;  %3583 = vmatmul.msk.f32.gmra.mxu2 %vm268_vm0, %v1991_v20  ;;  %v2299_v26 = vld [vmem:[%s3785_s29 + $0x10d] sm:$0xff] }
 0x25a   : > { %3620 = vmatmul.msk.f32.gmra.mxu3 %vm268_vm0, %v2298_v2  ;;  %3657 = vmatmul.msk.f32.gmra.mxu0 %vm268_vm0, %v2605_v11  ;;  %v1994_v11 = vld [vmem:[%s3785_s29 + $0x11c] sm:$0xff] }
 0x25b   : > { %v3111_v40 = vmul.f32 %v2978_v45, %v2859_v60 }
 0x25c   : > { %v2162_v22 = vpop.f32.mrf.mxu2 }
 0x25d   : > { %v3147_v62 = vadd.f32 %v3146_v52, %v3111_v40  ;;  %v3192_v51 = vmul.f32 %v3111_v40, %v3111_v40  ;;  %v2246_v27 = vadd.f32 %v2162_v22, %v1939_v59  ;;  %v2469_v46 = vpop.f32.mrf.mxu3 }
 0x25e   : > { %v1858_v55 = vpop.f32.mrf.mxu1 }
 0x25f   : > { %v3227_v42 = vadd.f32 %v3226_v43, %v3192_v51  ;;  %v1940_v8 = vadd.f32 %v1858_v55, %v4198_v6  ;;  %v2553_v37 = vadd.f32 %v2469_v46, %v2246_v27  ;;  %v2779_v31 = vpop.f32.mrf.mxu0  ;;  %v2993_v51 = vpop.permute.xlu2 %2992 }
 0x261   : > { %v2860_v3 = vadd.f32 %v2776_v50, %v2553_v37  ;;  %3547 = vmatmul.msk.f32.gmra.mxu1 %vm268_vm0, %v1990_v61  ;;  %3584 = vmatmul.msk.f32.gmra.mxu2 %vm268_vm0, %v1992_v23  ;;  %v2300_v61 = vld [vmem:[%s3785_s29 + $0x115] sm:$0xff] }
 0x262   : > { %3621 = vmatmul.msk.f32.gmra.mxu3 %vm268_vm0, %v2299_v26  ;;  %3658 = vmatmul.msk.f32.gmra.mxu0 %vm268_vm0, %v2606_v35 }
 0x263   : > { %v3112_v12 = vmul.f32 %v2983_v36, %v2860_v3 }
 0x264   : > { %v2165_v17 = vpop.f32.mrf.mxu2 }
 0x265   : > { %v3148_v6 = vadd.f32 %v3147_v62, %v3112_v12  ;;  %v3193_v10 = vmul.f32 %v3112_v12, %v3112_v12  ;;  %v2247_v48 = vadd.f32 %v2165_v17, %v1940_v8  ;;  %v2472_v53 = vpop.f32.mrf.mxu3  ;;  %v2608_v62 = vld [vmem:[%s3785_s29 + $0x11e] sm:$0xff]  ;;  %v2609_v17 = vld [vmem:[%s3785_s29 + $0x126] sm:$0xff] }
 0x266   : > { %v1861_v44 = vpop.f32.mrf.mxu1 }
 0x267   : > { %v3228_v15 = vadd.f32 %v3227_v42, %v3193_v10  ;;  %v1941_v1 = vadd.f32 %v1861_v44, %v4208_v29  ;;  %v2554_v49 = vadd.f32 %v2472_v53, %v2247_v48  ;;  %v2782_v52 = vpop.f32.mrf.mxu0 }
 0x269   : > { %v2861_v0 = vadd.f32 %v2779_v31, %v2554_v49  ;;  %3548 = vmatmul.msk.f32.gmra.mxu1 %vm268_vm0, %v1991_v20  ;;  %3585 = vmatmul.msk.f32.gmra.mxu2 %vm268_vm0, %v1993_v38  ;;  %v2301_v20 = vld [vmem:[%s3785_s29 + $0x11d] sm:$0xff] }
 0x26a   : > { %3622 = vmatmul.msk.f32.gmra.mxu3 %vm268_vm0, %v2300_v61  ;;  %3659 = vmatmul.msk.f32.gmra.mxu0 %vm268_vm0, %v2607_v33  ;;  %v1995_v31 = vld [vmem:[%s3785_s29 + $0x124] sm:$0xff]  ;;  %v1996_v61 = vld [vmem:[%s3785_s29 + $0x12c] sm:$0xff] }
 0x26b   : > { %v3113_v41 = vmul.f32 %v2988_v39, %v2861_v0 }
 0x26c   : > { %v2168_v43 = vpop.f32.mrf.mxu2 }
 0x26d   : > { %v3149_v29 = vadd.f32 %v3148_v6, %v3113_v41  ;;  %v3194_v59 = vmul.f32 %v3113_v41, %v3113_v41  ;;  %v2248_v24 = vadd.f32 %v2168_v43, %v1941_v1  ;;  %v2475_v2 = vpop.f32.mrf.mxu3  ;;  %v2998_v6 = vpop.permute.xlu0 %2997  ;;  %v2610_v41 = vld [vmem:[%s3785_s29 + $0x12e] sm:$0xff] }
 0x26e   : > { %v1864_v50 = vpop.f32.mrf.mxu1  ;;  %v3003_v43 = vpop.permute.xlu1 %3002 }
 0x26f   : > { %v3229_v45 = vadd.f32 %v3228_v15, %v3194_v59  ;;  %v1942_v60 = vadd.f32 %v1864_v50, %v4218_v54  ;;  %v2555_v40 = vadd.f32 %v2475_v2, %v2248_v24  ;;  %v2785_v22 = vpop.f32.mrf.mxu0 }
 0x271   : > { %v2862_v27 = vadd.f32 %v2782_v52, %v2555_v40  ;;  %3549 = vmatmul.msk.f32.gmra.mxu1 %vm268_vm0, %v1992_v23  ;;  %3586 = vmatmul.msk.f32.gmra.mxu2 %vm268_vm0, %v1994_v11  ;;  %v2302_v23 = vld [vmem:[%s3785_s29 + $0x125] sm:$0xff]  ;;  %v1997_v40 = vld [vmem:[%s3785_s29 + $0x134] sm:$0xff] }
 0x272   : > { %3623 = vmatmul.msk.f32.gmra.mxu3 %vm268_vm0, %v2301_v20  ;;  %3660 = vmatmul.msk.f32.gmra.mxu0 %vm268_vm0, %v2608_v62 }
 0x273   : > { %v3114_v46 = vmul.f32 %v2993_v51, %v2862_v27  ;;  %v2611_v27 = vld [vmem:[%s3785_s29 + $0x136] sm:$0xff] }
 0x274   : > { %v2171_v55 = vpop.f32.mrf.mxu2 }
 0x275   : > { %v3150_v54 = vadd.f32 %v3149_v29, %v3114_v46  ;;  %v3195_v42 = vmul.f32 %v3114_v46, %v3114_v46  ;;  %v2249_v8 = vadd.f32 %v2171_v55, %v1942_v60  ;;  %v2478_v37 = vpop.f32.mrf.mxu3  ;;  %v3008_v46 = vpop.permute.xlu2 %3007 }
 0x276   : > { %v1867_v26 = vpop.f32.mrf.mxu1 }
 0x277   : > { %v3230_v35 = vadd.f32 %v3229_v45, %v3195_v42  ;;  %v1943_v36 = vadd.f32 %v1867_v26, %v4228_v13  ;;  %v2556_v3 = vadd.f32 %v2478_v37, %v2249_v8  ;;  %v2788_v12 = vpop.f32.mrf.mxu0 }
 0x279   : > { %v2863_v10 = vadd.f32 %v2785_v22, %v2556_v3  ;;  %3550 = vmatmul.msk.f32.gmra.mxu1 %vm268_vm0, %v1993_v38  ;;  %3587 = vmatmul.msk.f32.gmra.mxu2 %vm268_vm0, %v1995_v31  ;;  %v2303_v38 = vld [vmem:[%s3785_s29 + $0x12d] sm:$0xff] }
 0x27a   : > { %3624 = vmatmul.msk.f32.gmra.mxu3 %vm268_vm0, %v2302_v23  ;;  %3661 = vmatmul.msk.f32.gmra.mxu0 %vm268_vm0, %v2609_v17 }
 0x27b   : > { %v3115_v48 = vmul.f32 %v2998_v6, %v2863_v10  ;;  %v2612_v6 = vld [vmem:[%s3785_s29 + $0x13e] sm:$0xff]  ;;  %v3013_v10 = vpop.permute.xlu0 %3012 }
 0x27c   : > { %v2174_v53 = vpop.f32.mrf.mxu2 }
 0x27d   : > { %v3151_v13 = vadd.f32 %v3150_v54, %v3115_v48  ;;  %v3196_v44 = vmul.f32 %v3115_v48, %v3115_v48  ;;  %v2250_v15 = vadd.f32 %v2174_v53, %v1943_v36  ;;  %v2481_v1 = vpop.f32.mrf.mxu3  ;;  %v1998_v36 = vld [vmem:[%s3785_s29 + $0x13c] sm:$0xff] }
 0x27e   : > { %v1870_v49 = vpop.f32.mrf.mxu1 }
 0x27f   : > { %v3231_v52 = vadd.f32 %v3230_v35, %v3196_v44  ;;  %v1944_v33 = vadd.f32 %v1870_v49, %v4238_v7  ;;  %v2557_v39 = vadd.f32 %v2481_v1, %v2250_v15  ;;  %v2791_v0 = vpop.f32.mrf.mxu0 }
 0x281   : > { %v2864_v29 = vadd.f32 %v2788_v12, %v2557_v39  ;;  %3551 = vmatmul.msk.f32.gmra.mxu1 %vm268_vm0, %v1994_v11  ;;  %3588 = vmatmul.msk.f32.gmra.mxu2 %vm268_vm0, %v1996_v61  ;;  %v2304_v11 = vld [vmem:[%s3785_s29 + $0x135] sm:$0xff] }
 0x282   : > { %3625 = vmatmul.msk.f32.gmra.mxu3 %vm268_vm0, %v2303_v38  ;;  %3662 = vmatmul.msk.f32.gmra.mxu0 %vm268_vm0, %v2610_v41 }
 0x283   : > { %v3116_v59 = vmul.f32 %v3003_v43, %v2864_v29 }
 0x284   : > { %v2177_v24 = vpop.f32.mrf.mxu2 }
 0x285   : > { %v3152_v7 = vadd.f32 %v3151_v13, %v3116_v59  ;;  %v3197_v2 = vmul.f32 %v3116_v59, %v3116_v59  ;;  %v2251_v50 = vadd.f32 %v2177_v24, %v1944_v33  ;;  %v2484_v45 = vpop.f32.mrf.mxu3 }
 0x286   : > { %v1873_v60 = vpop.f32.mrf.mxu1 }
 0x287   : > { %v3232_v20 = vadd.f32 %v3231_v52, %v3197_v2  ;;  %v1945_v22 = vadd.f32 %v1873_v60, %v4251_v9  ;;  %v2558_v62 = vadd.f32 %v2484_v45, %v2251_v50  ;;  %v2794_v51 = vpop.f32.mrf.mxu0 }
 0x289   : > { %v2865_v55 = vadd.f32 %v2791_v0, %v2558_v62  ;;  %3552 = vmatmul.msk.f32.gmra.mxu1 %vm268_vm0, %v1995_v31  ;;  %3589 = vmatmul.msk.f32.gmra.mxu2 %vm268_vm0, %v1997_v40  ;;  %v2305_v31 = vld [vmem:[%s3785_s29 + $0x13d] sm:$0xff]  ;;  %s3332_s29 = sshll.u32 %s4729_s12, 1 }
 0x28a   : > { %3626 = vmatmul.msk.f32.gmra.mxu3 %vm268_vm0, %v2304_v11  ;;  %3663 = vmatmul.msk.f32.gmra.mxu0 %vm268_vm0, %v2611_v27  ;;  %s187_s23 = scalar_lea.vmem %s4723_s3, %s3332_s29 }
 0x28b   : > { %v3117_v54 = vmul.f32 %v3008_v46, %v2865_v55 }
 0x28c   : > { %v2180_v42 = vpop.f32.mrf.mxu2 }
 0x28d   : > { %v3153_v9 = vadd.f32 %v3152_v7, %v3117_v54  ;;  %v3198_v8 = vmul.f32 %v3117_v54, %v3117_v54  ;;  %v2252_v37 = vadd.f32 %v2180_v42, %v1945_v22  ;;  %v2487_v26 = vpop.f32.mrf.mxu3  ;;  %v3023_v22 = vpop.permute.xlu2 %3022 }
 0x28e   : > { %v1876_v35 = vpop.f32.mrf.mxu1 }
 0x28f   : > { %v3233_v3 = vadd.f32 %v3232_v20, %v3198_v8  ;;  %v1946_v23 = vadd.f32 %v1876_v35, %v4265_v16  ;;  %v2559_v12 = vadd.f32 %v2487_v26, %v2252_v37  ;;  %v2797_v17 = vpop.f32.mrf.mxu0  ;;  %v3028_v26 = vpop.permute.xlu0 %3027 }
 0x291   : > { %v2866_v48 = vadd.f32 %v2794_v51, %v2559_v12  ;;  %3553 = vmatmul.msk.f32.gmra.mxu1 %vm268_vm0, %v1996_v61  ;;  %3590 = vmatmul.msk.f32.gmra.mxu2 %vm268_vm0, %v1998_v36  ;;  %v3018_v61 = vpop.permute.xlu1 %3017 }
 0x292   : > { %3627 = vmatmul.msk.f32.gmra.mxu3 %vm268_vm0, %v2305_v31  ;;  %3664 = vmatmul.msk.f32.gmra.mxu0 %vm268_vm0, %v2612_v6 }
 0x293   : > { %v3118_v53 = vmul.f32 %v3013_v10, %v2866_v48 }
 0x294   : > { %v2183_v13 = vpop.f32.mrf.mxu2 }
 0x295   : > { %v3154_v44 = vadd.f32 %v3153_v9, %v3118_v53  ;;  %v3199_v15 = vmul.f32 %v3118_v53, %v3118_v53  ;;  %v2253_v1 = vadd.f32 %v2183_v13, %v1946_v23  ;;  %v2490_v16 = vpop.f32.mrf.mxu3 }
 0x296   : > { %v1879_v49 = vpop.f32.mrf.mxu1 }
 0x297   : > { %v3234_v52 = vadd.f32 %v3233_v3, %v3199_v15  ;;  %v1947_v33 = vadd.f32 %v1879_v49, %v4279_v4  ;;  %v2560_v39 = vadd.f32 %v2490_v16, %v2253_v1  ;;  %v2800_v38 = vpop.f32.mrf.mxu0 }
 0x299   : > { %v2867_v0 = vadd.f32 %v2797_v17, %v2560_v39  ;;  %v3033_v13 = vpop.permute.xlu1 %3032 }
 0x29b   : > { %v3119_v41 = vmul.f32 %v3018_v61, %v2867_v0 }
 0x29c   : > { %v2186_v43 = vpop.f32.mrf.mxu2 }
 0x29d   : > { %v3155_v29 = vadd.f32 %v3154_v44, %v3119_v41  ;;  %v3200_v59 = vmul.f32 %v3119_v41, %v3119_v41  ;;  %v2254_v24 = vadd.f32 %v2186_v43, %v1947_v33  ;;  %v2493_v7 = vpop.f32.mrf.mxu3  ;;  %v3038_v41 = vpop.permute.xlu2 %3037 }
 0x29e   : > { %v1882_v2 = vpop.f32.mrf.mxu1 }
 0x29f   : > { %v3235_v50 = vadd.f32 %v3234_v52, %v3200_v59  ;;  %v1948_v45 = vadd.f32 %v1882_v2, %v4292_v21  ;;  %v2561_v60 = vadd.f32 %v2493_v7, %v2254_v24  ;;  %v2803_v40 = vpop.f32.mrf.mxu0 }
 0x2a1   : > { %v2868_v20 = vadd.f32 %v2800_v38, %v2561_v60 }
 0x2a3   : > { %v3120_v62 = vmul.f32 %v3023_v22, %v2868_v20  ;;  %v3043_v20 = vpop.permute.xlu0 %3042 }
 0x2a4   : > { %v2189_v4 = vpop.f32.mrf.mxu2 }
 0x2a5   : > { %v3156_v11 = vadd.f32 %v3155_v29, %v3120_v62  ;;  %v3201_v51 = vmul.f32 %v3120_v62, %v3120_v62  ;;  %v2255_v27 = vadd.f32 %v2189_v4, %v1948_v45  ;;  %v2496_v46 = vpop.f32.mrf.mxu3 }
 0x2a6   : > { %v1885_v55 = vpop.f32.mrf.mxu1 }
 0x2a7   : > { %v3236_v54 = vadd.f32 %v3235_v50, %v3201_v51  ;;  %v1949_v42 = vadd.f32 %v1885_v55, %v4302_v18  ;;  %v2562_v9 = vadd.f32 %v2496_v46, %v2255_v27  ;;  %v2806_v8 = vpop.f32.mrf.mxu0 }
 0x2a9   : > { %v2869_v37 = vadd.f32 %v2803_v40, %v2562_v9 }
 0x2ab   : > { %v3121_v35 = vmul.f32 %v3028_v26, %v2869_v37 }
 0x2ac   : > { %v2192_v21 = vpop.f32.mrf.mxu2 }
 0x2ad   : > { %v3157_v36 = vadd.f32 %v3156_v11, %v3121_v35  ;;  %v3202_v3 = vmul.f32 %v3121_v35, %v3121_v35  ;;  %v2256_v23 = vadd.f32 %v2192_v21, %v1949_v42  ;;  %v2499_v12 = vpop.f32.mrf.mxu3 }
 0x2ae   : > { %v1888_v31 = vpop.f32.mrf.mxu1 }
 0x2af   : > { %v3237_v17 = vadd.f32 %v3236_v54, %v3202_v3  ;;  %v1950_v6 = vadd.f32 %v1888_v31, %v4312_v25  ;;  %v2563_v10 = vadd.f32 %v2499_v12, %v2256_v23  ;;  %v2809_v48 = vpop.f32.mrf.mxu0 }
 0x2b1   : > { %v2870_v53 = vadd.f32 %v2806_v8, %v2563_v10  ;;  %v3048_v8 = vpop.permute.xlu1 %3047  ;;  %v3053_v10 = vpop.permute.xlu2 %3052 }
 0x2b3   : > { %v3122_v44 = vmul.f32 %v3033_v13, %v2870_v53 }
 0x2b4   : > { %v2195_v18 = vpop.f32.mrf.mxu2 }
 0x2b5   : > { %v3158_v15 = vadd.f32 %v3157_v36, %v3122_v44  ;;  %v3203_v1 = vmul.f32 %v3122_v44, %v3122_v44  ;;  %v2257_v16 = vadd.f32 %v2195_v18, %v1950_v6  ;;  %v2502_v49 = vpop.f32.mrf.mxu3 }
 0x2b6   : > { %v1891_v52 = vpop.f32.mrf.mxu1 }
 0x2b7   : > { %v3238_v33 = vadd.f32 %v3237_v17, %v3203_v1  ;;  %v1951_v39 = vadd.f32 %v1891_v52, %v4325_v32  ;;  %v2564_v38 = vadd.f32 %v2502_v49, %v2257_v16  ;;  %v2812_v0 = vpop.f32.mrf.mxu0 }
 0x2b9   : > { %v2871_v61 = vadd.f32 %v2809_v48, %v2564_v38 }
 0x2bb   : > { %v3123_v43 = vmul.f32 %v3038_v41, %v2871_v61 }
 0x2bc   : > { %v2198_v25 = vpop.f32.mrf.mxu2 }
 0x2bd   : > { %v3159_v29 = vadd.f32 %v3158_v15, %v3123_v43  ;;  %v3204_v59 = vmul.f32 %v3123_v43, %v3123_v43  ;;  %v2258_v24 = vadd.f32 %v2198_v25, %v1951_v39  ;;  %v2505_v7 = vpop.f32.mrf.mxu3  ;;  %v3058_v39 = vpop.permute.xlu0 %3057 }
 0x2be   : > { %v1894_v2 = vpop.f32.mrf.mxu1 }
 0x2bf   : > { %v3239_v50 = vadd.f32 %v3238_v33, %v3204_v59  ;;  %v2565_v45 = vadd.f32 %v2505_v7, %v2258_v24  ;;  %v2815_v60 = vpop.f32.mrf.mxu0  ;;  %v1952_v22 = vadd.f32 %v1894_v2, %v4341_v58 }
 0x2c1   : > { %v2872_v40 = vadd.f32 %v2812_v0, %v2565_v45 }
 0x2c3   : > { %v3124_v62 = vmul.f32 %v3043_v20, %v2872_v40 }
 0x2c4   : > { %v2201_v32 = vpop.f32.mrf.mxu2 }
 0x2c5   : > { %v3160_v4 = vadd.f32 %v3159_v29, %v3124_v62  ;;  %v3205_v11 = vmul.f32 %v3124_v62, %v3124_v62  ;;  %v2259_v51 = vadd.f32 %v2201_v32, %v1952_v22  ;;  %v2508_v27 = vpop.f32.mrf.mxu3 }
 0x2c6   : > { %v1897_v46 = vpop.f32.mrf.mxu1 }
 0x2c7   : > { %v3240_v55 = vadd.f32 %v3239_v50, %v3205_v11  ;;  %v2566_v54 = vadd.f32 %v2508_v27, %v2259_v51  ;;  %v2818_v42 = vpop.f32.mrf.mxu0  ;;  %v1953_v37 = vadd.f32 %v1897_v46, %v4354_v30  ;;  %v3063_v50 = vpop.permute.xlu1 %3062 }
 0x2c8   : > { %v3068_v46 = vpop.permute.xlu2 %3067 }
 0x2c9   : > { %v2873_v9 = vadd.f32 %v2815_v60, %v2566_v54 }
 0x2cb   : > { %v3125_v26 = vmul.f32 %v3048_v8, %v2873_v9 }
 0x2cc   : > { %v2204_v35 = vpop.f32.mrf.mxu2 }
 0x2cd   : > { %v3161_v21 = vadd.f32 %v3160_v4, %v3125_v26  ;;  %v3206_v36 = vmul.f32 %v3125_v26, %v3125_v26  ;;  %v2260_v3 = vadd.f32 %v2204_v35, %v1953_v37  ;;  %v2511_v58 = vpop.f32.mrf.mxu3 }
 0x2ce   : > { %v1900_v23 = vpop.f32.mrf.mxu1 }
 0x2cf   : > { %v3241_v12 = vadd.f32 %v3240_v55, %v3206_v36  ;;  %v2567_v31 = vadd.f32 %v2511_v58, %v2260_v3  ;;  %v2821_v17 = vpop.f32.mrf.mxu0  ;;  %v1954_v48 = vadd.f32 %v1900_v23, %v4367_v28  ;;  %v3073_v58 = vpop.permute.xlu0 %3072 }
 0x2d1   : > { %v2874_v6 = vadd.f32 %v2818_v42, %v2567_v31 }
 0x2d3   : > { %v3126_v53 = vmul.f32 %v3053_v10, %v2874_v6 }
 0x2d4   : > { %v2207_v13 = vpop.f32.mrf.mxu2 }
 0x2d5   : > { %v3162_v44 = vadd.f32 %v3161_v21, %v3126_v53  ;;  %v3207_v18 = vmul.f32 %v3126_v53, %v3126_v53  ;;  %v2261_v15 = vadd.f32 %v2207_v13, %v1954_v48  ;;  %v2514_v30 = vpop.f32.mrf.mxu3 }
 0x2d6   : > { %v1903_v1 = vpop.f32.mrf.mxu1 }
 0x2d7   : > { %v3242_v16 = vadd.f32 %v3241_v12, %v3207_v18  ;;  %v2568_v49 = vadd.f32 %v2514_v30, %v2261_v15  ;;  %v2824_v52 = vpop.f32.mrf.mxu0  ;;  %v1955_v38 = vadd.f32 %v1903_v1, %v4380_v19  ;;  %v3725_v18 = vmov 0.0   ;;  %v3078_v30 = vpop.permute.xlu1 %3077 }
 0x2d8   : > { %192 = vst [vmem:[#allocation2] sm:$0x3] %v3725_v18 }
 0x2d9   : > { %v2875_v33 = vadd.f32 %v2821_v17, %v2568_v49 }
 0x2db   : > { %v3127_v0 = vmul.f32 %v3058_v39, %v2875_v33 }
 0x2dc   : > { %v2210_v61 = vpop.f32.mrf.mxu2 }
 0x2dd   : > { %v3163_v41 = vadd.f32 %v3162_v44, %v3127_v0  ;;  %v3208_v43 = vmul.f32 %v3127_v0, %v3127_v0  ;;  %v2262_v25 = vadd.f32 %v2210_v61, %v1955_v38  ;;  %v2517_v28 = vpop.f32.mrf.mxu3 }
 0x2de   : > { %v1906_v29 = vpop.f32.mrf.mxu1 }
 0x2df   : > { %v3243_v59 = vadd.f32 %v3242_v16, %v3208_v43  ;;  %v2569_v24 = vadd.f32 %v2517_v28, %v2262_v25  ;;  %v2827_v7 = vpop.f32.mrf.mxu0  ;;  %v1956_v45 = vadd.f32 %v1906_v29, %v4393_v63  ;;  %v3083_v43 = vpop.permute.xlu2 %3082 }
 0x2e1   : > { %v2876_v2 = vadd.f32 %v2824_v52, %v2569_v24 }
 0x2e3   : > { %v3128_v60 = vmul.f32 %v3063_v50, %v2876_v2 }
 0x2e4   : > { %v2213_v40 = vpop.f32.mrf.mxu2 }
 0x2e5   : > { %v3164_v20 = vadd.f32 %v3163_v41, %v3128_v60  ;;  %v3209_v22 = vmul.f32 %v3128_v60, %v3128_v60  ;;  %v2263_v62 = vadd.f32 %v2213_v40, %v1956_v45  ;;  %v2520_v19 = vpop.f32.mrf.mxu3 }
 0x2e6   : > { %v1909_v32 = vpop.f32.mrf.mxu1 }
 0x2e7   : > { %v3244_v4 = vadd.f32 %v3243_v59, %v3209_v22  ;;  %v2570_v11 = vadd.f32 %v2520_v19, %v2263_v62  ;;  %v2830_v51 = vpop.f32.mrf.mxu0  ;;  %v1957_v55 = vadd.f32 %v1909_v32, %v4406_v5 }
 0x2e9   : > { %v2877_v27 = vadd.f32 %v2827_v7, %v2570_v11 }
 0x2eb   : > { %v3129_v54 = vmul.f32 %v3068_v46, %v2877_v27 }
 0x2ec   : > { %v2216_v42 = vpop.f32.mrf.mxu2 }
 0x2ed   : > { %v3165_v9 = vadd.f32 %v3164_v20, %v3129_v54  ;;  %v3210_v8 = vmul.f32 %v3129_v54, %v3129_v54  ;;  %v2264_v37 = vadd.f32 %v2216_v42, %v1957_v55  ;;  %v2523_v63 = vpop.f32.mrf.mxu3  ;;  %v3088_v20 = vpop.permute.xlu0 %3087 }
 0x2ee   : > { %v1912_v26 = vpop.f32.mrf.mxu1  ;;  %v3093_v42 = vpop.permute.xlu1 %3092 }
 0x2ef   : > { %v3245_v35 = vadd.f32 %v3244_v4, %v3210_v8  ;;  %v2571_v21 = vadd.f32 %v2523_v63, %v2264_v37  ;;  %v2833_v36 = vpop.f32.mrf.mxu0  ;;  %v1958_v23 = vadd.f32 %v1912_v26, %v4419_v34 }
 0x2f1   : > { %v2878_v3 = vadd.f32 %v2830_v51, %v2571_v21 }
 0x2f3   : > { %v3130_v12 = vmul.f32 %v3073_v58, %v2878_v3 }
 0x2f4   : > { %v2219_v31 = vpop.f32.mrf.mxu2 }
 0x2f5   : > { %v3166_v17 = vadd.f32 %v3165_v9, %v3130_v12  ;;  %v3211_v6 = vmul.f32 %v3130_v12, %v3130_v12  ;;  %v2265_v10 = vadd.f32 %v2219_v31, %v1958_v23  ;;  %v2526_v5 = vpop.f32.mrf.mxu3  ;;  %v3098_v23 = vpop.permute.xlu2 %3097 }
 0x2f6   : > { %v1915_v48 = vpop.f32.mrf.mxu1 }
 0x2f7   : > { %v3246_v53 = vadd.f32 %v3245_v35, %v3211_v6  ;;  %v2572_v13 = vadd.f32 %v2526_v5, %v2265_v10  ;;  %v2836_v44 = vpop.f32.mrf.mxu0  ;;  %v1959_v1 = vadd.f32 %v1915_v48, %v4432_v57 }
 0x2f9   : > { %v2879_v15 = vadd.f32 %v2833_v36, %v2572_v13 }
 0x2fb   : > { %v3131_v16 = vmul.f32 %v3078_v30, %v2879_v15  ;;  %v3136_v30 = vld [vmem:[#allocation2] sm:$0x1] }
 0x2fc   : > { %v2222_v49 = vpop.f32.mrf.mxu2 }
 0x2fd   : > { %v3167_v52 = vadd.f32 %v3166_v17, %v3131_v16  ;;  %v3212_v34 = vmul.f32 %v3131_v16, %v3131_v16  ;;  %v2266_v33 = vadd.f32 %v2222_v49, %v1959_v1  ;;  %v2529_v39 = vpop.f32.mrf.mxu3  ;;  %v3180_v49 = vld [vmem:[#allocation2 + $0x1] sm:$0x1] }
 0x2fe   : > { %v1918_v38 = vpop.f32.mrf.mxu1 }
 0x2ff   : > { %v3247_v0 = vadd.f32 %v3246_v53, %v3212_v34  ;;  %v2573_v61 = vadd.f32 %v2529_v39, %v2266_v33  ;;  %v2839_v25 = vpop.f32.mrf.mxu0  ;;  %v1960_v28 = vadd.f32 %v1918_v38, %v4445_v56 }
 0x301   : > { %v2880_v41 = vadd.f32 %v2836_v44, %v2573_v61 }
 0x303   : > { %v3132_v29 = vmul.f32 %v3083_v43, %v2880_v41 }
 0x304   : > { %v2225_v59 = vpop.f32.mrf.mxu2 }
 0x305   : > { %v3168_v24 = vadd.f32 %v3167_v52, %v3132_v29  ;;  %v3213_v7 = vmul.f32 %v3132_v29, %v3132_v29  ;;  %v2267_v2 = vadd.f32 %v2225_v59, %v1960_v28  ;;  %v2532_v57 = vpop.f32.mrf.mxu3 }
 0x306   : > { %v1921_v50 = vpop.f32.mrf.mxu1 }
 0x307   : > { %v3248_v45 = vadd.f32 %v3247_v0, %v3213_v7  ;;  %v2574_v60 = vadd.f32 %v2532_v57, %v2267_v2  ;;  %v1961_v22 = vadd.f32 %v1921_v50, %v4458_v47  ;;  %v2842_v32 = vpop.f32.mrf.mxu0 }
 0x309   : > { %v2881_v40 = vadd.f32 %v2839_v25, %v2574_v60 }
 0x30b   : > { %v3133_v62 = vmul.f32 %v3088_v20, %v2881_v40 }
 0x30c   : > { %v2228_v19 = vpop.f32.mrf.mxu2 }
 0x30d   : > { %v3169_v4 = vadd.f32 %v3168_v24, %v3133_v62  ;;  %v3214_v11 = vmul.f32 %v3133_v62, %v3133_v62  ;;  %v2268_v51 = vadd.f32 %v2228_v19, %v1961_v22  ;;  %v2535_v56 = vpop.f32.mrf.mxu3 }
 0x30e   : > { %v1924_v55 = vpop.f32.mrf.mxu1 }
 0x30f   : > { %v3249_v27 = vadd.f32 %v3248_v45, %v3214_v11  ;;  %v2575_v46 = vadd.f32 %v2535_v56, %v2268_v51  ;;  %v1962_v9 = vadd.f32 %v1924_v55, %v4471_v14  ;;  %v2845_v21 = vpop.f32.mrf.mxu0 }
 0x311   : > { %v2882_v54 = vadd.f32 %v2842_v32, %v2575_v46 }
 0x313   : > { %v3134_v8 = vmul.f32 %v3093_v42, %v2882_v54 }
 0x314   : > { %v2231_v37 = vpop.f32.mrf.mxu2 }
 0x315   : > { %v3170_v63 = vadd.f32 %v3169_v4, %v3134_v8  ;;  %v3215_v26 = vmul.f32 %v3134_v8, %v3134_v8  ;;  %v2269_v35 = vadd.f32 %v2231_v37, %v1962_v9  ;;  %v2538_v47 = vpop.f32.mrf.mxu3 }
 0x317   : > { %v3250_v36 = vadd.f32 %v3249_v27, %v3215_v26  ;;  %v2576_v3 = vadd.f32 %v2538_v47, %v2269_v35 }
 0x319   : > { %v2883_v58 = vadd.f32 %v2845_v21, %v2576_v3 }
 0x31b   : > { %v3135_v12 = vmul.f32 %v3098_v23, %v2883_v58 }
 0x31d   : > { %v3171_v31 = vadd.f32 %v3170_v63, %v3135_v12  ;;  %v3216_v17 = vmul.f32 %v3135_v12, %v3135_v12 }
 0x31f   : > { %v3172_v6 = vrot.slane %v3171_v31, 4  ;;  %v3251_v10 = vadd.f32 %v3250_v36, %v3216_v17 }
 0x321   : > { %v3173_v5 = vadd.f32 %v3172_v6, %v3171_v31  ;;  %v3252_v48 = vrot.slane %v3251_v10, 4 }
 0x323   : > { %v3174_v14 = vrot.slane %v3173_v5, 2  ;;  %v3253_v53 = vadd.f32 %v3252_v48, %v3251_v10 }
 0x325   : > { %v3175_v13 = vadd.f32 %v3174_v14, %v3173_v5  ;;  %v3254_v44 = vrot.slane %v3253_v53, 2 }
 0x327   : > { %v3176_v18 = vrot.slane %v3175_v13, 1  ;;  %v3255_v15 = vadd.f32 %v3254_v44, %v3253_v53 }
 0x329   : > { %v3177_v1 = vadd.f32 %v3176_v18, %v3175_v13  ;;  %v3256_v16 = vrot.slane %v3255_v15, 1 }
 0x32b   : > { %v3178_v52 = vadd.f32 %v3177_v1, %v3136_v30  ;;  %v3257_v34 = vadd.f32 %v3256_v16, %v3255_v15 }
 0x32d   : > { %3179 = vst [vmem:[#allocation2] sm:$0x1] %v3178_v52  ;;  %v3258_v33 = vadd.f32 %v3257_v34, %v3180_v49 }
 0x32f   : > { %3259 = vst [vmem:[#allocation2 + $0x1] sm:$0x1] %v3258_v33 }
 0x336   : > { %v3263_v39 = vld [vmem:[#allocation2] sm:$0x3] }
 0x337   : > { %3264 = vst [vmem:[%s187_s23] sm:$0x3] %v3263_v39 }
 0x338 PF: > { %s13_s14 = sadd.s32 1, %s3722_s14   ;;  %s4724_s12 = smov %s3718_s13 }
 0x339   : > { %p10_p5 = scmp.ge.s32.totalorder %s13_s14, 4   ;;  %s4725_s13 = smov %s4727_s15 }
 0x33b   :  { %12 = sbr.rel (!%p10_p5) target bundleno = 2 (0x2), region = 78 }

</bundles_post_ra>
